<compile_context>
chip_gen: v5e
topology: v5e:2x2
jax: 0.10.0
libtpu: 0.0.40
codegen_flags: <defaults>
</compile_context>

<pallas_src>
import functools

import jax
import jax.numpy as jnp
from jax import lax
from jax.experimental import pallas as pl
from jax.experimental.pallas import tpu as pltpu

COMPUTE_DTYPE = jnp.bfloat16   # MXU-native input dtype (accumulation is f32)
LANE = 128                     # channel axis padded to a multiple of this
BN_EPS = 1e-5
ROW_TILE = 512                 # row tile for the elementwise kernels


def _round_up(x, m):
    return ((x + m - 1) // m) * m


# ---------------------------------------------------------------------------
# Conv (KxK, stride s, zero pad p) + per-channel batch-stat partials.
# ---------------------------------------------------------------------------
def _conv_taps_kernel(x_ref, w_ref, o_ref, s_ref, *, tap_starts, wq, wo):
    """One (image, cout-tile) grid step.

    x_ref: (1, R, Cin)    flattened stride-parity planes of the padded input
    w_ref: (T, Cin, tco)  per-tap weight matrices (bf16)
    o_ref: (1, L, tco)    conv output rows, L = Ho*Wq
    s_ref: (1, 2, tco)    per-image [sum, sum_sq] over valid output positions
    """
    L = o_ref.shape[1]
    tco = o_ref.shape[2]
    acc = jnp.zeros((L, tco), jnp.float32)
    for t, start in enumerate(tap_starts):          # static unroll (<= 9 taps)
        patch = x_ref[0, start:start + L, :]        # (L, Cin) contiguous rows
        acc = acc + jnp.dot(patch, w_ref[t],
                            preferred_element_type=jnp.float32)
    o_ref[0] = acc.astype(o_ref.dtype)
    # Validity mask over output rows (columns >= Wo of each output row are
    # junk); generated in-kernel (VPU iota) instead of streamed from HBM.
    row_pos = lax.broadcasted_iota(jnp.int32, (L, 1), 0)
    mask = ((row_pos % wq) < wo).astype(jnp.float32)
    acc_m = acc * mask
    ssum = jnp.sum(acc_m, axis=0, keepdims=True)          # (1, tco)
    ssq = jnp.sum(acc_m * acc, axis=0, keepdims=True)     # (1, tco)
    s_ref[0] = jnp.concatenate([ssum, ssq], axis=0)       # single (2, tco) store


def conv2d_with_stats(x_nhwc, w, *, stride, padding, out_w_extra=2):
    """KxK conv (PyTorch semantics, bias-free) as K*K accumulated MXU matmuls.

    Returns:
      out:   (N, Ho*Wq, Coutp) f32 with Wq = Wo + out_w_extra (cols >= Wo are
             junk), channels zero-padded to a multiple of 128.
      stats: (2, Coutp) f32 = [sum, sum_of_squares] over the N*Ho*Wo valid
             output positions (training-mode BatchNorm statistics).
      dims:  (Ho, Wo, Wq)
    """
    N, H, W, Cin = x_nhwc.shape
    Cout, Cin_w, k, _ = w.shape
    assert Cin >= Cin_w
    s = stride
    Ho = (H + 2 * padding - k) // s + 1
    Wo = (W + 2 * padding - k) // s + 1
    eh = (k - 1) // s                       # extra rows per parity plane
    ew = (k - 1) // s                       # natural extra cols
    assert out_w_extra >= ew
    Hq, Wq = Ho + eh, Wo + out_w_extra
    Hp, Wp = s * Hq, s * Wq                 # padded input extent
    assert Hp - H - padding >= 0 and Wp - W - padding >= 0

    xb = x_nhwc.astype(COMPUTE_DTYPE)
    xp = jnp.pad(xb, ((0, 0),
                      (padding, Hp - H - padding),
                      (padding, Wp - W - padding),
                      (0, 0)))

    # Stride-parity planes: plane(ph,pw)[i, j] = xp[s*i+ph, s*j+pw].
    # Tap (kh, kw) then reads a contiguous row range of its flattened plane.
    plane_keys, tap_starts = [], []
    for kh in range(k):
        for kw in range(k):
            pk = (kh % s, kw % s)
            if pk not in plane_keys:
                plane_keys.append(pk)
            tap_starts.append(plane_keys.index(pk) * Hq * Wq
                              + (kh // s) * Wq + (kw // s))
    planes = jnp.concatenate(
        [xp[:, ph::s, pw::s, :].reshape(N, Hq * Wq, Cin)
         for (ph, pw) in plane_keys], axis=1)
    if ew:
        # trailing zero rows: junk-tolerant tap slices may overrun by <= ew
        planes = jnp.pad(planes, ((0, 0), (0, ew), (0, 0)))
    R = planes.shape[1]

    # weights: (Cout, Cin_w, k, k) -> (k*k, Cin, Coutp), zero padded, bf16
    Coutp = _round_up(Cout, LANE)
    wt = jnp.transpose(w, (2, 3, 1, 0)).reshape(k * k, Cin_w, Cout)
    wt = jnp.pad(wt, ((0, 0), (0, Cin - Cin_w), (0, Coutp - Cout)))
    wt = wt.astype(COMPUTE_DTYPE)

    L = Ho * Wq
    tco = 256 if Coutp % 256 == 0 else LANE      # MXU-friendly output tile
    grid = (N, Coutp // tco)
    # TODO(synk): for very large spatial planes add an H-tile grid axis so the
    # per-step VMEM footprint stays bounded on 64 MiB-VMEM parts.

    kernel = functools.partial(_conv_taps_kernel,
                               tap_starts=tuple(tap_starts), wq=Wq, wo=Wo)
    flops = 2 * N * L * k * k * Cin * Coutp
    bytes_accessed = (planes.size * 2 + wt.size * 2
                      + N * L * Coutp * 4 + N * 2 * Coutp * 4)

    out, stats = pl.pallas_call(
        kernel,
        out_shape=(jax.ShapeDtypeStruct((N, L, Coutp), jnp.float32),
                   jax.ShapeDtypeStruct((N, 2, Coutp), jnp.float32)),
        grid_spec=pltpu.PrefetchScalarGridSpec(
            num_scalar_prefetch=0,
            grid=grid,
            in_specs=[
                pl.BlockSpec((1, R, Cin), lambda n, co: (n, 0, 0)),
                pl.BlockSpec((k * k, Cin, tco), lambda n, co: (0, 0, co)),
            ],
            out_specs=[
                pl.BlockSpec((1, L, tco), lambda n, co: (n, 0, co)),
                pl.BlockSpec((1, 2, tco), lambda n, co: (n, 0, co)),
            ],
        ),
        compiler_params=pltpu.CompilerParams(
            dimension_semantics=("parallel", "parallel")),
        cost_estimate=pl.CostEstimate(flops=flops, transcendentals=0,
                                      bytes_accessed=bytes_accessed),
    )(planes, wt)

    return out, jnp.sum(stats, axis=0), (Ho, Wo, Wq)


# ---------------------------------------------------------------------------
# Fused elementwise kernels (tiled, lane-dense).
# ---------------------------------------------------------------------------
def _scale_shift_relu_kernel(x_ref, sc_ref, sh_ref, o_ref):
    # bn1 (folded into scale/shift) + ReLU
    y = x_ref[...] * sc_ref[...] + sh_ref[...]
    o_ref[...] = jnp.maximum(y, 0.0).astype(o_ref.dtype)


def _bn_add_relu_kernel(a_ref, b_ref, sa_ref, ha_ref, sb_ref, hb_ref, o_ref):
    # bn2(a) + shortcut_bn(b) + residual add + ReLU, all folded per-channel
    y = (a_ref[...] * sa_ref[...] + ha_ref[...]
         + b_ref[...].astype(jnp.float32) * sb_ref[...] + hb_ref[...])
    o_ref[...] = jnp.maximum(y, 0.0).astype(o_ref.dtype)


def _elementwise_call(kernel, mats, vecs, out_dtype):
    """Tiled launch over (M, C) matrices; vecs are per-channel (1, C)."""
    M, C = mats[0].shape
    tr = min(ROW_TILE, M)
    grid = (pl.cdiv(M, tr),)
    mat_spec = pl.BlockSpec((tr, C), lambda i: (i, 0))
    vec_spec = pl.BlockSpec((1, C), lambda i: (0, 0))
    return pl.pallas_call(
        kernel,
        out_shape=jax.ShapeDtypeStruct((M, C), out_dtype),
        grid_spec=pltpu.PrefetchScalarGridSpec(
            num_scalar_prefetch=0,
            grid=grid,
            in_specs=[mat_spec] * len(mats) + [vec_spec] * len(vecs),
            out_specs=mat_spec,
        ),
        compiler_params=pltpu.CompilerParams(
            dimension_semantics=("parallel",)),
    )(*mats, *vecs)


def _bn_fold(stats, gamma, beta, count, cpad):
    """Fold training-mode BatchNorm into per-channel scale/shift (f32)."""
    gp = jnp.pad(gamma.astype(jnp.float32), (0, cpad - gamma.shape[0]))
    bp = jnp.pad(beta.astype(jnp.float32), (0, cpad - beta.shape[0]))
    mean = stats[0] / count
    var = jnp.maximum(stats[1] / count - mean * mean, 0.0)   # biased variance
    scale = gp * jax.lax.rsqrt(var + BN_EPS)
    shift = bp - mean * scale
    return scale.reshape(1, cpad), shift.reshape(1, cpad)


# ---------------------------------------------------------------------------
# BasicBlock forward (NCHW in / NCHW out, PyTorch training-mode BN semantics)
# ---------------------------------------------------------------------------
def _basic_block_forward(x_nchw, params, stride):
    N, Cin, H, W = x_nchw.shape
    Cout = params["conv1_w"].shape[0]
    Coutp = _round_up(Cout, LANE)
    x_nhwc = jnp.transpose(x_nchw, (0, 2, 3, 1)).astype(jnp.float32)

    # conv1 (3x3, stride, pad 1) -> bn1 -> relu
    c1, st1, (Ho, Wo, Wq) = conv2d_with_stats(
        x_nhwc, params["conv1_w"], stride=stride, padding=1)
    count = float(N * Ho * Wo)
    Mp = N * Ho * Wq
    s1, h1 = _bn_fold(st1, params["bn1_g"], params["bn1_b"], count, Coutp)
    a1 = _elementwise_call(_scale_shift_relu_kernel,
                           [c1.reshape(Mp, Coutp)], [s1, h1], COMPUTE_DTYPE)

    # conv2 (3x3, stride 1, pad 1) -> bn2 (apply deferred to the fused kernel)
    a1_nhwc = a1.reshape(N, Ho, Wq, Coutp)[:, :, :Wo, :]     # drop junk cols
    c2, st2, dims2 = conv2d_with_stats(
        a1_nhwc, params["conv2_w"], stride=1, padding=1)
    assert dims2 == (Ho, Wo, Wq)
    s2, h2 = _bn_fold(st2, params["bn2_g"], params["bn2_b"], count, Coutp)

    # shortcut branch
    if stride != 1 or Cin != Cout:
        cs, sts, dims_s = conv2d_with_stats(
            x_nhwc, params["sc_w"], stride=stride, padding=0)
        assert dims_s == (Ho, Wo, Wq)
        ss, hs = _bn_fold(sts, params["sc_g"], params["sc_b"], count, Coutp)
        sc2d = cs.reshape(Mp, Coutp)
    else:
        sc2d = jnp.pad(x_nhwc, ((0, 0), (0, 0), (0, Wq - Wo),
                                (0, Coutp - Cin))).reshape(Mp, Coutp)
        ss = jnp.ones((1, Coutp), jnp.float32)
        hs = jnp.zeros((1, Coutp), jnp.float32)

    # bn2 + shortcut-bn + residual add + relu : one fused tiled kernel
    out2d = _elementwise_call(_bn_add_relu_kernel,
                              [c2.reshape(Mp, Coutp), sc2d],
                              [s2, h2, ss, hs], jnp.float32)
    out = out2d.reshape(N, Ho, Wq, Coutp)[:, :, :Wo, :Cout]
    return jnp.transpose(out, (0, 3, 1, 2))


basic_block_forward = jax.jit(_basic_block_forward, static_argnums=2)


# ---------------------------------------------------------------------------
# Parameter init + plain-JAX reference (for a loose numerical self-check).
# ---------------------------------------------------------------------------
def init_basic_block_params(key, in_channels, out_channels, stride):
    ks = jax.random.split(key, 8)
    p = {
        "conv1_w": 0.1 * jax.random.normal(ks[0], (out_channels, in_channels, 3, 3), jnp.float32),
        "bn1_g": 1.0 + 0.1 * jax.random.normal(ks[1], (out_channels,), jnp.float32),
        "bn1_b": 0.1 * jax.random.normal(ks[2], (out_channels,), jnp.float32),
        "conv2_w": 0.1 * jax.random.normal(ks[3], (out_channels, out_channels, 3, 3), jnp.float32),
        "bn2_g": 1.0 + 0.1 * jax.random.normal(ks[4], (out_channels,), jnp.float32),
        "bn2_b": 0.1 * jax.random.normal(ks[5], (out_channels,), jnp.float32),
    }
    if stride != 1 or in_channels != out_channels:
        p["sc_w"] = 0.1 * jax.random.normal(ks[6], (out_channels, in_channels, 1, 1), jnp.float32)
        p["sc_g"] = 1.0 + 0.1 * jax.random.normal(ks[7], (out_channels,), jnp.float32)
        p["sc_b"] = jnp.zeros((out_channels,), jnp.float32)
    return p


def _reference_forward(x_nchw, params, stride):
    """f32 reference matching the PyTorch module's training-mode forward."""
    def conv(x, w, s, p):
        return jax.lax.conv_general_dilated(
            x, w, window_strides=(s, s), padding=[(p, p), (p, p)],
            dimension_numbers=("NCHW", "OIHW", "NCHW"))

    def bn(x, g, b):
        mean = jnp.mean(x, axis=(0, 2, 3), keepdims=True)
        var = jnp.mean(jnp.square(x - mean), axis=(0, 2, 3), keepdims=True)
        return ((x - mean) * jax.lax.rsqrt(var + BN_EPS)
                * g.reshape(1, -1, 1, 1) + b.reshape(1, -1, 1, 1))

    out = jax.nn.relu(bn(conv(x_nchw, params["conv1_w"], stride, 1),
                         params["bn1_g"], params["bn1_b"]))
    out = bn(conv(out, params["conv2_w"], 1, 1),
             params["bn2_g"], params["bn2_b"])
    if "sc_w" in params:
        sc = bn(conv(x_nchw, params["sc_w"], stride, 0),
                params["sc_g"], params["sc_b"])
    else:
        sc = x_nchw
    return jax.nn.relu(out + sc)


# ---------------------------------------------------------------------------
if __name__ == "__main__":
    key = jax.random.PRNGKey(0)
    k_x, k_p1, k_p2 = jax.random.split(key, 3)

    # Case 1: downsampling block (stride=2, channel expansion -> conv shortcut)
    N, Cin, H, W = 2, 4, 16, 16
    Cout, stride = 8, 2
    x = jax.random.normal(k_x, (N, Cin, H, W), jnp.float32)
    params = init_basic_block_params(k_p1, Cin, Cout, stride)
    out = basic_block_forward(x, params, stride)
    jax.block_until_ready(out)
    assert out.shape == (N, Cout, H // stride, W // stride)
    err = float(jnp.max(jnp.abs(out - _reference_forward(x, params, stride))))
    assert err < 0.15, f"case1 max abs err {err}"

    # Case 2: identity-shortcut block (stride=1, same channels)
    params_id = init_basic_block_params(k_p2, Cout, Cout, 1)
    out2 = basic_block_forward(out, params_id, 1)
    jax.block_until_ready(out2)
    assert out2.shape == out.shape
    err2 = float(jnp.max(jnp.abs(out2 - _reference_forward(out, params_id, 1))))
    assert err2 < 0.15, f"case2 max abs err {err2}"

    print("KERNEL_OK")
</pallas_src>

<mosaic_0001>
module attributes {stable_mosaic.version = 11 : i64} {
  func.func @_conv_taps_kernel(%arg0: i32, %arg1: i32, %arg2: memref<1x361x4xbf16, #tpu.memory_space<vmem>>, %arg3: memref<9x4x128xbf16, #tpu.memory_space<vmem>>, %arg4: memref<1x80x128xf32, #tpu.memory_space<vmem>>, %arg5: memref<1x2x128xf32, #tpu.memory_space<vmem>>) attributes {dimension_semantics = [#tpu.dimension_semantics<parallel>, #tpu.dimension_semantics<parallel>], iteration_bounds = array<i64: 2, 1>, scalar_prefetch = 0 : i64, scratch_operands = 0 : i64, tpu.core_type = #tpu.core_type<tc>, window_params = [{transform_indices = @transform_0, window_bounds = array<i64: 1, 361, 4>}, {transform_indices = @transform_1, window_bounds = array<i64: 9, 4, 128>}, {transform_indices = @transform_2, window_bounds = array<i64: 1, 80, 128>}, {transform_indices = @transform_3, window_bounds = array<i64: 1, 2, 128>}]} {
    %cst = arith.constant 0.000000e+00 : f32
    %0 = vector.broadcast %cst : f32 to vector<80x128xf32>
    %c0 = arith.constant 0 : index
    %c0_0 = arith.constant 0 : index
    %c0_1 = arith.constant 0 : index
    %1 = vector.load %arg2[%c0, %c0_0, %c0_1] : memref<1x361x4xbf16, #tpu.memory_space<vmem>>, vector<1x80x4xbf16>
    %2 = vector.shape_cast %1 : vector<1x80x4xbf16> to vector<80x4xbf16>
    %c0_2 = arith.constant 0 : index
    %c0_3 = arith.constant 0 : index
    %c0_4 = arith.constant 0 : index
    %3 = vector.load %arg3[%c0_2, %c0_3, %c0_4] : memref<9x4x128xbf16, #tpu.memory_space<vmem>>, vector<1x4x128xbf16>
    %4 = vector.shape_cast %3 : vector<1x4x128xbf16> to vector<4x128xbf16>
    %cst_5 = arith.constant dense<0.000000e+00> : vector<80x128xf32>
    %5 = tpu.matmul %2, %4, %cst_5 {dimension_numbers = #tpu.dot_dimension_numbers<[1], [0], [0], [1], [0, 0, 1, 1], [], []>} : vector<80x4xbf16>, vector<4x128xbf16>, vector<80x128xf32> -> vector<80x128xf32>
    %6 = arith.addf %0, %5 : vector<80x128xf32>
    %c0_6 = arith.constant 0 : index
    %c90 = arith.constant 90 : index
    %c0_7 = arith.constant 0 : index
    %7 = vector.load %arg2[%c0_6, %c90, %c0_7] : memref<1x361x4xbf16, #tpu.memory_space<vmem>>, vector<1x80x4xbf16>
    %8 = vector.shape_cast %7 : vector<1x80x4xbf16> to vector<80x4xbf16>
    %c1 = arith.constant 1 : index
    %c0_8 = arith.constant 0 : index
    %c0_9 = arith.constant 0 : index
    %9 = vector.load %arg3[%c1, %c0_8, %c0_9] : memref<9x4x128xbf16, #tpu.memory_space<vmem>>, vector<1x4x128xbf16>
    %10 = vector.shape_cast %9 : vector<1x4x128xbf16> to vector<4x128xbf16>
    %cst_10 = arith.constant dense<0.000000e+00> : vector<80x128xf32>
    %11 = tpu.matmul %8, %10, %cst_10 {dimension_numbers = #tpu.dot_dimension_numbers<[1], [0], [0], [1], [0, 0, 1, 1], [], []>} : vector<80x4xbf16>, vector<4x128xbf16>, vector<80x128xf32> -> vector<80x128xf32>
    %12 = arith.addf %6, %11 : vector<80x128xf32>
    %c0_11 = arith.constant 0 : index
    %c1_12 = arith.constant 1 : index
    %c0_13 = arith.constant 0 : index
    %13 = vector.load %arg2[%c0_11, %c1_12, %c0_13] : memref<1x361x4xbf16, #tpu.memory_space<vmem>>, vector<1x80x4xbf16>
    %14 = vector.shape_cast %13 : vector<1x80x4xbf16> to vector<80x4xbf16>
    %c2 = arith.constant 2 : index
    %c0_14 = arith.constant 0 : index
    %c0_15 = arith.constant 0 : index
    %15 = vector.load %arg3[%c2, %c0_14, %c0_15] : memref<9x4x128xbf16, #tpu.memory_space<vmem>>, vector<1x4x128xbf16>
    %16 = vector.shape_cast %15 : vector<1x4x128xbf16> to vector<4x128xbf16>
    %cst_16 = arith.constant dense<0.000000e+00> : vector<80x128xf32>
    %17 = tpu.matmul %14, %16, %cst_16 {dimension_numbers = #tpu.dot_dimension_numbers<[1], [0], [0], [1], [0, 0, 1, 1], [], []>} : vector<80x4xbf16>, vector<4x128xbf16>, vector<80x128xf32> -> vector<80x128xf32>
    %18 = arith.addf %12, %17 : vector<80x128xf32>
    %c0_17 = arith.constant 0 : index
    %c180 = arith.constant 180 : index
    %c0_18 = arith.constant 0 : index
    %19 = vector.load %arg2[%c0_17, %c180, %c0_18] : memref<1x361x4xbf16, #tpu.memory_space<vmem>>, vector<1x80x4xbf16>
    %20 = vector.shape_cast %19 : vector<1x80x4xbf16> to vector<80x4xbf16>
    %c3 = arith.constant 3 : index
    %c0_19 = arith.constant 0 : index
    %c0_20 = arith.constant 0 : index
    %21 = vector.load %arg3[%c3, %c0_19, %c0_20] : memref<9x4x128xbf16, #tpu.memory_space<vmem>>, vector<1x4x128xbf16>
    %22 = vector.shape_cast %21 : vector<1x4x128xbf16> to vector<4x128xbf16>
    %cst_21 = arith.constant dense<0.000000e+00> : vector<80x128xf32>
    %23 = tpu.matmul %20, %22, %cst_21 {dimension_numbers = #tpu.dot_dimension_numbers<[1], [0], [0], [1], [0, 0, 1, 1], [], []>} : vector<80x4xbf16>, vector<4x128xbf16>, vector<80x128xf32> -> vector<80x128xf32>
    %24 = arith.addf %18, %23 : vector<80x128xf32>
    %c0_22 = arith.constant 0 : index
    %c270 = arith.constant 270 : index
    %c0_23 = arith.constant 0 : index
    %25 = vector.load %arg2[%c0_22, %c270, %c0_23] : memref<1x361x4xbf16, #tpu.memory_space<vmem>>, vector<1x80x4xbf16>
    %26 = vector.shape_cast %25 : vector<1x80x4xbf16> to vector<80x4xbf16>
    %c4 = arith.constant 4 : index
    %c0_24 = arith.constant 0 : index
    %c0_25 = arith.constant 0 : index
    %27 = vector.load %arg3[%c4, %c0_24, %c0_25] : memref<9x4x128xbf16, #tpu.memory_space<vmem>>, vector<1x4x128xbf16>
    %28 = vector.shape_cast %27 : vector<1x4x128xbf16> to vector<4x128xbf16>
    %cst_26 = arith.constant dense<0.000000e+00> : vector<80x128xf32>
    %29 = tpu.matmul %26, %28, %cst_26 {dimension_numbers = #tpu.dot_dimension_numbers<[1], [0], [0], [1], [0, 0, 1, 1], [], []>} : vector<80x4xbf16>, vector<4x128xbf16>, vector<80x128xf32> -> vector<80x128xf32>
    %30 = arith.addf %24, %29 : vector<80x128xf32>
    %c0_27 = arith.constant 0 : index
    %c181 = arith.constant 181 : index
    %c0_28 = arith.constant 0 : index
    %31 = vector.load %arg2[%c0_27, %c181, %c0_28] : memref<1x361x4xbf16, #tpu.memory_space<vmem>>, vector<1x80x4xbf16>
    %32 = vector.shape_cast %31 : vector<1x80x4xbf16> to vector<80x4xbf16>
    %c5 = arith.constant 5 : index
    %c0_29 = arith.constant 0 : index
    %c0_30 = arith.constant 0 : index
    %33 = vector.load %arg3[%c5, %c0_29, %c0_30] : memref<9x4x128xbf16, #tpu.memory_space<vmem>>, vector<1x4x128xbf16>
    %34 = vector.shape_cast %33 : vector<1x4x128xbf16> to vector<4x128xbf16>
    %cst_31 = arith.constant dense<0.000000e+00> : vector<80x128xf32>
    %35 = tpu.matmul %32, %34, %cst_31 {dimension_numbers = #tpu.dot_dimension_numbers<[1], [0], [0], [1], [0, 0, 1, 1], [], []>} : vector<80x4xbf16>, vector<4x128xbf16>, vector<80x128xf32> -> vector<80x128xf32>
    %36 = arith.addf %30, %35 : vector<80x128xf32>
    %c0_32 = arith.constant 0 : index
    %c10 = arith.constant 10 : index
    %c0_33 = arith.constant 0 : index
    %37 = vector.load %arg2[%c0_32, %c10, %c0_33] : memref<1x361x4xbf16, #tpu.memory_space<vmem>>, vector<1x80x4xbf16>
    %38 = vector.shape_cast %37 : vector<1x80x4xbf16> to vector<80x4xbf16>
    %c6 = arith.constant 6 : index
    %c0_34 = arith.constant 0 : index
    %c0_35 = arith.constant 0 : index
    %39 = vector.load %arg3[%c6, %c0_34, %c0_35] : memref<9x4x128xbf16, #tpu.memory_space<vmem>>, vector<1x4x128xbf16>
    %40 = vector.shape_cast %39 : vector<1x4x128xbf16> to vector<4x128xbf16>
    %cst_36 = arith.constant dense<0.000000e+00> : vector<80x128xf32>
    %41 = tpu.matmul %38, %40, %cst_36 {dimension_numbers = #tpu.dot_dimension_numbers<[1], [0], [0], [1], [0, 0, 1, 1], [], []>} : vector<80x4xbf16>, vector<4x128xbf16>, vector<80x128xf32> -> vector<80x128xf32>
    %42 = arith.addf %36, %41 : vector<80x128xf32>
    %c0_37 = arith.constant 0 : index
    %c100 = arith.constant 100 : index
    %c0_38 = arith.constant 0 : index
    %43 = vector.load %arg2[%c0_37, %c100, %c0_38] : memref<1x361x4xbf16, #tpu.memory_space<vmem>>, vector<1x80x4xbf16>
    %44 = vector.shape_cast %43 : vector<1x80x4xbf16> to vector<80x4xbf16>
    %c7 = arith.constant 7 : index
    %c0_39 = arith.constant 0 : index
    %c0_40 = arith.constant 0 : index
    %45 = vector.load %arg3[%c7, %c0_39, %c0_40] : memref<9x4x128xbf16, #tpu.memory_space<vmem>>, vector<1x4x128xbf16>
    %46 = vector.shape_cast %45 : vector<1x4x128xbf16> to vector<4x128xbf16>
    %cst_41 = arith.constant dense<0.000000e+00> : vector<80x128xf32>
    %47 = tpu.matmul %44, %46, %cst_41 {dimension_numbers = #tpu.dot_dimension_numbers<[1], [0], [0], [1], [0, 0, 1, 1], [], []>} : vector<80x4xbf16>, vector<4x128xbf16>, vector<80x128xf32> -> vector<80x128xf32>
    %48 = arith.addf %42, %47 : vector<80x128xf32>
    %c0_42 = arith.constant 0 : index
    %c11 = arith.constant 11 : index
    %c0_43 = arith.constant 0 : index
    %49 = vector.load %arg2[%c0_42, %c11, %c0_43] : memref<1x361x4xbf16, #tpu.memory_space<vmem>>, vector<1x80x4xbf16>
    %50 = vector.shape_cast %49 : vector<1x80x4xbf16> to vector<80x4xbf16>
    %c8 = arith.constant 8 : index
    %c0_44 = arith.constant 0 : index
    %c0_45 = arith.constant 0 : index
    %51 = vector.load %arg3[%c8, %c0_44, %c0_45] : memref<9x4x128xbf16, #tpu.memory_space<vmem>>, vector<1x4x128xbf16>
    %52 = vector.shape_cast %51 : vector<1x4x128xbf16> to vector<4x128xbf16>
    %cst_46 = arith.constant dense<0.000000e+00> : vector<80x128xf32>
    %53 = tpu.matmul %50, %52, %cst_46 {dimension_numbers = #tpu.dot_dimension_numbers<[1], [0], [0], [1], [0, 0, 1, 1], [], []>} : vector<80x4xbf16>, vector<4x128xbf16>, vector<80x128xf32> -> vector<80x128xf32>
    %54 = arith.addf %48, %53 : vector<80x128xf32>
    %c0_47 = arith.constant 0 : index
    %c0_48 = arith.constant 0 : index
    %c0_49 = arith.constant 0 : index
    %55 = vector.load %arg4[%c0_47, %c0_48, %c0_49] : memref<1x80x128xf32, #tpu.memory_space<vmem>>, vector<1x80x128xf32>
    %56 = vector.shape_cast %55 : vector<1x80x128xf32> to vector<80x128xf32>
    %57 = vector.shape_cast %54 : vector<80x128xf32> to vector<1x80x128xf32>
    tpu.vector_store %arg4[%c0_47, %c0_48, %c0_49], %57 {strides = array<i32>} : memref<1x80x128xf32, #tpu.memory_space<vmem>>, vector<1x80x128xf32>,
    %58 = tpu.iota {dimensions = array<i32: 0>} : vector<80x1xi32>
    %c10_i32 = arith.constant 10 : i32
    %c0_i32 = arith.constant 0 : i32
    %59 = arith.cmpi eq, %c10_i32, %c0_i32 : i32
    %c1_i32 = arith.constant 1 : i32
    %60 = arith.select %59, %c1_i32, %c10_i32 : i32
    %61 = vector.broadcast %60 : i32 to vector<80x1xi32>
    %62 = arith.remsi %58, %61 : vector<80x1xi32>
    %c0_i32_50 = arith.constant 0 : i32
    %63 = vector.broadcast %c0_i32_50 : i32 to vector<80x1xi32>
    %64 = arith.cmpi ne, %62, %63 : vector<80x1xi32>
    %c0_i32_51 = arith.constant 0 : i32
    %65 = vector.broadcast %c0_i32_51 : i32 to vector<80x1xi32>
    %66 = arith.cmpi slt, %62, %65 : vector<80x1xi32>
    %c0_i32_52 = arith.constant 0 : i32
    %67 = arith.cmpi slt, %60, %c0_i32_52 : i32
    %68 = vector.broadcast %67 : i1 to vector<80x1xi1>
    %69 = vector.broadcast %68 : vector<80x1xi1> to vector<80x1xi1>
    %70 = arith.xori %66, %69 : vector<80x1xi1>
    %71 = arith.andi %70, %64 : vector<80x1xi1>
    %72 = vector.broadcast %60 : i32 to vector<80x1xi32>
    %73 = arith.addi %62, %72 : vector<80x1xi32>
    %74 = arith.select %71, %73, %62 : vector<80x1xi1>, vector<80x1xi32>
    %c8_i32 = arith.constant 8 : i32
    %75 = vector.broadcast %c8_i32 : i32 to vector<80x1xi32>
    %76 = arith.cmpi slt, %74, %75 : vector<80x1xi32>
    %77 = arith.extui %76 : vector<80x1xi1> to vector<80x1xi32>
    %78 = arith.sitofp %77 : vector<80x1xi32> to vector<80x1xf32>
    %79 = vector.broadcast %78 : vector<80x1xf32> to vector<80x128xf32>
    %80 = arith.mulf %54, %79 : vector<80x128xf32>
    %cst_53 = arith.constant dense<0.000000e+00> : vector<128xf32>
    %81 = vector.multi_reduction <add>, %80, %cst_53 [0] : vector<80x128xf32> to vector<128xf32>
    %82 = vector.shape_cast %81 : vector<128xf32> to vector<1x128xf32>
    %83 = arith.mulf %80, %54 : vector<80x128xf32>
    %cst_54 = arith.constant dense<0.000000e+00> : vector<128xf32>
    %84 = vector.multi_reduction <add>, %83, %cst_54 [0] : vector<80x128xf32> to vector<128xf32>
    %85 = vector.shape_cast %84 : vector<128xf32> to vector<1x128xf32>
    %86 = tpu.concatenate %82, %85 in 0 : vector<1x128xf32>, vector<1x128xf32> -> vector<2x128xf32>
    %c0_55 = arith.constant 0 : index
    %c0_56 = arith.constant 0 : index
    %c0_57 = arith.constant 0 : index
    %87 = vector.load %arg5[%c0_55, %c0_56, %c0_57] : memref<1x2x128xf32, #tpu.memory_space<vmem>>, vector<1x2x128xf32>
    %88 = vector.shape_cast %87 : vector<1x2x128xf32> to vector<2x128xf32>
    %89 = vector.shape_cast %86 : vector<2x128xf32> to vector<1x2x128xf32>
    tpu.vector_store %arg5[%c0_55, %c0_56, %c0_57], %89 {strides = array<i32>} : memref<1x2x128xf32, #tpu.memory_space<vmem>>, vector<1x2x128xf32>,
    return
  }
  func.func @transform_0(%arg0: i32, %arg1: i32) -> (i32, i32, i32) {
    %c0_i32 = arith.constant 0 : i32
    %c0_i32_0 = arith.constant 0 : i32
    %c0_i32_1 = arith.constant 0 : i32
    return %arg0, %c0_i32, %c0_i32_0 : i32, i32, i32
  }
  func.func @transform_1(%arg0: i32, %arg1: i32) -> (i32, i32, i32) {
    %c0_i32 = arith.constant 0 : i32
    %c0_i32_0 = arith.constant 0 : i32
    %c0_i32_1 = arith.constant 0 : i32
    return %c0_i32, %c0_i32_0, %arg1 : i32, i32, i32
  }
  func.func @transform_2(%arg0: i32, %arg1: i32) -> (i32, i32, i32) {
    %c0_i32 = arith.constant 0 : i32
    %c0_i32_0 = arith.constant 0 : i32
    return %arg0, %c0_i32, %arg1 : i32, i32, i32
  }
  func.func @transform_3(%arg0: i32, %arg1: i32) -> (i32, i32, i32) {
    %c0_i32 = arith.constant 0 : i32
    %c0_i32_0 = arith.constant 0 : i32
    return %arg0, %c0_i32, %arg1 : i32, i32, i32
  }
}

module attributes {stable_mosaic.version = 11 : i64} {
  func.func @_scale_shift_relu_kernel(%arg0: i32, %arg1: memref<160x128xf32, #tpu.memory_space<vmem>>, %arg2: memref<1x128xf32, #tpu.memory_space<vmem>>, %arg3: memref<1x128xf32, #tpu.memory_space<vmem>>, %arg4: memref<160x128xbf16, #tpu.memory_space<vmem>>) attributes {dimension_semantics = [#tpu.dimension_semantics<parallel>], iteration_bounds = array<i64: 1>, scalar_prefetch = 0 : i64, scratch_operands = 0 : i64, tpu.core_type = #tpu.core_type<tc>, window_params = [{transform_indices = @transform_0, window_bounds = array<i64: 160, 128>}, {pipeline_mode = #tpu.pipeline_mode<synchronous>, transform_indices = @transform_1, window_bounds = array<i64: 1, 128>}, {pipeline_mode = #tpu.pipeline_mode<synchronous>, transform_indices = @transform_2, window_bounds = array<i64: 1, 128>}, {transform_indices = @transform_3, window_bounds = array<i64: 160, 128>}]} {
    %c0 = arith.constant 0 : index
    %c0_0 = arith.constant 0 : index
    %0 = vector.load %arg1[%c0, %c0_0] : memref<160x128xf32, #tpu.memory_space<vmem>>, vector<160x128xf32>
    %c0_1 = arith.constant 0 : index
    %c0_2 = arith.constant 0 : index
    %1 = vector.load %arg2[%c0_1, %c0_2] : memref<1x128xf32, #tpu.memory_space<vmem>>, vector<1x128xf32>
    %2 = vector.broadcast %1 : vector<1x128xf32> to vector<160x128xf32>
    %3 = arith.mulf %0, %2 : vector<160x128xf32>
    %c0_3 = arith.constant 0 : index
    %c0_4 = arith.constant 0 : index
    %4 = vector.load %arg3[%c0_3, %c0_4] : memref<1x128xf32, #tpu.memory_space<vmem>>, vector<1x128xf32>
    %5 = vector.broadcast %4 : vector<1x128xf32> to vector<160x128xf32>
    %6 = arith.addf %3, %5 : vector<160x128xf32>
    %cst = arith.constant 0.000000e+00 : f32
    %7 = vector.broadcast %cst : f32 to vector<160x128xf32>
    %8 = arith.maximumf %6, %7 : vector<160x128xf32>
    %9 = arith.truncf %8 : vector<160x128xf32> to vector<160x128xbf16>
    %c0_5 = arith.constant 0 : index
    %c0_6 = arith.constant 0 : index
    %10 = vector.load %arg4[%c0_5, %c0_6] : memref<160x128xbf16, #tpu.memory_space<vmem>>, vector<160x128xbf16>
    tpu.vector_store %arg4[%c0_5, %c0_6], %9 {strides = array<i32>} : memref<160x128xbf16, #tpu.memory_space<vmem>>, vector<160x128xbf16>,
    return
  }
  func.func @transform_0(%arg0: i32) -> (i32, i32) {
    %c0_i32 = arith.constant 0 : i32
    %c0_i32_0 = arith.constant 0 : i32
    return %arg0, %c0_i32 : i32, i32
  }
  func.func @transform_1(%arg0: i32) -> (i32, i32) {
    %c0_i32 = arith.constant 0 : i32
    %c0_i32_0 = arith.constant 0 : i32
    %c0_i32_1 = arith.constant 0 : i32
    return %c0_i32, %c0_i32_0 : i32, i32
  }
  func.func @transform_2(%arg0: i32) -> (i32, i32) {
    %c0_i32 = arith.constant 0 : i32
    %c0_i32_0 = arith.constant 0 : i32
    %c0_i32_1 = arith.constant 0 : i32
    return %c0_i32, %c0_i32_0 : i32, i32
  }
  func.func @transform_3(%arg0: i32) -> (i32, i32) {
    %c0_i32 = arith.constant 0 : i32
    %c0_i32_0 = arith.constant 0 : i32
    return %arg0, %c0_i32 : i32, i32
  }
}

module attributes {stable_mosaic.version = 11 : i64} {
  func.func @_conv_taps_kernel(%arg0: i32, %arg1: i32, %arg2: memref<1x102x128xbf16, #tpu.memory_space<vmem>>, %arg3: memref<9x128x128xbf16, #tpu.memory_space<vmem>>, %arg4: memref<1x80x128xf32, #tpu.memory_space<vmem>>, %arg5: memref<1x2x128xf32, #tpu.memory_space<vmem>>) attributes {dimension_semantics = [#tpu.dimension_semantics<parallel>, #tpu.dimension_semantics<parallel>], iteration_bounds = array<i64: 2, 1>, scalar_prefetch = 0 : i64, scratch_operands = 0 : i64, tpu.core_type = #tpu.core_type<tc>, window_params = [{transform_indices = @transform_0, window_bounds = array<i64: 1, 102, 128>}, {transform_indices = @transform_1, window_bounds = array<i64: 9, 128, 128>}, {transform_indices = @transform_2, window_bounds = array<i64: 1, 80, 128>}, {transform_indices = @transform_3, window_bounds = array<i64: 1, 2, 128>}]} {
    %cst = arith.constant 0.000000e+00 : f32
    %0 = vector.broadcast %cst : f32 to vector<80x128xf32>
    %c0 = arith.constant 0 : index
    %c0_0 = arith.constant 0 : index
    %c0_1 = arith.constant 0 : index
    %1 = vector.load %arg2[%c0, %c0_0, %c0_1] : memref<1x102x128xbf16, #tpu.memory_space<vmem>>, vector<1x80x128xbf16>
    %2 = vector.shape_cast %1 : vector<1x80x128xbf16> to vector<80x128xbf16>
    %c0_2 = arith.constant 0 : index
    %c0_3 = arith.constant 0 : index
    %c0_4 = arith.constant 0 : index
    %3 = vector.load %arg3[%c0_2, %c0_3, %c0_4] : memref<9x128x128xbf16, #tpu.memory_space<vmem>>, vector<1x128x128xbf16>
    %4 = vector.shape_cast %3 : vector<1x128x128xbf16> to vector<128x128xbf16>
    %cst_5 = arith.constant dense<0.000000e+00> : vector<80x128xf32>
    %5 = tpu.matmul %2, %4, %cst_5 {dimension_numbers = #tpu.dot_dimension_numbers<[1], [0], [0], [1], [0, 0, 1, 1], [], []>} : vector<80x128xbf16>, vector<128x128xbf16>, vector<80x128xf32> -> vector<80x128xf32>
    %6 = arith.addf %0, %5 : vector<80x128xf32>
    %c0_6 = arith.constant 0 : index
    %c1 = arith.constant 1 : index
    %c0_7 = arith.constant 0 : index
    %7 = vector.load %arg2[%c0_6, %c1, %c0_7] : memref<1x102x128xbf16, #tpu.memory_space<vmem>>, vector<1x80x128xbf16>
    %8 = vector.shape_cast %7 : vector<1x80x128xbf16> to vector<80x128xbf16>
    %c1_8 = arith.constant 1 : index
    %c0_9 = arith.constant 0 : index
    %c0_10 = arith.constant 0 : index
    %9 = vector.load %arg3[%c1_8, %c0_9, %c0_10] : memref<9x128x128xbf16, #tpu.memory_space<vmem>>, vector<1x128x128xbf16>
    %10 = vector.shape_cast %9 : vector<1x128x128xbf16> to vector<128x128xbf16>
    %cst_11 = arith.constant dense<0.000000e+00> : vector<80x128xf32>
    %11 = tpu.matmul %8, %10, %cst_11 {dimension_numbers = #tpu.dot_dimension_numbers<[1], [0], [0], [1], [0, 0, 1, 1], [], []>} : vector<80x128xbf16>, vector<128x128xbf16>, vector<80x128xf32> -> vector<80x128xf32>
    %12 = arith.addf %6, %11 : vector<80x128xf32>
    %c0_12 = arith.constant 0 : index
    %c2 = arith.constant 2 : index
    %c0_13 = arith.constant 0 : index
    %13 = vector.load %arg2[%c0_12, %c2, %c0_13] : memref<1x102x128xbf16, #tpu.memory_space<vmem>>, vector<1x80x128xbf16>
    %14 = vector.shape_cast %13 : vector<1x80x128xbf16> to vector<80x128xbf16>
    %c2_14 = arith.constant 2 : index
    %c0_15 = arith.constant 0 : index
    %c0_16 = arith.constant 0 : index
    %15 = vector.load %arg3[%c2_14, %c0_15, %c0_16] : memref<9x128x128xbf16, #tpu.memory_space<vmem>>, vector<1x128x128xbf16>
    %16 = vector.shape_cast %15 : vector<1x128x128xbf16> to vector<128x128xbf16>
    %cst_17 = arith.constant dense<0.000000e+00> : vector<80x128xf32>
    %17 = tpu.matmul %14, %16, %cst_17 {dimension_numbers = #tpu.dot_dimension_numbers<[1], [0], [0], [1], [0, 0, 1, 1], [], []>} : vector<80x128xbf16>, vector<128x128xbf16>, vector<80x128xf32> -> vector<80x128xf32>
    %18 = arith.addf %12, %17 : vector<80x128xf32>
    %c0_18 = arith.constant 0 : index
    %c10 = arith.constant 10 : index
    %c0_19 = arith.constant 0 : index
    %19 = vector.load %arg2[%c0_18, %c10, %c0_19] : memref<1x102x128xbf16, #tpu.memory_space<vmem>>, vector<1x80x128xbf16>
    %20 = vector.shape_cast %19 : vector<1x80x128xbf16> to vector<80x128xbf16>
    %c3 = arith.constant 3 : index
    %c0_20 = arith.constant 0 : index
    %c0_21 = arith.constant 0 : index
    %21 = vector.load %arg3[%c3, %c0_20, %c0_21] : memref<9x128x128xbf16, #tpu.memory_space<vmem>>, vector<1x128x128xbf16>
    %22 = vector.shape_cast %21 : vector<1x128x128xbf16> to vector<128x128xbf16>
    %cst_22 = arith.constant dense<0.000000e+00> : vector<80x128xf32>
    %23 = tpu.matmul %20, %22, %cst_22 {dimension_numbers = #tpu.dot_dimension_numbers<[1], [0], [0], [1], [0, 0, 1, 1], [], []>} : vector<80x128xbf16>, vector<128x128xbf16>, vector<80x128xf32> -> vector<80x128xf32>
    %24 = arith.addf %18, %23 : vector<80x128xf32>
    %c0_23 = arith.constant 0 : index
    %c11 = arith.constant 11 : index
    %c0_24 = arith.constant 0 : index
    %25 = vector.load %arg2[%c0_23, %c11, %c0_24] : memref<1x102x128xbf16, #tpu.memory_space<vmem>>, vector<1x80x128xbf16>
    %26 = vector.shape_cast %25 : vector<1x80x128xbf16> to vector<80x128xbf16>
    %c4 = arith.constant 4 : index
    %c0_25 = arith.constant 0 : index
    %c0_26 = arith.constant 0 : index
    %27 = vector.load %arg3[%c4, %c0_25, %c0_26] : memref<9x128x128xbf16, #tpu.memory_space<vmem>>, vector<1x128x128xbf16>
    %28 = vector.shape_cast %27 : vector<1x128x128xbf16> to vector<128x128xbf16>
    %cst_27 = arith.constant dense<0.000000e+00> : vector<80x128xf32>
    %29 = tpu.matmul %26, %28, %cst_27 {dimension_numbers = #tpu.dot_dimension_numbers<[1], [0], [0], [1], [0, 0, 1, 1], [], []>} : vector<80x128xbf16>, vector<128x128xbf16>, vector<80x128xf32> -> vector<80x128xf32>
    %30 = arith.addf %24, %29 : vector<80x128xf32>
    %c0_28 = arith.constant 0 : index
    %c12 = arith.constant 12 : index
    %c0_29 = arith.constant 0 : index
    %31 = vector.load %arg2[%c0_28, %c12, %c0_29] : memref<1x102x128xbf16, #tpu.memory_space<vmem>>, vector<1x80x128xbf16>
    %32 = vector.shape_cast %31 : vector<1x80x128xbf16> to vector<80x128xbf16>
    %c5 = arith.constant 5 : index
    %c0_30 = arith.constant 0 : index
    %c0_31 = arith.constant 0 : index
    %33 = vector.load %arg3[%c5, %c0_30, %c0_31] : memref<9x128x128xbf16, #tpu.memory_space<vmem>>, vector<1x128x128xbf16>
    %34 = vector.shape_cast %33 : vector<1x128x128xbf16> to vector<128x128xbf16>
    %cst_32 = arith.constant dense<0.000000e+00> : vector<80x128xf32>
    %35 = tpu.matmul %32, %34, %cst_32 {dimension_numbers = #tpu.dot_dimension_numbers<[1], [0], [0], [1], [0, 0, 1, 1], [], []>} : vector<80x128xbf16>, vector<128x128xbf16>, vector<80x128xf32> -> vector<80x128xf32>
    %36 = arith.addf %30, %35 : vector<80x128xf32>
    %c0_33 = arith.constant 0 : index
    %c20 = arith.constant 20 : index
    %c0_34 = arith.constant 0 : index
    %37 = vector.load %arg2[%c0_33, %c20, %c0_34] : memref<1x102x128xbf16, #tpu.memory_space<vmem>>, vector<1x80x128xbf16>
    %38 = vector.shape_cast %37 : vector<1x80x128xbf16> to vector<80x128xbf16>
    %c6 = arith.constant 6 : index
    %c0_35 = arith.constant 0 : index
    %c0_36 = arith.constant 0 : index
    %39 = vector.load %arg3[%c6, %c0_35, %c0_36] : memref<9x128x128xbf16, #tpu.memory_space<vmem>>, vector<1x128x128xbf16>
    %40 = vector.shape_cast %39 : vector<1x128x128xbf16> to vector<128x128xbf16>
    %cst_37 = arith.constant dense<0.000000e+00> : vector<80x128xf32>
    %41 = tpu.matmul %38, %40, %cst_37 {dimension_numbers = #tpu.dot_dimension_numbers<[1], [0], [0], [1], [0, 0, 1, 1], [], []>} : vector<80x128xbf16>, vector<128x128xbf16>, vector<80x128xf32> -> vector<80x128xf32>
    %42 = arith.addf %36, %41 : vector<80x128xf32>
    %c0_38 = arith.constant 0 : index
    %c21 = arith.constant 21 : index
    %c0_39 = arith.constant 0 : index
    %43 = vector.load %arg2[%c0_38, %c21, %c0_39] : memref<1x102x128xbf16, #tpu.memory_space<vmem>>, vector<1x80x128xbf16>
    %44 = vector.shape_cast %43 : vector<1x80x128xbf16> to vector<80x128xbf16>
    %c7 = arith.constant 7 : index
    %c0_40 = arith.constant 0 : index
    %c0_41 = arith.constant 0 : index
    %45 = vector.load %arg3[%c7, %c0_40, %c0_41] : memref<9x128x128xbf16, #tpu.memory_space<vmem>>, vector<1x128x128xbf16>
    %46 = vector.shape_cast %45 : vector<1x128x128xbf16> to vector<128x128xbf16>
    %cst_42 = arith.constant dense<0.000000e+00> : vector<80x128xf32>
    %47 = tpu.matmul %44, %46, %cst_42 {dimension_numbers = #tpu.dot_dimension_numbers<[1], [0], [0], [1], [0, 0, 1, 1], [], []>} : vector<80x128xbf16>, vector<128x128xbf16>, vector<80x128xf32> -> vector<80x128xf32>
    %48 = arith.addf %42, %47 : vector<80x128xf32>
    %c0_43 = arith.constant 0 : index
    %c22 = arith.constant 22 : index
    %c0_44 = arith.constant 0 : index
    %49 = vector.load %arg2[%c0_43, %c22, %c0_44] : memref<1x102x128xbf16, #tpu.memory_space<vmem>>, vector<1x80x128xbf16>
    %50 = vector.shape_cast %49 : vector<1x80x128xbf16> to vector<80x128xbf16>
    %c8 = arith.constant 8 : index
    %c0_45 = arith.constant 0 : index
    %c0_46 = arith.constant 0 : index
    %51 = vector.load %arg3[%c8, %c0_45, %c0_46] : memref<9x128x128xbf16, #tpu.memory_space<vmem>>, vector<1x128x128xbf16>
    %52 = vector.shape_cast %51 : vector<1x128x128xbf16> to vector<128x128xbf16>
    %cst_47 = arith.constant dense<0.000000e+00> : vector<80x128xf32>
    %53 = tpu.matmul %50, %52, %cst_47 {dimension_numbers = #tpu.dot_dimension_numbers<[1], [0], [0], [1], [0, 0, 1, 1], [], []>} : vector<80x128xbf16>, vector<128x128xbf16>, vector<80x128xf32> -> vector<80x128xf32>
    %54 = arith.addf %48, %53 : vector<80x128xf32>
    %c0_48 = arith.constant 0 : index
    %c0_49 = arith.constant 0 : index
    %c0_50 = arith.constant 0 : index
    %55 = vector.load %arg4[%c0_48, %c0_49, %c0_50] : memref<1x80x128xf32, #tpu.memory_space<vmem>>, vector<1x80x128xf32>
    %56 = vector.shape_cast %55 : vector<1x80x128xf32> to vector<80x128xf32>
    %57 = vector.shape_cast %54 : vector<80x128xf32> to vector<1x80x128xf32>
    tpu.vector_store %arg4[%c0_48, %c0_49, %c0_50], %57 {strides = array<i32>} : memref<1x80x128xf32, #tpu.memory_space<vmem>>, vector<1x80x128xf32>,
    %58 = tpu.iota {dimensions = array<i32: 0>} : vector<80x1xi32>
    %c10_i32 = arith.constant 10 : i32
    %c0_i32 = arith.constant 0 : i32
    %59 = arith.cmpi eq, %c10_i32, %c0_i32 : i32
    %c1_i32 = arith.constant 1 : i32
    %60 = arith.select %59, %c1_i32, %c10_i32 : i32
    %61 = vector.broadcast %60 : i32 to vector<80x1xi32>
    %62 = arith.remsi %58, %61 : vector<80x1xi32>
    %c0_i32_51 = arith.constant 0 : i32
    %63 = vector.broadcast %c0_i32_51 : i32 to vector<80x1xi32>
    %64 = arith.cmpi ne, %62, %63 : vector<80x1xi32>
    %c0_i32_52 = arith.constant 0 : i32
    %65 = vector.broadcast %c0_i32_52 : i32 to vector<80x1xi32>
    %66 = arith.cmpi slt, %62, %65 : vector<80x1xi32>
    %c0_i32_53 = arith.constant 0 : i32
    %67 = arith.cmpi slt, %60, %c0_i32_53 : i32
    %68 = vector.broadcast %67 : i1 to vector<80x1xi1>
    %69 = vector.broadcast %68 : vector<80x1xi1> to vector<80x1xi1>
    %70 = arith.xori %66, %69 : vector<80x1xi1>
    %71 = arith.andi %70, %64 : vector<80x1xi1>
    %72 = vector.broadcast %60 : i32 to vector<80x1xi32>
    %73 = arith.addi %62, %72 : vector<80x1xi32>
    %74 = arith.select %71, %73, %62 : vector<80x1xi1>, vector<80x1xi32>
    %c8_i32 = arith.constant 8 : i32
    %75 = vector.broadcast %c8_i32 : i32 to vector<80x1xi32>
    %76 = arith.cmpi slt, %74, %75 : vector<80x1xi32>
    %77 = arith.extui %76 : vector<80x1xi1> to vector<80x1xi32>
    %78 = arith.sitofp %77 : vector<80x1xi32> to vector<80x1xf32>
    %79 = vector.broadcast %78 : vector<80x1xf32> to vector<80x128xf32>
    %80 = arith.mulf %54, %79 : vector<80x128xf32>
    %cst_54 = arith.constant dense<0.000000e+00> : vector<128xf32>
    %81 = vector.multi_reduction <add>, %80, %cst_54 [0] : vector<80x128xf32> to vector<128xf32>
    %82 = vector.shape_cast %81 : vector<128xf32> to vector<1x128xf32>
    %83 = arith.mulf %80, %54 : vector<80x128xf32>
    %cst_55 = arith.constant dense<0.000000e+00> : vector<128xf32>
    %84 = vector.multi_reduction <add>, %83, %cst_55 [0] : vector<80x128xf32> to vector<128xf32>
    %85 = vector.shape_cast %84 : vector<128xf32> to vector<1x128xf32>
    %86 = tpu.concatenate %82, %85 in 0 : vector<1x128xf32>, vector<1x128xf32> -> vector<2x128xf32>
    %c0_56 = arith.constant 0 : index
    %c0_57 = arith.constant 0 : index
    %c0_58 = arith.constant 0 : index
    %87 = vector.load %arg5[%c0_56, %c0_57, %c0_58] : memref<1x2x128xf32, #tpu.memory_space<vmem>>, vector<1x2x128xf32>
    %88 = vector.shape_cast %87 : vector<1x2x128xf32> to vector<2x128xf32>
    %89 = vector.shape_cast %86 : vector<2x128xf32> to vector<1x2x128xf32>
    tpu.vector_store %arg5[%c0_56, %c0_57, %c0_58], %89 {strides = array<i32>} : memref<1x2x128xf32, #tpu.memory_space<vmem>>, vector<1x2x128xf32>,
    return
  }
  func.func @transform_0(%arg0: i32, %arg1: i32) -> (i32, i32, i32) {
    %c0_i32 = arith.constant 0 : i32
    %c0_i32_0 = arith.constant 0 : i32
    %c0_i32_1 = arith.constant 0 : i32
    return %arg0, %c0_i32, %c0_i32_0 : i32, i32, i32
  }
  func.func @transform_1(%arg0: i32, %arg1: i32) -> (i32, i32, i32) {
    %c0_i32 = arith.constant 0 : i32
    %c0_i32_0 = arith.constant 0 : i32
    %c0_i32_1 = arith.constant 0 : i32
    return %c0_i32, %c0_i32_0, %arg1 : i32, i32, i32
  }
  func.func @transform_2(%arg0: i32, %arg1: i32) -> (i32, i32, i32) {
    %c0_i32 = arith.constant 0 : i32
    %c0_i32_0 = arith.constant 0 : i32
    return %arg0, %c0_i32, %arg1 : i32, i32, i32
  }
  func.func @transform_3(%arg0: i32, %arg1: i32) -> (i32, i32, i32) {
    %c0_i32 = arith.constant 0 : i32
    %c0_i32_0 = arith.constant 0 : i32
    return %arg0, %c0_i32, %arg1 : i32, i32, i32
  }
}

module attributes {stable_mosaic.version = 11 : i64} {
  func.func @_conv_taps_kernel(%arg0: i32, %arg1: i32, %arg2: memref<1x80x4xbf16, #tpu.memory_space<vmem>>, %arg3: memref<1x4x128xbf16, #tpu.memory_space<vmem>>, %arg4: memref<1x80x128xf32, #tpu.memory_space<vmem>>, %arg5: memref<1x2x128xf32, #tpu.memory_space<vmem>>) attributes {dimension_semantics = [#tpu.dimension_semantics<parallel>, #tpu.dimension_semantics<parallel>], iteration_bounds = array<i64: 2, 1>, scalar_prefetch = 0 : i64, scratch_operands = 0 : i64, tpu.core_type = #tpu.core_type<tc>, window_params = [{transform_indices = @transform_0, window_bounds = array<i64: 1, 80, 4>}, {transform_indices = @transform_1, window_bounds = array<i64: 1, 4, 128>}, {transform_indices = @transform_2, window_bounds = array<i64: 1, 80, 128>}, {transform_indices = @transform_3, window_bounds = array<i64: 1, 2, 128>}]} {
    %cst = arith.constant 0.000000e+00 : f32
    %0 = vector.broadcast %cst : f32 to vector<80x128xf32>
    %c0 = arith.constant 0 : index
    %c0_0 = arith.constant 0 : index
    %c0_1 = arith.constant 0 : index
    %1 = vector.load %arg2[%c0, %c0_0, %c0_1] : memref<1x80x4xbf16, #tpu.memory_space<vmem>>, vector<1x80x4xbf16>
    %2 = vector.shape_cast %1 : vector<1x80x4xbf16> to vector<80x4xbf16>
    %c0_2 = arith.constant 0 : index
    %c0_3 = arith.constant 0 : index
    %c0_4 = arith.constant 0 : index
    %3 = vector.load %arg3[%c0_2, %c0_3, %c0_4] : memref<1x4x128xbf16, #tpu.memory_space<vmem>>, vector<1x4x128xbf16>
    %4 = vector.shape_cast %3 : vector<1x4x128xbf16> to vector<4x128xbf16>
    %cst_5 = arith.constant dense<0.000000e+00> : vector<80x128xf32>
    %5 = tpu.matmul %2, %4, %cst_5 {dimension_numbers = #tpu.dot_dimension_numbers<[1], [0], [0], [1], [0, 0, 1, 1], [], []>} : vector<80x4xbf16>, vector<4x128xbf16>, vector<80x128xf32> -> vector<80x128xf32>
    %6 = arith.addf %0, %5 : vector<80x128xf32>
    %c0_6 = arith.constant 0 : index
    %c0_7 = arith.constant 0 : index
    %c0_8 = arith.constant 0 : index
    %7 = vector.load %arg4[%c0_6, %c0_7, %c0_8] : memref<1x80x128xf32, #tpu.memory_space<vmem>>, vector<1x80x128xf32>
    %8 = vector.shape_cast %7 : vector<1x80x128xf32> to vector<80x128xf32>
    %9 = vector.shape_cast %6 : vector<80x128xf32> to vector<1x80x128xf32>
    tpu.vector_store %arg4[%c0_6, %c0_7, %c0_8], %9 {strides = array<i32>} : memref<1x80x128xf32, #tpu.memory_space<vmem>>, vector<1x80x128xf32>,
    %10 = tpu.iota {dimensions = array<i32: 0>} : vector<80x1xi32>
    %c10_i32 = arith.constant 10 : i32
    %c0_i32 = arith.constant 0 : i32
    %11 = arith.cmpi eq, %c10_i32, %c0_i32 : i32
    %c1_i32 = arith.constant 1 : i32
    %12 = arith.select %11, %c1_i32, %c10_i32 : i32
    %13 = vector.broadcast %12 : i32 to vector<80x1xi32>
    %14 = arith.remsi %10, %13 : vector<80x1xi32>
    %c0_i32_9 = arith.constant 0 : i32
    %15 = vector.broadcast %c0_i32_9 : i32 to vector<80x1xi32>
    %16 = arith.cmpi ne, %14, %15 : vector<80x1xi32>
    %c0_i32_10 = arith.constant 0 : i32
    %17 = vector.broadcast %c0_i32_10 : i32 to vector<80x1xi32>
    %18 = arith.cmpi slt, %14, %17 : vector<80x1xi32>
    %c0_i32_11 = arith.constant 0 : i32
    %19 = arith.cmpi slt, %12, %c0_i32_11 : i32
    %20 = vector.broadcast %19 : i1 to vector<80x1xi1>
    %21 = vector.broadcast %20 : vector<80x1xi1> to vector<80x1xi1>
    %22 = arith.xori %18, %21 : vector<80x1xi1>
    %23 = arith.andi %22, %16 : vector<80x1xi1>
    %24 = vector.broadcast %12 : i32 to vector<80x1xi32>
    %25 = arith.addi %14, %24 : vector<80x1xi32>
    %26 = arith.select %23, %25, %14 : vector<80x1xi1>, vector<80x1xi32>
    %c8_i32 = arith.constant 8 : i32
    %27 = vector.broadcast %c8_i32 : i32 to vector<80x1xi32>
    %28 = arith.cmpi slt, %26, %27 : vector<80x1xi32>
    %29 = arith.extui %28 : vector<80x1xi1> to vector<80x1xi32>
    %30 = arith.sitofp %29 : vector<80x1xi32> to vector<80x1xf32>
    %31 = vector.broadcast %30 : vector<80x1xf32> to vector<80x128xf32>
    %32 = arith.mulf %6, %31 : vector<80x128xf32>
    %cst_12 = arith.constant dense<0.000000e+00> : vector<128xf32>
    %33 = vector.multi_reduction <add>, %32, %cst_12 [0] : vector<80x128xf32> to vector<128xf32>
    %34 = vector.shape_cast %33 : vector<128xf32> to vector<1x128xf32>
    %35 = arith.mulf %32, %6 : vector<80x128xf32>
    %cst_13 = arith.constant dense<0.000000e+00> : vector<128xf32>
    %36 = vector.multi_reduction <add>, %35, %cst_13 [0] : vector<80x128xf32> to vector<128xf32>
    %37 = vector.shape_cast %36 : vector<128xf32> to vector<1x128xf32>
    %38 = tpu.concatenate %34, %37 in 0 : vector<1x128xf32>, vector<1x128xf32> -> vector<2x128xf32>
    %c0_14 = arith.constant 0 : index
    %c0_15 = arith.constant 0 : index
    %c0_16 = arith.constant 0 : index
    %39 = vector.load %arg5[%c0_14, %c0_15, %c0_16] : memref<1x2x128xf32, #tpu.memory_space<vmem>>, vector<1x2x128xf32>
    %40 = vector.shape_cast %39 : vector<1x2x128xf32> to vector<2x128xf32>
    %41 = vector.shape_cast %38 : vector<2x128xf32> to vector<1x2x128xf32>
    tpu.vector_store %arg5[%c0_14, %c0_15, %c0_16], %41 {strides = array<i32>} : memref<1x2x128xf32, #tpu.memory_space<vmem>>, vector<1x2x128xf32>,
    return
  }
  func.func @transform_0(%arg0: i32, %arg1: i32) -> (i32, i32, i32) {
    %c0_i32 = arith.constant 0 : i32
    %c0_i32_0 = arith.constant 0 : i32
    %c0_i32_1 = arith.constant 0 : i32
    return %arg0, %c0_i32, %c0_i32_0 : i32, i32, i32
  }
  func.func @transform_1(%arg0: i32, %arg1: i32) -> (i32, i32, i32) {
    %c0_i32 = arith.constant 0 : i32
    %c0_i32_0 = arith.constant 0 : i32
    %c0_i32_1 = arith.constant 0 : i32
    return %c0_i32, %c0_i32_0, %arg1 : i32, i32, i32
  }
  func.func @transform_2(%arg0: i32, %arg1: i32) -> (i32, i32, i32) {
    %c0_i32 = arith.constant 0 : i32
    %c0_i32_0 = arith.constant 0 : i32
    return %arg0, %c0_i32, %arg1 : i32, i32, i32
  }
  func.func @transform_3(%arg0: i32, %arg1: i32) -> (i32, i32, i32) {
    %c0_i32 = arith.constant 0 : i32
    %c0_i32_0 = arith.constant 0 : i32
    return %arg0, %c0_i32, %arg1 : i32, i32, i32
  }
}

module attributes {stable_mosaic.version = 11 : i64} {
  func.func @_bn_add_relu_kernel(%arg0: i32, %arg1: memref<160x128xf32, #tpu.memory_space<vmem>>, %arg2: memref<160x128xf32, #tpu.memory_space<vmem>>, %arg3: memref<1x128xf32, #tpu.memory_space<vmem>>, %arg4: memref<1x128xf32, #tpu.memory_space<vmem>>, %arg5: memref<1x128xf32, #tpu.memory_space<vmem>>, %arg6: memref<1x128xf32, #tpu.memory_space<vmem>>, %arg7: memref<160x128xf32, #tpu.memory_space<vmem>>) attributes {dimension_semantics = [#tpu.dimension_semantics<parallel>], iteration_bounds = array<i64: 1>, scalar_prefetch = 0 : i64, scratch_operands = 0 : i64, tpu.core_type = #tpu.core_type<tc>, window_params = [{transform_indices = @transform_0, window_bounds = array<i64: 160, 128>}, {transform_indices = @transform_1, window_bounds = array<i64: 160, 128>}, {pipeline_mode = #tpu.pipeline_mode<synchronous>, transform_indices = @transform_2, window_bounds = array<i64: 1, 128>}, {pipeline_mode = #tpu.pipeline_mode<synchronous>, transform_indices = @transform_3, window_bounds = array<i64: 1, 128>}, {pipeline_mode = #tpu.pipeline_mode<synchronous>, transform_indices = @transform_4, window_bounds = array<i64: 1, 128>}, {pipeline_mode = #tpu.pipeline_mode<synchronous>, transform_indices = @transform_5, window_bounds = array<i64: 1, 128>}, {transform_indices = @transform_6, window_bounds = array<i64: 160, 128>}]} {
    %c0 = arith.constant 0 : index
    %c0_0 = arith.constant 0 : index
    %0 = vector.load %arg1[%c0, %c0_0] : memref<160x128xf32, #tpu.memory_space<vmem>>, vector<160x128xf32>
    %c0_1 = arith.constant 0 : index
    %c0_2 = arith.constant 0 : index
    %1 = vector.load %arg3[%c0_1, %c0_2] : memref<1x128xf32, #tpu.memory_space<vmem>>, vector<1x128xf32>
    %2 = vector.broadcast %1 : vector<1x128xf32> to vector<160x128xf32>
    %3 = arith.mulf %0, %2 : vector<160x128xf32>
    %c0_3 = arith.constant 0 : index
    %c0_4 = arith.constant 0 : index
    %4 = vector.load %arg4[%c0_3, %c0_4] : memref<1x128xf32, #tpu.memory_space<vmem>>, vector<1x128xf32>
    %5 = vector.broadcast %4 : vector<1x128xf32> to vector<160x128xf32>
    %6 = arith.addf %3, %5 : vector<160x128xf32>
    %c0_5 = arith.constant 0 : index
    %c0_6 = arith.constant 0 : index
    %7 = vector.load %arg2[%c0_5, %c0_6] : memref<160x128xf32, #tpu.memory_space<vmem>>, vector<160x128xf32>
    %c0_7 = arith.constant 0 : index
    %c0_8 = arith.constant 0 : index
    %8 = vector.load %arg5[%c0_7, %c0_8] : memref<1x128xf32, #tpu.memory_space<vmem>>, vector<1x128xf32>
    %9 = vector.broadcast %8 : vector<1x128xf32> to vector<160x128xf32>
    %10 = arith.mulf %7, %9 : vector<160x128xf32>
    %11 = arith.addf %6, %10 : vector<160x128xf32>
    %c0_9 = arith.constant 0 : index
    %c0_10 = arith.constant 0 : index
    %12 = vector.load %arg6[%c0_9, %c0_10] : memref<1x128xf32, #tpu.memory_space<vmem>>, vector<1x128xf32>
    %13 = vector.broadcast %12 : vector<1x128xf32> to vector<160x128xf32>
    %14 = arith.addf %11, %13 : vector<160x128xf32>
    %cst = arith.constant 0.000000e+00 : f32
    %15 = vector.broadcast %cst : f32 to vector<160x128xf32>
    %16 = arith.maximumf %14, %15 : vector<160x128xf32>
    %c0_11 = arith.constant 0 : index
    %c0_12 = arith.constant 0 : index
    %17 = vector.load %arg7[%c0_11, %c0_12] : memref<160x128xf32, #tpu.memory_space<vmem>>, vector<160x128xf32>
    tpu.vector_store %arg7[%c0_11, %c0_12], %16 {strides = array<i32>} : memref<160x128xf32, #tpu.memory_space<vmem>>, vector<160x128xf32>,
    return
  }
  func.func @transform_0(%arg0: i32) -> (i32, i32) {
    %c0_i32 = arith.constant 0 : i32
    %c0_i32_0 = arith.constant 0 : i32
    return %arg0, %c0_i32 : i32, i32
  }
  func.func @transform_1(%arg0: i32) -> (i32, i32) {
    %c0_i32 = arith.constant 0 : i32
    %c0_i32_0 = arith.constant 0 : i32
    return %arg0, %c0_i32 : i32, i32
  }
  func.func @transform_2(%arg0: i32) -> (i32, i32) {
    %c0_i32 = arith.constant 0 : i32
    %c0_i32_0 = arith.constant 0 : i32
    %c0_i32_1 = arith.constant 0 : i32
    return %c0_i32, %c0_i32_0 : i32, i32
  }
  func.func @transform_3(%arg0: i32) -> (i32, i32) {
    %c0_i32 = arith.constant 0 : i32
    %c0_i32_0 = arith.constant 0 : i32
    %c0_i32_1 = arith.constant 0 : i32
    return %c0_i32, %c0_i32_0 : i32, i32
  }
  func.func @transform_4(%arg0: i32) -> (i32, i32) {
    %c0_i32 = arith.constant 0 : i32
    %c0_i32_0 = arith.constant 0 : i32
    %c0_i32_1 = arith.constant 0 : i32
    return %c0_i32, %c0_i32_0 : i32, i32
  }
  func.func @transform_5(%arg0: i32) -> (i32, i32) {
    %c0_i32 = arith.constant 0 : i32
    %c0_i32_0 = arith.constant 0 : i32
    %c0_i32_1 = arith.constant 0 : i32
    return %c0_i32, %c0_i32_0 : i32, i32
  }
  func.func @transform_6(%arg0: i32) -> (i32, i32) {
    %c0_i32 = arith.constant 0 : i32
    %c0_i32_0 = arith.constant 0 : i32
    return %arg0, %c0_i32 : i32, i32
  }
}

</mosaic_0001>

<bundles_post_ra>
// kernel: _basic_block_forward.6
= control target key start
LH: loop header
LB: loop body
LE: loop exit
PB: predicated region body
PF: predicated region fallthrough
CT: control target
= control target key end

     0   :  { %s367_s0 = inlined_call_operand.vmem [shape: f32[160,128], index: 0, kind: input, shape index: {}]   ;;  %s368_s1 = inlined_call_operand.vmem [shape: f32[1,128], index: 1, kind: input, shape index: {}]   ;;  %s369_s2 = inlined_call_operand.vmem [shape: f32[1,128], index: 2, kind: input, shape index: {}]   ;;  %s370_s3 = inlined_call_operand.vmem [shape: bf16[160,128], index: 3, kind: output, shape index: {}]  }
   0x1   :  { %v14_v0 = vld [vmem:[%s367_s0] sm:$0xff]  ;;  %v15_v1 = vld [vmem:[%s367_s0 + $0x8] sm:$0xff]  ;;  %v16_v4 = vld [vmem:[%s367_s0 + $0x10] sm:$0xff] }
   0x2   :  { %v236_v2 = vld [vmem:[%s368_s1] ss:$0 sm:$0xff]  ;;  %v17_v5 = vld [vmem:[%s367_s0 + $0x18] sm:$0xff]  ;;  %v19_v11 = vld [vmem:[%s367_s0 + $0x28] sm:$0xff] }
   0x3   :  { %v241_v3 = vld [vmem:[%s369_s2] ss:$0 sm:$0xff]  ;;  %v38_v7 = vmul.f32 %v236_v2, %v14_v0  ;;  %v39_v8 = vmul.f32 %v236_v2, %v15_v1  ;;  %v40_v9 = vmul.f32 %v236_v2, %v16_v4  ;;  %v41_v10 = vmul.f32 %v236_v2, %v17_v5  ;;  %v20_v12 = vld [vmem:[%s367_s0 + $0x30] sm:$0xff]  ;;  %v21_v13 = vld [vmem:[%s367_s0 + $0x38] sm:$0xff] }
   0x4   :  { %v18_v6 = vld [vmem:[%s367_s0 + $0x20] sm:$0xff]  ;;  %v43_v15 = vmul.f32 %v236_v2, %v19_v11  ;;  %v44_v16 = vmul.f32 %v236_v2, %v20_v12  ;;  %v45_v17 = vmul.f32 %v236_v2, %v21_v13  ;;  %v23_v27 = vld [vmem:[%s367_s0 + $0x48] sm:$0xff]  ;;  %v24_v32 = vld [vmem:[%s367_s0 + $0x50] sm:$0xff] }
   0x5   :  { %v42_v14 = vmul.f32 %v236_v2, %v18_v6  ;;  %v62_v18 = vadd.f32 %v241_v3, %v38_v7  ;;  %v63_v19 = vadd.f32 %v241_v3, %v39_v8  ;;  %v64_v20 = vadd.f32 %v241_v3, %v40_v9  ;;  %v22_v26 = vld [vmem:[%s367_s0 + $0x40] sm:$0xff]  ;;  %v25_v33 = vld [vmem:[%s367_s0 + $0x58] sm:$0xff]  ;;  %v27_v39 = vld [vmem:[%s367_s0 + $0x68] sm:$0xff] }
   0x6   :  { %v65_v21 = vadd.f32 %v241_v3, %v41_v10  ;;  %v67_v23 = vadd.f32 %v241_v3, %v43_v15  ;;  %v68_v24 = vadd.f32 %v241_v3, %v44_v16  ;;  %v69_v25 = vadd.f32 %v241_v3, %v45_v17  ;;  %v26_v38 = vld [vmem:[%s367_s0 + $0x60] sm:$0xff]  ;;  %v28_v44 = vld [vmem:[%s367_s0 + $0x70] sm:$0xff]  ;;  %v29_v45 = vld [vmem:[%s367_s0 + $0x78] sm:$0xff] }
   0x7   :  { %v66_v22 = vadd.f32 %v241_v3, %v42_v14  ;;  %v82_v28 = vmax.f32 %v62_v18, 0.0  ;;  %v83_v29 = vmax.f32 %v63_v19, 0.0  ;;  %v84_v30 = vmax.f32 %v64_v20, 0.0  ;;  %v30_v58 = vld [vmem:[%s367_s0 + $0x80] sm:$0xff]  ;;  %v31_v63 = vld [vmem:[%s367_s0 + $0x88] sm:$0xff]  ;;  %v32_v6 = vld [vmem:[%s367_s0 + $0x90] sm:$0xff] }
   0x8   :  { %v85_v31 = vmax.f32 %v65_v21, 0.0  ;;  %v87_v35 = vmax.f32 %v67_v23, 0.0  ;;  %v88_v36 = vmax.f32 %v68_v24, 0.0  ;;  %v89_v37 = vmax.f32 %v69_v25, 0.0  ;;  %v33_v7 = vld [vmem:[%s367_s0 + $0x98] sm:$0xff] }
   0x9   :  { %v86_v34 = vmax.f32 %v66_v22, 0.0  ;;  %v149_v40 = vpack.c.bf16 %v83_v29, %v82_v28  ;;  %v46_v42 = vmul.f32 %v236_v2, %v22_v26  ;;  %v47_v43 = vmul.f32 %v236_v2, %v23_v27 }
   0xa   :  { %v154_v41 = vpack.c.bf16 %v85_v31, %v84_v30  ;;  %v164_v47 = vpack.c.bf16 %v89_v37, %v88_v36  ;;  %v48_v48 = vmul.f32 %v236_v2, %v24_v32  ;;  %v49_v49 = vmul.f32 %v236_v2, %v25_v33 }
   0xb   :  { %v159_v46 = vpack.c.bf16 %v87_v35, %v86_v34  ;;  %150 = vst [vmem:[%s370_s3] sm:$0xff] %v149_v40   ;;  %v70_v50 = vadd.f32 %v241_v3, %v46_v42  ;;  %v71_v51 = vadd.f32 %v241_v3, %v47_v43  ;;  %v50_v52 = vmul.f32 %v236_v2, %v26_v38 }
   0xc   :  { %v51_v53 = vmul.f32 %v236_v2, %v27_v39  ;;  %196 = vst [vmem:[%s370_s3 + $0x8] sm:$0xff] %v154_v41   ;;  %v72_v54 = vadd.f32 %v241_v3, %v48_v48  ;;  %v73_v55 = vadd.f32 %v241_v3, %v49_v49  ;;  %v52_v56 = vmul.f32 %v236_v2, %v28_v44 }
   0xd   :  { %v53_v57 = vmul.f32 %v236_v2, %v29_v45  ;;  %197 = vst [vmem:[%s370_s3 + $0x10] sm:$0xff] %v159_v46   ;;  %v90_v59 = vmax.f32 %v70_v50, 0.0  ;;  %v91_v60 = vmax.f32 %v71_v51, 0.0  ;;  %v74_v61 = vadd.f32 %v241_v3, %v50_v52 }
   0xe   :  { %v75_v62 = vadd.f32 %v241_v3, %v51_v53  ;;  %198 = vst [vmem:[%s370_s3 + $0x18] sm:$0xff] %v164_v47   ;;  %v92_v0 = vmax.f32 %v72_v54, 0.0  ;;  %v93_v1 = vmax.f32 %v73_v55, 0.0  ;;  %v76_v4 = vadd.f32 %v241_v3, %v52_v56 }
   0xf   :  { %v77_v5 = vadd.f32 %v241_v3, %v53_v57  ;;  %v169_v8 = vpack.c.bf16 %v91_v60, %v90_v59  ;;  %v94_v9 = vmax.f32 %v74_v61, 0.0  ;;  %v54_v11 = vmul.f32 %v236_v2, %v30_v58 }
  0x10   :  { %v95_v10 = vmax.f32 %v75_v62, 0.0  ;;  %v174_v12 = vpack.c.bf16 %v93_v1, %v92_v0  ;;  %v96_v13 = vmax.f32 %v76_v4, 0.0  ;;  %v55_v15 = vmul.f32 %v236_v2, %v31_v63 }
  0x11   :  { %v97_v14 = vmax.f32 %v77_v5, 0.0  ;;  %199 = vst [vmem:[%s370_s3 + $0x20] sm:$0xff] %v169_v8   ;;  %v78_v17 = vadd.f32 %v241_v3, %v54_v11  ;;  %v56_v18 = vmul.f32 %v236_v2, %v32_v6  ;;  %v57_v19 = vmul.f32 %v236_v2, %v33_v7 }
  0x12   :  { %v179_v16 = vpack.c.bf16 %v95_v10, %v94_v9  ;;  %200 = vst [vmem:[%s370_s3 + $0x28] sm:$0xff] %v174_v12   ;;  %v79_v21 = vadd.f32 %v241_v3, %v55_v15 }
  0x13   :  { %v184_v20 = vpack.c.bf16 %v97_v14, %v96_v13  ;;  %v98_v22 = vmax.f32 %v78_v17, 0.0  ;;  %v80_v23 = vadd.f32 %v241_v3, %v56_v18  ;;  %v81_v24 = vadd.f32 %v241_v3, %v57_v19 }
  0x14   :  { %201 = vst [vmem:[%s370_s3 + $0x30] sm:$0xff] %v179_v16   ;;  %v99_v2 = vmax.f32 %v79_v21, 0.0 }
  0x15   :  { %202 = vst [vmem:[%s370_s3 + $0x38] sm:$0xff] %v184_v20   ;;  %v100_v25 = vmax.f32 %v80_v23, 0.0  ;;  %v101_v26 = vmax.f32 %v81_v24, 0.0 }
  0x16   :  { %v189_v27 = vpack.c.bf16 %v99_v2, %v98_v22 }
  0x17   :  { %v194_v28 = vpack.c.bf16 %v101_v26, %v100_v25 }
  0x18   :  { %203 = vst [vmem:[%s370_s3 + $0x40] sm:$0xff] %v189_v27  }
  0x19   :  { %204 = vst [vmem:[%s370_s3 + $0x48] sm:$0xff] %v194_v28  }

// kernel: _basic_block_forward.5
= control target key start
LH: loop header
LB: loop body
LE: loop exit
PB: predicated region body
PF: predicated region fallthrough
CT: control target
= control target key end

     0   :  { %s2177_s12 = smov 0   ;;  %s2179_s13 = smov 0   ;;  %s2786_s0 = inlined_call_operand.vmem [shape: bf16[2,361,4], index: 0, kind: input, shape index: {}]   ;;  %s2787_s1 = inlined_call_operand.vmem [shape: bf16[9,4,128], index: 1, kind: input, shape index: {}]   ;;  %s2788_s2 = inlined_call_operand.vmem [shape: f32[2,80,128], index: 2, kind: output, shape index: {0}]   ;;  %s2789_s3 = inlined_call_operand.vmem [shape: f32[2,2,128], index: 3, kind: output, shape index: {1}]  }
   0x1   :  { %s2181_s14 = smov 0  }
   0x2 LB: > { %s26_s15 = sadd.s32 1, %s2149_s13  ;;  %p1856_p0 = scmp.ge.s32.totalorder %s2153_s14, 1  ;;  %s2153_s14 = sphi %s2181_s14, %s14_s14   ;;  %s2149_s13 = sphi %s2179_s13, %s2817_s13   ;;  %s2145_s12 = sphi %s2177_s12, %s2816_s12  }
   0x3   : > { %p28_p1 = scmp.ge.s32.totalorder %s26_s15, 2  ;;  %p165_p2 = scmp.lt.s32.totalorder %s2153_s14, 3 }
   0x5   : > { %s2819_s15 = smov (%p28_p1, %s26_s15), 0  ;;  %p166_p3 = pnand %p1856_p0, %p165_p2 }
   0x6   : > { %p203_p4 = scmp.lt.s32.totalorder (!%p166_p3), %s2145_s12, 1 }
   0x7   : > { %169 = sbr.rel (%p166_p3) target bundleno = 363 (0x16b), region = 28 }
   0xc   : > { %v1860_v0 = vld [vmem:[%s2787_s1 + $0x2] sm:$0x3]  ;;  %vm308_vm0 = vcmask 1041408   ;;  %v1911_v2 = vld [vmem:[%s2787_s1 + $0x4] sm:$0x3]  ;;  %s2821_s12 = smov (!%p203_p4, %s2145_s12), 1 }
   0xd   : > { %v310_v1 = vsel %vm308_vm0, %v1860_v0, 0  ;;  %v238_v3 = vld [vmem:[%s2787_s1] sm:$0x3]  ;;  %v525_v4 = vsel %vm308_vm0, %v1911_v2, 0  ;;  %v1937_v6 = vld [vmem:[%s2787_s1 + $0x6] sm:$0x3] }
   0xe   : > { %2100 = vmatpush.bf16.msra.mxu1 %v310_v1  ;;  %2101 = vmatpush.bf16.msra.mxu2 %v310_v1  ;;  %v387_v5 = vsel %vm308_vm0, %v238_v3, 0  ;;  %v640_v7 = vsel %vm308_vm0, %v1937_v6, 0  ;;  %v1963_v8 = vld [vmem:[%s2787_s1 + $0x8] sm:$0x3]  ;;  %s2103_s26 = smul.u32 184, %s2821_s12  ;;  %vm280_vm1 = vcmask 1046528  }
   0xf   : > { %2102 = vmatpush.bf16.msra.mxu3 %v310_v1  ;;  %319 = vmatpush.bf16.msra.mxu0 %v310_v1  ;;  %v755_v9 = vsel %vm308_vm0, %v1963_v8, 0  ;;  %vm292_vm2 = vcmask 31744   ;;  %v1995_v26 = vld [vmem:[%s2787_s1 + $0xc] sm:$0x3]  ;;  %v2021_v32 = vld [vmem:[%s2787_s1 + $0xe] sm:$0x3] }
  0x10   : > { %s2221_s29 = scalar_lea.vmem %s2786_s0, %s2103_s26  ;;  %v991_v29 = vsel %vm308_vm0, %v1995_v26, 0  ;;  %v1989_v33 = vld [vmem:[%s2787_s1 + $0xa] sm:$0x3]  ;;  %v1105_v34 = vsel %vm308_vm0, %v2021_v32, 0  ;;  %v2047_v35 = vld [vmem:[%s2787_s1 + $0x10] sm:$0x3] }
  0x11   : > { %v2071_v10 = vld [vmem:[%s2221_s29 + $0x34] sm:$0xff]  ;;  %v2072_v11 = vld [vmem:[%s2221_s29 + $0x3c] sm:$0xff]  ;;  %v2073_v12 = vld [vmem:[%s2221_s29 + $0x44] sm:$0xff]  ;;  %v877_v38 = vsel %vm308_vm0, %v1989_v33, 0  ;;  %v1227_v41 = vsel %vm308_vm0, %v2047_v35, 0  ;;  %vm612_vm3 = vcmask 1045504  }
  0x12   : > { %534 = vmatpush.bf16.msrb.mxu2 %v525_v4  ;;  %396 = vmatpush.bf16.msrb.mxu1 %v387_v5  ;;  %v2074_v13 = vld [vmem:[%s2221_s29 + $0x4c] sm:$0xff]  ;;  %v249_v14 = vld [vmem:[%s2221_s29 + $0x54] sm:$0x1]  ;;  %v282_v15 = vrot.slane %v2071_v10, 1  ;;  %v284_v16 = vrot.slane %v2072_v11, 1  ;;  %v286_v17 = vrot.slane %v2073_v12, 1 }
  0x13   : > { %649 = vmatpush.bf16.msrb.mxu3 %v640_v7  ;;  %764 = vmatpush.bf16.msrb.mxu0 %v755_v9  ;;  %v273_v18 = vunpack.c.l.b16 %v249_v14  ;;  %v1863_v19 = vld [vmem:[%s2221_s29 + $0x2c] sm:$0xe]  ;;  %v288_v20 = vrot.slane %v2074_v13, 1  ;;  %v2070_v21 = vld [vmem:[%s2221_s29 + $0x2c] sm:$0xf0]  ;;  %v2259_v42 = vld [vmem:[%s2221_s29 + $0x60] sm:$0xff] }
  0x14   : > { %v285_v22 = vsel %vm280_vm1, %v282_v15, %v284_v16  ;;  %v287_v23 = vsel %vm280_vm1, %v284_v16, %v286_v17  ;;  %v1864_v25 = vor.u32 %v2070_v21, %v1863_v19  ;;  %v1940_v36 = vld [vmem:[%s2221_s29 + $0x58] sm:$0xc]  ;;  %v2080_v37 = vld [vmem:[%s2221_s29 + $0x58] sm:$0xf0]  ;;  %v1966_v39 = vld [vmem:[%s2221_s29 + $0x84] sm:$0x8] }
  0x15   : > { %v279_v24 = vpack.c.b16 %v273_v18, %v273_v18  ;;  %1882 = vmatmul.msk.bf16.vlgmr.msra.gmra.mxu1 %vm292_vm2, %v285_v22  ;;  %1883 = vmatmul.msk.bf16.vlgmr.msra.gmra.mxu2 %vm292_vm2, %v287_v23  ;;  %v2085_v40 = vld [vmem:[%s2221_s29 + $0x84] sm:$0xf0]  ;;  %v2261_v43 = vor.u32 %v2080_v37, %v1940_v36  ;;  %v2086_v44 = vld [vmem:[%s2221_s29 + $0x8c] sm:$0xff]  ;;  %v289_v46 = vsel %vm280_vm1, %v286_v17, %v288_v20  ;;  %v2065_v47 = vld [vmem:[%s2221_s29] sm:$0xff]  ;;  %v614_v49 = vrot.slane %v2259_v42, 2  ;;  %s2104_s11 = smul.u32 80, %s2821_s12 }
  0x16   : > { %v281_v28 = vrot.slane %v1864_v25, 1  ;;  %1000 = vmatpush.bf16.msra.mxu2 %v991_v29  ;;  %886 = vmatpush.bf16.msra.mxu1 %v877_v38  ;;  %v1967_v45 = vor.u32 %v2085_v40, %v1966_v39  ;;  %v2075_v50 = vld [vmem:[%s2221_s29] sm:$0xff]  ;;  %v729_v52 = vrot.slane %v2086_v44, 3  ;;  %vm727_vm4 = vcmask 1044480   ;;  %v2076_v54 = vld [vmem:[%s2221_s29 + $0x8] sm:$0xff]  ;;  %v2087_v63 = vld [vmem:[%s2221_s29 + $0x94] sm:$0xff] }
  0x17   : > { %v290_v27 = vrot.slane %v279_v24, 1  ;;  %v613_v48 = vrot.slane %v2261_v43, 2  ;;  %v468_v55 = vshll.u32 %v2075_v50, 16  ;;  %v466_v57 = vshrl.u32 %v2075_v50, 16  ;;  %v2277_v62 = vld [vmem:[%s2221_s29 + $0x68] sm:$0xff]  ;;  %v2077_v5 = vld [vmem:[%s2221_s29 + $0x10] sm:$0xff]  ;;  %s2599_s18 = scalar_lea.vmem %s2788_s2, %s2104_s11 }
  0x18   : > { %v283_v31 = vsel %vm280_vm1, %v281_v28, %v282_v15  ;;  %v728_v51 = vrot.slane %v1967_v45, 3  ;;  %v473_v59 = vshll.u32 %v2076_v54, 16  ;;  %vm464_vm5 = vsmask.f32 7424  ;;  %v2066_v0 = vld [vmem:[%s2221_s29 + $0x8] sm:$0xff]  ;;  %v2291_v11 = vld [vmem:[%s2221_s29 + $0x70] sm:$0xff] }
  0x19   : > { %v291_v30 = vsel %vm280_vm1, %v288_v20, %v290_v27  ;;  %1881 = vmatmul.msk.bf16.vlgmr.msra.gmra.mxu0 %vm292_vm2, %v283_v31  ;;  %v615_v53 = vsel %vm612_vm3, %v613_v48, %v614_v49  ;;  %v470_v58 = vrot.slane %v468_v55, 1  ;;  %v616_v2 = vrot.slane %v2277_v62, 2  ;;  %v2088_v12 = vld [vmem:[%s2221_s29 + $0x9c] sm:$0xff]  ;;  %v2067_v13 = vld [vmem:[%s2221_s29 + $0x10] sm:$0xff]  ;;  %v2089_v25 = vld [vmem:[%s2221_s29 + $0xa4] sm:$0xff]  ;;  %s1859_s19 = sshll.u32 %s2821_s12, 1 }
  0x1a   : > { %1885 = vmatmul.msk.bf16.vlgmr.msra.gmra.mxu3 %vm292_vm2, %v291_v30  ;;  %1236 = vmatpush.bf16.msra.mxu0 %v1227_v41  ;;  %v730_v56 = vsel %vm727_vm4, %v728_v51, %v729_v52  ;;  %v475_v61 = vrot.slane %v473_v59, 1  ;;  %v731_v3 = vrot.slane %v2087_v63, 3  ;;  %v477_v7 = vshrl.u32 %v2076_v54, 16  ;;  %v2078_v18 = vld [vmem:[%s2221_s29 + $0x18] sm:$0xff]  ;;  %v581_v44 = vld [vmem:[%s2221_s29 + $0x80] sm:$0x3]  ;;  %s226_s22 = scalar_lea.vmem %s2789_s3, %s1859_s19 }
  0x1b   : > { %1114 = vmatpush.bf16.msra.mxu3 %v1105_v34  ;;  %v471_v60 = vor.u32 %v470_v58, %v466_v57  ;;  %v617_v4 = vsel %vm612_vm3, %v614_v49, %v616_v2  ;;  %v481_v8 = vshll.u32 %v2077_v5, 16  ;;  %v618_v15 = vrot.slane %v2291_v11, 2  ;;  %v2305_v24 = vld [vmem:[%s2221_s29 + $0x78] sm:$0xff]  ;;  %v696_v45 = vld [vmem:[%s2221_s29 + $0xac] sm:$0x7] }
  0x1c   : > { %v732_v6 = vsel %vm727_vm4, %v729_v52, %v731_v3  ;;  %v479_v9 = vor.u32 %v477_v7, %v475_v61  ;;  %v733_v16 = vrot.slane %v2088_v12, 3  ;;  %v485_v20 = vshrl.u32 %v2077_v5, 16  ;;  %v2068_v33 = vld [vmem:[%s2221_s29 + $0x18] sm:$0xff]  ;;  %v433_v58 = vld [vmem:[%s2221_s29 + $0x28] sm:$0x1]  ;;  %v2341_v7 = vld [vmem:[%s2221_s29 + $0xc] sm:$0xff] }
  0x1d   : > { %v476_v1 = vsel %vm464_vm5, %v471_v60, %v475_v61  ;;  %v483_v10 = vrot.slane %v481_v8, 1  ;;  %v619_v17 = vsel %vm612_vm3, %v616_v2, %v618_v15  ;;  %v489_v21 = vshll.u32 %v2078_v18, 16  ;;  %v2069_v61 = vld [vmem:[%s2221_s29 + $0x20] sm:$0xff]  ;;  %v2024_v12 = vld [vmem:[%s2221_s29 + $0x30] sm:$0xc] }
  0x1e   : > { %v734_v19 = vsel %vm727_vm4, %v731_v3, %v733_v16  ;;  %v809_v26 = vshrl.u32 %v2261_v43, 16  ;;  %v812_v27 = vshll.u32 %v2261_v43, 16  ;;  %v817_v28 = vshrl.u32 %v2259_v42, 16  ;;  %v1998_v2 = vld [vmem:[%s2221_s29 + $0x4] sm:$0xe] }
  0x1f   : > { %v484_v14 = vsel %vm464_vm5, %v479_v9, %v483_v10  ;;  %v487_v22 = vor.u32 %v485_v20, %v483_v10  ;;  %v491_v23 = vrot.slane %v489_v21, 1  ;;  %v820_v29 = vshll.u32 %v2259_v42, 16  ;;  %v2079_v42 = vld [vmem:[%s2221_s29 + $0x20] sm:$0xff]  ;;  %v2090_v3 = vld [vmem:[%s2221_s29 + $0x4] sm:$0xf0]  ;;  %v2096_v21 = vld [vmem:[%s2221_s29 + $0x38] sm:$0xff] }
  0x20   : > { %v811_v30 = vrot.slane %v809_v26, 2  ;;  %v814_v31 = vrot.slane %v812_v27, 3  ;;  %v819_v32 = vrot.slane %v817_v28, 2  ;;  %v620_v36 = vrot.slane %v2305_v24, 2 }
  0x21   : > { %v822_v34 = vrot.slane %v820_v29, 3  ;;  %v492_v35 = vsel %vm464_vm5, %v487_v22, %v491_v23  ;;  %v735_v37 = vrot.slane %v2089_v25, 3  ;;  %vm807_vm6 = vsmask.f32 5376 }
  0x22   : > { %v815_v38 = vor.u32 %v814_v31, %v811_v30  ;;  %v621_v41 = vsel %vm612_vm3, %v618_v15, %v620_v36  ;;  %v493_v48 = vshrl.u32 %v2078_v18, 16  ;;  %v497_v49 = vshll.u32 %v2079_v42, 16 }
  0x23   : > { %v823_v39 = vor.u32 %v822_v34, %v819_v32  ;;  %v736_v43 = vsel %vm727_vm4, %v733_v16, %v735_v37  ;;  %v605_v50 = vunpack.c.l.b16 %v581_v44  ;;  %v720_v51 = vunpack.c.l.b16 %v696_v45  ;;  %v2356_v34 = vld [vmem:[%s2221_s29 + $0x14] sm:$0xff] }
  0x24   : > { %v495_v55 = vor.u32 %v493_v48, %v491_v23  ;;  %v1999_v8 = vor.u32 %v2090_v3, %v1998_v2  ;;  %v501_v9 = vshrl.u32 %v2079_v42, 16  ;;  %v1167_v16 = vshrl.u32 %v2341_v7, 16 }
  0x25   : > { %1884 = vmatmul.msk.bf16.gmra.mxu2 %vm292_vm2, %v289_v46  ;;  %1906 = vmatmul.msk.bf16.vlgmr.msrb.gmra.mxu1 %vm292_vm2, %v2065_v47  ;;  %v824_v40 = vsel %vm807_vm6, %v815_v38, %v823_v39  ;;  %v826_v46 = vshrl.u32 %v2277_v62, 16  ;;  %v829_v47 = vshll.u32 %v2277_v62, 16  ;;  %v611_v57 = vpack.c.b16 %v605_v50, %v605_v50 }
  0x26   : > { %v726_v59 = vpack.c.b16 %v720_v51, %v720_v51  ;;  %v457_v62 = vunpack.c.l.b16 %v433_v58  ;;  %v1162_v15 = vshll.u32 %v1999_v8, 16  ;;  %v1169_v25 = vrot.slane %v1167_v16, 1 }
  0x27   : > { %v828_v52 = vrot.slane %v826_v46, 2  ;;  %v1079_v29 = vrot.slane %v2096_v21, 2  ;;  %vm1157_vm7 = vsmask.f32 6400  ;;  %v965_v38 = vrot.slane %v2341_v7, 1 }
  0x28   : > { %v1164_v23 = vrot.slane %v1162_v15, 2  ;;  %v835_v46 = vshrl.u32 %v2291_v11, 16 }
  0x29   : > { %1984 = vmatmul.msk.bf16.vlgmr.msrb.gmra.mxu0 %vm292_vm2, %v730_v56  ;;  %v499_v56 = vrot.slane %v497_v49, 1  ;;  %v2372_v49 = vld [vmem:[%s2221_s29 + $0x1c] sm:$0xff] }
  0x2a   : > { %1958 = vmatmul.msk.bf16.vlgmr.msrb.gmra.mxu3 %vm292_vm2, %v615_v53  ;;  %v831_v53 = vrot.slane %v829_v47, 3  ;;  %v838_v47 = vshll.u32 %v2291_v11, 16  ;;  %v837_v50 = vrot.slane %v835_v46, 2  ;;  %v969_v15 = vrot.slane %v2372_v49, 1 }
  0x2b   : > { %v500_v63 = vsel %vm464_vm5, %v495_v55, %v499_v56  ;;  %v503_v18 = vor.u32 %v501_v9, %v499_v56  ;;  %v967_v56 = vrot.slane %v2356_v34, 1 }
  0x2c   : > { %v2327_v54 = vor.u32 %v831_v53, %v828_v52  ;;  %v840_v51 = vrot.slane %v838_v47, 3  ;;  %v1185_v52 = vshrl.u32 %v2372_v49, 16  ;;  %v1188_v53 = vshll.u32 %v2372_v49, 16 }
  0x2e   : > { %v833_v60 = vsel %vm807_vm6, %v823_v39, %v2327_v54  ;;  %v2097_v39 = vld [vmem:[%s2221_s29 + $0x40] sm:$0xff]  ;;  %v841_v55 = vor.u32 %v840_v51, %v837_v50  ;;  %v1187_v11 = vrot.slane %v1185_v52, 1  ;;  %v1190_v58 = vrot.slane %v1188_v53, 2 }
  0x35   : > { %1907 = vmatmul.msk.bf16.gmra.mxu1 %vm292_vm2, %v2066_v0  ;;  %1932 = vmatmul.msk.bf16.vlgmr.msrb.gmra.mxu2 %vm292_vm2, %v476_v1  ;;  %v622_v0 = vrot.slane %v611_v57, 2  ;;  %v737_v1 = vrot.slane %v726_v59, 3  ;;  %v2098_v57 = vld [vmem:[%s2221_s29 + $0x48] sm:$0xff] }
  0x37   : > { %v623_v5 = vsel %vm612_vm3, %v620_v36, %v622_v0  ;;  %v1179_v36 = vshll.u32 %v2356_v34, 16  ;;  %v844_v0 = vshrl.u32 %v2305_v24, 16 }
  0x39   : > { %1985 = vmatmul.msk.bf16.gmra.mxu0 %vm292_vm2, %v732_v6  ;;  %v738_v6 = vsel %vm727_vm4, %v735_v37, %v737_v1  ;;  %v964_v37 = vrot.slane %v1999_v8, 1  ;;  %v847_v1 = vshll.u32 %v2305_v24, 16  ;;  %v801_v24 = vld [vmem:[%s2221_s29 + $0x80] sm:$0x7] }
  0x3a   : > { %1959 = vmatmul.msk.bf16.gmra.mxu3 %vm292_vm2, %v617_v4  ;;  %v463_v4 = vpack.c.b16 %v457_v62, %v457_v62  ;;  %v1083_v62 = vrot.slane %v2098_v57, 2 }
  0x3b   : > { %v966_v42 = vsel %vm280_vm1, %v964_v37, %v965_v38 }
  0x3c   : > { %v505_v10 = vshll.u32 %v463_v4, 16 }
  0x45   : > { %1908 = vmatmul.msk.bf16.gmra.mxu1 %vm292_vm2, %v2067_v13  ;;  %1933 = vmatmul.msk.bf16.gmra.mxu2 %vm292_vm2, %v484_v14  ;;  %v2095_v13 = vld [vmem:[%s2221_s29 + $0x30] sm:$0xf0]  ;;  %v1159_v14 = vshrl.u32 %v1999_v8, 16 }
  0x46   : > { %v2025_v20 = vor.u32 %v2095_v13, %v2024_v12 }
  0x47   : > { %v1161_v22 = vrot.slane %v1159_v14, 1  ;;  %v805_v14 = vunpack.c.l.b16 %v801_v24 }
  0x48   : > { %v1078_v28 = vrot.slane %v2025_v20, 2  ;;  %v1151_v20 = vld [vmem:[%s2221_s29 + $0x2c] sm:$0x3] }
  0x49   : > { %1986 = vmatmul.msk.bf16.gmra.mxu0 %vm292_vm2, %v734_v19  ;;  %v507_v19 = vrot.slane %v505_v10, 1  ;;  %v1165_v30 = vor.u32 %v1164_v23, %v1161_v22  ;;  %v806_v23 = vpack.c.b16 %v805_v14, %v805_v14 }
  0x4a   : > { %1960 = vmatmul.msk.bf16.gmra.mxu3 %vm292_vm2, %v619_v17  ;;  %v1170_v17 = vshll.u32 %v2341_v7, 16  ;;  %v1080_v32 = vsel %vm612_vm3, %v1078_v28, %v1079_v29  ;;  %v849_v7 = vrot.slane %v847_v1, 3 }
  0x4b   : > { %v508_v27 = vsel %vm464_vm5, %v503_v18, %v507_v19 }
  0x4c   : > { %v1172_v26 = vrot.slane %v1170_v17, 2  ;;  %v2099_v17 = vld [vmem:[%s2221_s29 + $0x50] sm:$0xff] }
  0x4e   : > { %v1173_v31 = vor.u32 %v1172_v26, %v1169_v25  ;;  %v970_v26 = vsel %vm280_vm1, %v967_v56, %v969_v15 }
  0x55   : > { %1909 = vmatmul.msk.bf16.gmra.mxu1 %vm292_vm2, %v2068_v33  ;;  %1934 = vmatmul.msk.bf16.gmra.mxu2 %vm292_vm2, %v492_v35  ;;  %v1174_v33 = vsel %vm1157_vm7, %v1165_v30, %v1173_v31  ;;  %v1176_v35 = vshrl.u32 %v2356_v34, 16 }
  0x59   : > { %1987 = vmatmul.msk.bf16.gmra.mxu0 %vm292_vm2, %v736_v43  ;;  %v1081_v43 = vrot.slane %v2097_v39, 2 }
  0x5a   : > { %1961 = vmatmul.msk.bf16.gmra.mxu3 %vm292_vm2, %v621_v41  ;;  %v1181_v41 = vrot.slane %v1179_v36, 2 }
  0x5b   : > { %v1082_v45 = vsel %vm612_vm3, %v1079_v29, %v1081_v43  ;;  %v1084_v2 = vsel %vm612_vm3, %v1081_v43, %v1083_v62  ;;  %v1155_v29 = vunpack.c.l.b16 %v1151_v20 }
  0x5d   : > { %v1156_v37 = vpack.c.b16 %v1155_v29, %v1155_v29 }
  0x65   : > { %1910 = vmatmul.msk.bf16.gmra.mxu1 %vm292_vm2, %v2069_v61  ;;  %1935 = vmatmul.msk.bf16.gmra.mxu2 %vm292_vm2, %v500_v63  ;;  %v968_v61 = vsel %vm280_vm1, %v965_v38, %v967_v56  ;;  %v1191_v63 = vor.u32 %v1190_v58, %v1187_v11  ;;  %v1047_v38 = vld [vmem:[%s2221_s29 + $0x58] sm:$0x3] }
  0x66   : > { %v1071_v43 = vunpack.c.l.b16 %v1047_v38 }
  0x68   : > { %v1077_v51 = vpack.c.b16 %v1071_v43, %v1071_v43 }
  0x69   : > { %1988 = vmatmul.msk.bf16.gmra.mxu0 %vm292_vm2, %v738_v6  ;;  %v846_v6 = vrot.slane %v844_v0, 2 }
  0x6a   : > { %1962 = vmatmul.msk.bf16.gmra.mxu3 %vm292_vm2, %v623_v5  ;;  %v1087_v58 = vrot.slane %v1077_v51, 2 }
  0x6b   : > { %v850_v13 = vor.u32 %v849_v7, %v846_v6 }
  0x6d   : > { %v851_v22 = vsel %vm807_vm6, %v841_v55, %v850_v13 }
  0x75   : > { %1936 = vmatmul.msk.bf16.gmra.mxu2 %vm292_vm2, %v508_v27  ;;  %1990 = vmatmul.msk.bf16.vlgmr.msra.gmra.mxu1 %vm292_vm2, %v824_v40  ;;  %v1178_v40 = vrot.slane %v1176_v35, 1  ;;  %v1085_v27 = vrot.slane %v2099_v17, 2 }
  0x77   : > { %v1182_v44 = vor.u32 %v1181_v41, %v1178_v40  ;;  %v1086_v34 = vsel %vm612_vm3, %v1083_v62, %v1085_v27  ;;  %v933_v62 = vld [vmem:[%s2221_s29 + $0x2c] sm:$0x1]  ;;  %v1088_v0 = vsel %vm612_vm3, %v1085_v27, %v1087_v58 }
  0x79   : > { %2048 = vmatmul.msk.bf16.vlgmr.msra.gmra.mxu0 %vm292_vm2, %v1174_v33  ;;  %v1183_v48 = vsel %vm1157_vm7, %v1173_v31, %v1182_v44  ;;  %v1192_v4 = vsel %vm1157_vm7, %v1182_v44, %v1191_v63  ;;  %v856_v33 = vshll.u32 %v806_v23, 16  ;;  %v1203_v44 = vshrl.u32 %v1156_v37, 16 }
  0x7a   : > { %2042 = vmatmul.msk.bf16.vlgmr.msra.gmra.mxu3 %vm292_vm2, %v1080_v32  ;;  %v853_v32 = vshrl.u32 %v806_v23, 16 }
  0x7b   : > { %v858_v41 = vrot.slane %v856_v33, 3  ;;  %v1205_v52 = vrot.slane %v1203_v44, 1 }
  0x7c   : > { %v855_v40 = vrot.slane %v853_v32, 2 }
  0x85   : > { %1991 = vmatmul.msk.bf16.gmra.mxu1 %vm292_vm2, %v833_v60  ;;  %2016 = vmatmul.msk.bf16.vlgmr.msra.gmra.mxu2 %vm292_vm2, %v966_v42  ;;  %v842_v60 = vsel %vm807_vm6, %v2327_v54, %v841_v55  ;;  %v2392_v54 = vld [vmem:[%s2221_s29 + $0x24] sm:$0xff] }
  0x86   : > { %v1194_v9 = vshrl.u32 %v2392_v54, 16  ;;  %v1197_v10 = vshll.u32 %v2392_v54, 16  ;;  %v971_v49 = vrot.slane %v2392_v54, 1 }
  0x88   : > { %v1196_v18 = vrot.slane %v1194_v9, 1  ;;  %v1199_v19 = vrot.slane %v1197_v10, 2  ;;  %v972_v11 = vsel %vm280_vm1, %v969_v15, %v971_v49 }
  0x89   : > { %2049 = vmatmul.msk.bf16.gmra.mxu0 %vm292_vm2, %v1183_v48  ;;  %v859_v48 = vor.u32 %v858_v41, %v855_v40 }
  0x8a   : > { %2043 = vmatmul.msk.bf16.gmra.mxu3 %vm292_vm2, %v1082_v45  ;;  %v1200_v28 = vor.u32 %v1199_v19, %v1196_v18  ;;  %v1206_v45 = vshll.u32 %v1156_v37, 16 }
  0x8b   : > { %v860_v57 = vsel %vm807_vm6, %v850_v13, %v859_v48 }
  0x8c   : > { %v1201_v36 = vsel %vm1157_vm7, %v1191_v63, %v1200_v28  ;;  %v1208_v53 = vrot.slane %v1206_v45, 2 }
  0x92   : > { %v2380_v59 = vpop.f32.mrf.mxu1 }
  0x95   : > { %1992 = vmatmul.msk.bf16.gmra.mxu1 %vm292_vm2, %v842_v60  ;;  %2017 = vmatmul.msk.bf16.gmra.mxu2 %vm292_vm2, %v968_v61  ;;  %v1209_v60 = vor.u32 %v1208_v53, %v1205_v52 }
  0x96   : > { %v321_v3 = vpop.f32.mrf.mxu0 }
  0x98   : > { %v2394_v5 = vpop.f32.mrf.mxu2 }
  0x99   : > { %2050 = vmatmul.msk.bf16.gmra.mxu0 %vm292_vm2, %v1192_v4 }
  0x9a   : > { %2044 = vmatmul.msk.bf16.gmra.mxu3 %vm292_vm2, %v1084_v2  ;;  %v2398_v8 = vpop.f32.mrf.mxu1  ;;  %v957_v2 = vunpack.c.l.b16 %v933_v62 }
  0x9d   : > { %v2403_v12 = vpop.f32.mrf.mxu3 }
  0x9e   : > { %v323_v16 = vpop.f32.mrf.mxu0 }
  0xa0   : > { %v2408_v21 = vpop.f32.mrf.mxu2 }
  0xa2   : > { %v398_v25 = vpop.f32.mrf.mxu1 }
  0xa3   : > { %v399_v30 = vadd.f32 %v398_v25, %v321_v3  ;;  %v1210_v3 = vsel %vm1157_vm7, %v1200_v28, %v1209_v60 }
  0xa5   : > { %v2412_v31 = vpop.f32.mrf.mxu3  ;;  %1993 = vmatmul.msk.bf16.gmra.mxu1 %vm292_vm2, %v851_v22  ;;  %2018 = vmatmul.msk.bf16.gmra.mxu2 %vm292_vm2, %v970_v26 }
  0xa6   : > { %v766_v35 = vpop.f32.mrf.mxu0 }
  0xa8   : > { %v2419_v39 = vpop.f32.mrf.mxu2 }
  0xa9   : > { %2051 = vmatmul.msk.bf16.gmra.mxu0 %vm292_vm2, %v1201_v36 }
  0xaa   : > { %2045 = vmatmul.msk.bf16.gmra.mxu3 %vm292_vm2, %v1086_v34  ;;  %v400_v42 = vpop.f32.mrf.mxu1 }
  0xab   : > { %v401_v46 = vadd.f32 %v400_v42, %v323_v16 }
  0xad   : > { %v651_v47 = vpop.f32.mrf.mxu3 }
  0xae   : > { %v768_v50 = vpop.f32.mrf.mxu0 }
  0xb0   : > { %v2424_v55 = vpop.f32.mrf.mxu2 }
  0xb2   : > { %v403_v56 = vpop.f32.mrf.mxu1 }
  0xb3   : > { %v404_v61 = vadd.f32 %v403_v56, %v2380_v59  ;;  %v963_v59 = vpack.c.b16 %v957_v2, %v957_v2 }
  0xb5   : > { %v653_v63 = vpop.f32.mrf.mxu3  ;;  %1994 = vmatmul.msk.bf16.gmra.mxu1 %vm292_vm2, %v860_v57  ;;  %2019 = vmatmul.msk.bf16.gmra.mxu2 %vm292_vm2, %v972_v11  ;;  %v973_v13 = vrot.slane %v963_v59, 1  ;;  %v2155_v57 = vmov 0  }
  0xb6   : > { %v771_v1 = vpop.f32.mrf.mxu0 }
  0xb7   : > { %v974_v18 = vsel %vm280_vm1, %v971_v49, %v973_v13 }
  0xb8   : > { %v536_v4 = vpop.f32.mrf.mxu2 }
  0xb9   : > { %v561_v54 = vadd.f32 %v536_v4, %v399_v30  ;;  %2052 = vmatmul.msk.bf16.gmra.mxu0 %vm292_vm2, %v1210_v3 }
  0xba   : > { %2046 = vmatmul.msk.bf16.gmra.mxu3 %vm292_vm2, %v1088_v0  ;;  %v405_v6 = vpop.f32.mrf.mxu1 }
  0xbb   : > { %v676_v7 = vadd.f32 %v651_v47, %v561_v54  ;;  %v406_v24 = vadd.f32 %v405_v6, %v2398_v8 }
  0xbd   : > { %v656_v9 = vpop.f32.mrf.mxu3  ;;  %v2437_v10 = vadd.f32 %v766_v35, %v676_v7  ;;  %v1283_v35 = vlaneseq }
  0xbe   : > { %v773_v14 = vpop.f32.mrf.mxu0 }
  0xbf   : > { %v2447_v37 = vshrl.u32 %v1283_v35, 7 }
  0xc0   : > { %v538_v15 = vpop.f32.mrf.mxu2 }
  0xc1   : > { %v562_v16 = vadd.f32 %v538_v15, %v401_v46  ;;  %v1297_v42 = vand.u32 65535, %v2447_v37  ;;  %v2474_v15 = vadd.s32 16, %v2447_v37 }
  0xc2   : > { %v408_v17 = vpop.f32.mrf.mxu1 }
  0xc3   : > { %v677_v19 = vadd.f32 %v653_v63, %v562_v16  ;;  %v409_v20 = vadd.f32 %v408_v17, %v2394_v5  ;;  %v1301_v45 = vmul.u32 52428, %v1297_v42  ;;  %v1300_v47 = vmul.u32 52429, %v1297_v42 }
  0xc5   : > { %v658_v22 = vpop.f32.mrf.mxu3  ;;  %2020 = vmatmul.msk.bf16.gmra.mxu2 %vm292_vm2, %v974_v18  ;;  %v2442_v23 = vadd.f32 %v768_v50, %v677_v19  ;;  %v1304_v49 = vshll.u32 %v1301_v45, 16  ;;  %v1305_v7 = vshrl.u32 %v1301_v45, 16  ;;  %v2488_v45 = vadd.s32 24, %v2447_v37 }
  0xc6   : > { %v776_v25 = vpop.f32.mrf.mxu0 }
  0xc7   : > { %vm1308_vm8 = vc.u32 %v1300_v47, %v1304_v49  ;;  %v1310_v58 = vadd.s32 %v1304_v49, %v1300_v47 }
  0xc8   : > { %v541_v8 = vpop.f32.mrf.mxu2  ;;  %v1309_v11 = vsel %vm1308_vm8, 1, %v2155_v57 }
  0xc9   : > { %v563_v26 = vadd.f32 %v541_v8, %v404_v61  ;;  %v2461_v61 = vadd.s32 8, %v2447_v37 }
  0xca   : > { %v410_v27 = vpop.f32.mrf.mxu1 }
  0xcb   : > { %v678_v28 = vadd.f32 %v656_v9, %v563_v26  ;;  %v411_v29 = vadd.f32 %v410_v27, %v2408_v21  ;;  %v1298_v21 = vshrl.u32 %v2447_v37, 16  ;;  %v1327_v2 = vshrl.u32 %v2461_v61, 16 }
  0xcd   : > { %v661_v30 = vpop.f32.mrf.mxu3  ;;  %v2445_v32 = vadd.f32 %v771_v1, %v678_v28  ;;  %v1302_v48 = vmul.u32 52429, %v1298_v21  ;;  %v1303_v52 = vmul.u32 52428, %v1298_v21  ;;  %v1326_v1 = vand.u32 65535, %v2461_v61 }
  0xce   : > { %v778_v33 = vpop.f32.mrf.mxu0  ;;  %v2470_v6 = vmul.u32 52429, %v1327_v2  ;;  %v1332_v19 = vmul.u32 52428, %v1327_v2 }
  0xcf   : > { %v1306_v53 = vshll.u32 %v1302_v48, 16  ;;  %v1311_v0 = vadd.s32 %v1309_v11, %v1303_v52  ;;  %v1329_v4 = vmul.u32 52429, %v1326_v1  ;;  %v1330_v54 = vmul.u32 52428, %v1326_v1 }
  0xd0   : > { %v543_v34 = vpop.f32.mrf.mxu2  ;;  %v1307_v27 = vshrl.u32 %v1302_v48, 16 }
  0xd1   : > { %v564_v36 = vadd.f32 %v543_v34, %v406_v24  ;;  %vm1312_vm9 = vc.u32 %v1310_v58, %v1306_v53  ;;  %v1333_v13 = vshll.u32 %v1330_v54, 16  ;;  %v1384_v53 = vand.u32 65535, %v2488_v45 }
  0xd2   : > { %v413_v5 = vpop.f32.mrf.mxu1 }
  0xd3   : > { %v679_v38 = vadd.f32 %v658_v22, %v564_v36  ;;  %v414_v40 = vadd.f32 %v413_v5, %v2419_v39  ;;  %vm1337_vm10 = vc.u32 %v1329_v4, %v1333_v13  ;;  %v1355_v22 = vand.u32 65535, %v2474_v15 }
  0xd5   : > { %v663_v41 = vpop.f32.mrf.mxu3  ;;  %v2451_v43 = vadd.f32 %v773_v14, %v679_v38  ;;  %v1335_v14 = vshll.u32 %v2470_v6, 16  ;;  %v1358_v35 = vmul.u32 52429, %v1355_v22 }
  0xd6   : > { %v2453_v44 = vpop.f32.mrf.mxu0 }
  0xd8   : > { %v546_v46 = vpop.f32.mrf.mxu2 }
  0xd9   : > { %v565_v50 = vadd.f32 %v546_v46, %v409_v20  ;;  %v1339_v20 = vadd.s32 %v1333_v13, %v1329_v4 }
  0xda   : > { %v415_v51 = vpop.f32.mrf.mxu1 }
  0xdb   : > { %v680_v39 = vadd.f32 %v661_v30, %v565_v50  ;;  %v2457_v56 = vadd.f32 %v415_v51, %v2424_v55  ;;  %v1313_v55 = vsel %vm1312_vm9, 1, %v2155_v57  ;;  %vm1341_vm11 = vc.u32 %v1339_v20, %v1335_v14 }
  0xdc   : > { %v1315_v9 = vadd.s32 %v1313_v55, %v1311_v0  ;;  %v1359_v30 = vmul.u32 52428, %v1355_v22  ;;  %v1342_v38 = vsel %vm1341_vm11, 1, %v2155_v57  ;;  %v1334_v50 = vshrl.u32 %v1330_v54, 16 }
  0xdd   : > { %v666_v60 = vpop.f32.mrf.mxu3  ;;  %v2463_v62 = vadd.f32 %v776_v25, %v680_v39  ;;  %v1338_v25 = vsel %vm1337_vm10, 1, %v2155_v57  ;;  %v1336_v55 = vshrl.u32 %v2470_v6, 16 }
  0xde   : > { %v2465_v63 = vpop.f32.mrf.mxu0  ;;  %v1316_v28 = vadd.s32 %v1315_v9, %v1305_v7  ;;  %v1340_v34 = vadd.s32 %v1338_v25, %v1332_v19  ;;  %v1363_v0 = vshrl.u32 %v1359_v30, 16  ;;  %v1387_v7 = vmul.u32 52429, %v1384_v53 }
  0xdf   : > { %v2505_v19 = vadd.s32 32, %v2447_v37 }
  0xe0   : > { %v548_v3 = vpop.f32.mrf.mxu2  ;;  %v1317_v21 = vadd.s32 %v1316_v28, %v1307_v27  ;;  %v1344_v51 = vadd.s32 %v1342_v38, %v1340_v34 }
  0xe1   : > { %v566_v59 = vadd.f32 %v548_v3, %v411_v29  ;;  %v1356_v29 = vshrl.u32 %v2474_v15, 16 }
  0xe2   : > { %v418_v24 = vpop.f32.mrf.mxu1  ;;  %v1318_v11 = vshrl.u32 %v1317_v21, 3  ;;  %v1345_v3 = vadd.s32 %v1344_v51, %v1334_v50 }
  0xe3   : > { %v681_v16 = vadd.f32 %v663_v41, %v566_v59  ;;  %v2477_v17 = vadd.f32 %v418_v24, %v2403_v12  ;;  %v1360_v36 = vmul.u32 52429, %v1356_v29  ;;  %v1362_v41 = vshll.u32 %v1359_v30, 16 }
  0xe4   : > { %v1319_v13 = vmul.u32 10, %v1318_v11  ;;  %v1346_v27 = vadd.s32 %v1345_v3, %v1336_v55  ;;  %v1413_v30 = vand.u32 65535, %v2505_v19 }
  0xe5   : > { %v668_v18 = vpop.f32.mrf.mxu3  ;;  %v2481_v8 = vadd.f32 %v778_v33, %v681_v16  ;;  %v1361_v33 = vmul.u32 52428, %v1356_v29  ;;  %v1364_v48 = vshll.u32 %v1360_v36, 16  ;;  %vm1366_vm12 = vc.u32 %v1358_v35, %v1362_v41 }
  0xe6   : > { %v2483_v26 = vpop.f32.mrf.mxu0  ;;  %v1368_v52 = vadd.s32 %v1362_v41, %v1358_v35  ;;  %v1365_v4 = vshrl.u32 %v1360_v36, 16  ;;  %v1414_v35 = vshrl.u32 %v2505_v19, 16  ;;  %v1347_v38 = vshrl.u32 %v1346_v27, 3 }
  0xe8   : > { %v551_v12 = vpop.f32.mrf.mxu2  ;;  %vm1370_vm13 = vc.u32 %v1368_v52, %v1364_v48  ;;  %v2517_v48 = vmul.u32 52429, %v1414_v35 }
  0xe9   : > { %v567_v5 = vadd.f32 %v551_v12, %v414_v40  ;;  %v1367_v40 = vsel %vm1366_vm12, 1, %v2155_v57  ;;  %v1371_v54 = vsel %vm1370_vm13, 1, %v2155_v57  ;;  %v2510_v12 = vsub.s32 %v2447_v37, %v1319_v13 }
  0xea   : > { %v420_v42 = vpop.f32.mrf.mxu1  ;;  %v1369_v58 = vadd.s32 %v1367_v40, %v1361_v33  ;;  %v2546_v13 = vadd.s32 40, %v2447_v37 }
  0xeb   : > { %v682_v46 = vadd.f32 %v666_v60, %v567_v5  ;;  %v2491_v47 = vadd.f32 %v420_v42, %v2412_v31  ;;  %v1385_v31 = vshrl.u32 %v2488_v45, 16  ;;  %v1388_v60 = vmul.u32 52428, %v1384_v53 }
  0xec   : > { %v1416_v42 = vmul.u32 52429, %v1413_v30  ;;  %vm1584_vm0 = vcmp.ne.s32.totalorder %v2510_v12, 0  ;;  %vm1594_vm1 = vcmp.lt.s32.totalorder %v2510_v12, 0  ;;  %v1614_v3 = vadd.s32 10, %v2510_v12 }
  0xed   : > { %v671_v49 = vpop.f32.mrf.mxu3  ;;  %v2496_v39 = vadd.f32 %v2453_v44, %v682_v46  ;;  %v1373_v44 = vadd.s32 %v1371_v54, %v1369_v58  ;;  %v1389_v24 = vmul.u32 52429, %v1385_v31  ;;  %v1390_v14 = vmul.u32 52428, %v1385_v31  ;;  %vm2539_vm4 = vmand %vm1594_vm1, %vm1584_vm0 }
  0xee   : > { %v2499_v2 = vpop.f32.mrf.mxu0  ;;  %v1391_v16 = vshll.u32 %v1388_v60, 16  ;;  %v1392_v36 = vshrl.u32 %v1388_v60, 16  ;;  %v1419_v58 = vmul.u32 52428, %v1414_v35  ;;  %v1348_v31 = vmul.u32 10, %v1347_v38 }
  0xef   : > { %v1374_v22 = vadd.s32 %v1373_v44, %v1363_v0  ;;  %v1393_v25 = vshll.u32 %v1389_v24, 16  ;;  %v1394_v53 = vshrl.u32 %v1389_v24, 16  ;;  %v1422_v60 = vshll.u32 %v2517_v48, 16 }
  0xf0   : > { %v553_v1 = vpop.f32.mrf.mxu2  ;;  %vm1395_vm14 = vc.u32 %v1387_v7, %v1391_v16 }
  0xf1   : > { %v568_v59 = vadd.f32 %v553_v1, %v2457_v56  ;;  %v1375_v28 = vadd.s32 %v1374_v22, %v1365_v4  ;;  %v1396_v29 = vsel %vm1395_vm14, 1, %v2155_v57  ;;  %v1397_v56 = vadd.s32 %v1391_v16, %v1387_v7 }
  0xf2   : > { %v888_v9 = vpop.f32.mrf.mxu1  ;;  %v1398_v34 = vadd.s32 %v1396_v29, %v1390_v14  ;;  %v1349_v7 = vsub.s32 %v2461_v61, %v1348_v31  ;;  %v1442_v22 = vand.u32 65535, %v2546_v13  ;;  %v2156_v31 = vmov 0.0  }
  0xf3   : > { %v683_v20 = vadd.f32 %v668_v18, %v568_v59  ;;  %vm1399_vm15 = vc.u32 %v1397_v56, %v1393_v25  ;;  %v2513_v18 = vmul.u32 52428, %v1413_v30  ;;  %v1376_v33 = vshrl.u32 %v1375_v28, 3 }
  0xf4   : > { %v1400_v41 = vsel %vm1399_vm15, 1, %v2155_v57  ;;  %v913_v16 = vadd.f32 %v888_v9, %v2437_v10  ;;  %vm1585_vm5 = vcmp.ne.s32.totalorder %v1349_v7, 0  ;;  %vm1595_vm6 = vcmp.lt.s32.totalorder %v1349_v7, 0 }
  0xf5   : > { %v673_v6 = vpop.f32.mrf.mxu3  ;;  %v1402_v46 = vadd.s32 %v1400_v41, %v1398_v34  ;;  %v1420_v51 = vshll.u32 %v2513_v18, 16  ;;  %v2525_v52 = vadd.f32 %v2465_v63, %v683_v20  ;;  %v1377_v55 = vmul.u32 10, %v1376_v33  ;;  %vm2571_vm9 = vmand %vm1595_vm6, %vm1585_vm5 }
  0xf6   : > { %v2519_v50 = vpop.f32.mrf.mxu0  ;;  %v1624_v20 = vsel %vm2539_vm4, %v1614_v3, %v2510_v12  ;;  %v1421_v27 = vshrl.u32 %v2513_v18, 16  ;;  %v1446_v10 = vmul.u32 52428, %v1442_v22  ;;  %v1423_v9 = vshrl.u32 %v2517_v48, 16 }
  0xf7   : > { %v1403_v11 = vadd.s32 %v1402_v46, %v1392_v36  ;;  %vm1424_vm2 = vc.u32 %v1416_v42, %v1420_v51  ;;  %v1426_v1 = vadd.s32 %v1420_v51, %v1416_v42  ;;  %v2550_v14 = vsub.s32 %v2474_v15, %v1377_v55 }
  0xf8   : > { %v556_v5 = vpop.f32.mrf.mxu2  ;;  %v1425_v4 = vsel %vm1424_vm2, 1, %v2155_v57  ;;  %v1443_v15 = vshrl.u32 %v2546_v13, 16  ;;  %v1445_v30 = vmul.u32 52429, %v1442_v22  ;;  %v1449_v34 = vshll.u32 %v1446_v10, 16 }
  0xf9   : > { %v569_v21 = vadd.f32 %v556_v5, %v2477_v17  ;;  %vm1428_vm3 = vc.u32 %v1426_v1, %v1422_v60  ;;  %v1404_v54 = vadd.s32 %v1403_v11, %v1394_v53  ;;  %v1427_v59 = vadd.s32 %v1425_v4, %v1419_v58 }
  0xfa   : > { %v2527_v17 = vpop.f32.mrf.mxu1  ;;  %v1429_v24 = vsel %vm1428_vm3, 1, %v2155_v57  ;;  %vm1586_vm7 = vcmp.ne.s32.totalorder %v2550_v14, 0  ;;  %vm1596_vm8 = vcmp.lt.s32.totalorder %v2550_v14, 0  ;;  %v1447_v12 = vmul.u32 52429, %v1443_v15 }
  0xfb   : > { %v684_v40 = vadd.f32 %v671_v49, %v569_v21  ;;  %v1405_v61 = vshrl.u32 %v1404_v54, 3  ;;  %v1431_v28 = vadd.s32 %v1429_v24, %v1427_v59  ;;  %v1448_v38 = vmul.u32 52428, %v1443_v15  ;;  %vm2587_vm12 = vmand %vm1596_vm8, %vm1586_vm7 }
  0xfc   : > { %v2576_v41 = vadd.s32 48, %v2447_v37  ;;  %vm1634_vm10 = vcmp.lt.s32.totalorder %v1624_v20, 8  ;;  %v1451_v21 = vshll.u32 %v1447_v12, 16  ;;  %vm1453_vm11 = vc.u32 %v1445_v30, %v1449_v34 }
  0xfd   : > { %v1116_v0 = vpop.f32.mrf.mxu3  ;;  %v2533_v63 = vadd.f32 %v2483_v26, %v684_v40  ;;  %v1406_v18 = vmul.u32 10, %v1405_v61  ;;  %v1432_v5 = vadd.s32 %v1431_v28, %v1421_v27  ;;  %v1455_v33 = vadd.s32 %v1449_v34, %v1445_v30 }
  0xfe   : > { %v2560_v56 = vpop.f32.mrf.mxu0  ;;  %v1454_v48 = vsel %vm1453_vm11, 1, %v2155_v57  ;;  %v1471_v11 = vand.u32 65535, %v2576_v41  ;;  %v2053_v60 = vsel %vm1634_vm10, 1.0, %v2156_v31  ;;  %v1450_v4 = vshrl.u32 %v1446_v10, 16 }
  0xff   : > { %v1456_v53 = vadd.s32 %v1454_v48, %v1448_v38  ;;  %vm1457_vm13 = vc.u32 %v1455_v33, %v1451_v21  ;;  %v2594_v1 = vsub.s32 %v2488_v45, %v1406_v18  ;;  %v1433_v55 = vadd.s32 %v1432_v5, %v1423_v9 }
 0x100   : > { %v558_v44 = vpop.f32.mrf.mxu2  ;;  %v1458_v49 = vsel %vm1457_vm13, 1, %v2155_v57  ;;  %v2605_v54 = vmul.u32 52428, %v1471_v11  ;;  %v914_v45 = vadd.f32 %v2527_v17, %v2442_v23  ;;  %v1474_v20 = vmul.u32 52429, %v1471_v11 }
 0x101   : > { %v570_v26 = vadd.f32 %v558_v44, %v2491_v47  ;;  %v1615_v47 = vadd.s32 10, %v1349_v7  ;;  %vm1587_vm15 = vcmp.ne.s32.totalorder %v2594_v1, 0  ;;  %v1434_v23 = vshrl.u32 %v1433_v55, 3 }
 0x102   : > { %v1478_v17 = vshll.u32 %v2605_v54, 16  ;;  %vm1597_vm0 = vcmp.lt.s32.totalorder %v2594_v1, 0  ;;  %v2627_v28 = vadd.s32 56, %v2447_v37 }
 0x103   : > { %v685_v25 = vadd.f32 %v673_v6, %v570_v26  ;;  %v2566_v6 = vpop.f32.mrf.mxu1  ;;  %v1625_v51 = vsel %vm2571_vm9, %v1615_v47, %v1349_v7  ;;  %v1452_v26 = vshrl.u32 %v1447_v12, 16  ;;  %v1617_v47 = vadd.s32 10, %v2594_v1  ;;  %vm2642_vm3 = vmand %vm1597_vm0, %vm1587_vm15 }
 0x104   : > { %vm2610_vm14 = vcmp.lt.s32.totalorder %v1625_v51, 8  ;;  %vm1482_vm1 = vc.u32 %v1474_v20, %v1478_v17  ;;  %v1484_v12 = vadd.s32 %v1478_v17, %v1474_v20  ;;  %v1500_v34 = vand.u32 65535, %v2627_v28 }
 0x105   : > { %v2558_v29 = vpop.f32.mrf.mxu3  ;;  %v2569_v35 = vadd.f32 %v2499_v2, %v685_v25  ;;  %v1616_v2 = vadd.s32 10, %v2550_v14  ;;  %v2054_v10 = vsel %vm2610_vm14, 1.0, %v2156_v31  ;;  %v1483_v30 = vsel %vm1482_vm1, 1, %v2155_v57 }
 0x106   : > { %v2617_v24 = vpop.f32.mrf.mxu0  ;;  %v1435_v38 = vmul.u32 10, %v1434_v23  ;;  %v1501_v33 = vshrl.u32 %v2627_v28, 16  ;;  %v1503_v51 = vmul.u32 52429, %v1500_v34 }
 0x107   : > { %v1626_v7 = vsel %vm2587_vm12, %v1616_v2, %v2550_v14 }
 0x108   : > { %v1002_v42 = vpop.f32.mrf.mxu2  ;;  %vm2636_vm2 = vcmp.lt.s32.totalorder %v1626_v7, 8 }
 0x109   : > { %v1027_v46 = vadd.f32 %v1002_v42, %v913_v16  ;;  %v1460_v16 = vadd.s32 %v1458_v49, %v1456_v53  ;;  %v1627_v53 = vsel %vm2642_vm3, %v1617_v47, %v2594_v1  ;;  %v2665_v1 = vadd.s32 64, %v2447_v37 }
 0x10a   : > { %vm2675_vm6 = vcmp.lt.s32.totalorder %v1627_v53, 8 }
 0x10b   : > { %v1141_v58 = vadd.f32 %v1116_v0, %v1027_v46  ;;  %v1472_v0 = vshrl.u32 %v2576_v41, 16  ;;  %v895_v25 = vpop.f32.mrf.mxu1  ;;  %v1461_v27 = vadd.s32 %v1460_v16, %v1450_v4  ;;  %v2647_v46 = vmul.u32 52428, %v1500_v34 }
 0x10c   : > { %v2661_v4 = vsub.s32 %v2505_v19, %v1435_v38  ;;  %v2055_v19 = vsel %vm2636_vm2, 1.0, %v2156_v31 }
 0x10d   : > { %v2601_v3 = vpop.f32.mrf.mxu3  ;;  %v1263_v59 = vadd.f32 %v2519_v50, %v1141_v58  ;;  %v2619_v22 = vmul.u32 52429, %v1472_v0  ;;  %v1477_v50 = vmul.u32 52428, %v1472_v0  ;;  %v1462_v9 = vadd.s32 %v1461_v27, %v1452_v26 }
 0x10e   : > { %v2656_v58 = vmul.u32 52429, %v1501_v33  ;;  %v1245_v0 = vpop.f32.mrf.mxu0  ;;  %v916_v27 = vadd.f32 %v895_v25, %v2451_v43  ;;  %vm1588_vm7 = vcmp.ne.s32.totalorder %v2661_v4, 0  ;;  %vm1598_vm8 = vcmp.lt.s32.totalorder %v2661_v4, 0 }
 0x10f   : > { %1273 = vst [vmem:[%s2599_s18] sm:$0xff] %v1263_v59  ;;  %v1480_v14 = vshll.u32 %v2619_v22, 16  ;;  %v1485_v42 = vadd.s32 %v1483_v30, %v1477_v50  ;;  %v1664_v21 = vmul.f32 %v2053_v60, %v1263_v59  ;;  %v1463_v11 = vshrl.u32 %v1462_v9, 3  ;;  %vm2690_vm10 = vmand %vm1598_vm8, %vm1588_vm7 }
 0x110   : > { %v1004_v61 = vpop.f32.mrf.mxu2  ;;  %v1507_v60 = vshll.u32 %v2647_v46, 16  ;;  %v1481_v17 = vshrl.u32 %v2619_v22, 16  ;;  %v1529_v9 = vand.u32 65535, %v2665_v1  ;;  %v1530_v43 = vshrl.u32 %v2665_v1, 16 }
 0x111   : > { %v1028_v15 = vadd.f32 %v1004_v61, %v914_v45  ;;  %vm1486_vm4 = vc.u32 %v1484_v12, %v1480_v14  ;;  %v1506_v45 = vmul.u32 52428, %v1501_v33  ;;  %v1508_v5 = vshrl.u32 %v2647_v46, 16 }
 0x112   : > { %v1487_v48 = vsel %vm1486_vm4, 1, %v2155_v57  ;;  %vm1511_vm5 = vc.u32 %v1503_v51, %v1507_v60  ;;  %v1535_v53 = vmul.u32 52428, %v1530_v43 }
 0x113   : > { %v1142_v36 = vadd.f32 %v2558_v29, %v1028_v15  ;;  %v915_v29 = vadd.f32 %v2566_v6, %v2445_v32  ;;  %v1479_v32 = vshrl.u32 %v2605_v54, 16  ;;  %v1689_v6 = vmul.f32 %v1664_v21, %v1263_v59  ;;  %v898_v20 = vpop.f32.mrf.mxu1 }
 0x114   : > { %v1512_v16 = vsel %vm1511_vm5, 1, %v2155_v57  ;;  %v1464_v54 = vmul.u32 10, %v1463_v11  ;;  %v1509_v59 = vshll.u32 %v2656_v58, 16  ;;  %v1513_v15 = vadd.s32 %v1507_v60, %v1503_v51 }
 0x115   : > { %v1264_v2 = vadd.f32 %v2560_v56, %v1142_v36  ;;  %v1123_v40 = vpop.f32.mrf.mxu3  ;;  %v1489_v56 = vadd.s32 %v1487_v48, %v1485_v42  ;;  %v2695_v42 = vmul.u32 52429, %v1530_v43  ;;  %v2056_v48 = vsel %vm2675_vm6, 1.0, %v2156_v31 }
 0x116   : > { %v2685_v22 = vsub.s32 %v2546_v13, %v1464_v54  ;;  %vm1515_vm9 = vc.u32 %v1513_v15, %v1509_v59  ;;  %v1532_v13 = vmul.u32 52429, %v1529_v9  ;;  %v1248_v51 = vpop.f32.mrf.mxu0 }
 0x117   : > { %1274 = vst [vmem:[%s2599_s18 + $0x8] sm:$0xff] %v1264_v2  ;;  %v1665_v55 = vmul.f32 %v2054_v10, %v1264_v2  ;;  %v1490_v61 = vadd.s32 %v1489_v56, %v1479_v32  ;;  %v1514_v10 = vadd.s32 %v1512_v16, %v1506_v45  ;;  %v1516_v12 = vsel %vm1515_vm9, 1, %v2155_v57 }
 0x118   : > { %v1007_v49 = vpop.f32.mrf.mxu2  ;;  %v1510_v56 = vshrl.u32 %v2656_v58, 16  ;;  %vm1589_vm12 = vcmp.ne.s32.totalorder %v2685_v22, 0  ;;  %vm1599_vm13 = vcmp.lt.s32.totalorder %v2685_v22, 0  ;;  %v1619_v16 = vadd.s32 10, %v2685_v22 }
 0x119   : > { %v1674_v44 = vadd.f32 %v1665_v55, %v1664_v21  ;;  %v1690_v7 = vmul.f32 %v1665_v55, %v1264_v2  ;;  %v1029_v26 = vadd.f32 %v1007_v49, %v915_v29  ;;  %v1491_v30 = vadd.s32 %v1490_v61, %v1481_v17  ;;  %vm2718_vm15 = vmand %vm1599_vm13, %vm1589_vm12 }
 0x11a   : > { %v1518_v38 = vadd.s32 %v1516_v12, %v1514_v10  ;;  %v1538_v49 = vshll.u32 %v2695_v42, 16  ;;  %v1539_v12 = vshrl.u32 %v2695_v42, 16 }
 0x11b   : > { %v1699_v23 = vadd.f32 %v1690_v7, %v1689_v6  ;;  %v1143_v50 = vadd.f32 %v2601_v3, %v1029_v26  ;;  %v1618_v3 = vadd.s32 10, %v2661_v4  ;;  %v1492_v55 = vshrl.u32 %v1491_v30, 3  ;;  %v900_v32 = vpop.f32.mrf.mxu1 }
 0x11c   : > { %v1519_v6 = vadd.s32 %v1518_v38, %v1508_v5 }
 0x11d   : > { %v1265_v47 = vadd.f32 %v2617_v24, %v1143_v50  ;;  %v1533_v24 = vmul.u32 52428, %v1529_v9  ;;  %v1126_v36 = vpop.f32.mrf.mxu3  ;;  %v1628_v46 = vsel %vm2690_vm10, %v1618_v3, %v2661_v4  ;;  %v1493_v58 = vmul.u32 10, %v1492_v55 }
 0x11e   : > { %vm2714_vm14 = vcmp.lt.s32.totalorder %v1628_v46, 8  ;;  %v1629_v9 = vsel %vm2718_vm15, %v1619_v16, %v2685_v22 }
 0x11f   : > { %1275 = vst [vmem:[%s2599_s18 + $0x10] sm:$0xff] %v1265_v47  ;;  %v1666_v25 = vmul.f32 %v2055_v19, %v1265_v47  ;;  %v1536_v2 = vshll.u32 %v1533_v24, 16  ;;  %v2712_v19 = vadd.s32 72, %v2447_v37  ;;  %v1494_v3 = vsub.s32 %v2576_v41, %v1493_v58 }
 0x120   : > { %v1009_v34 = vpop.f32.mrf.mxu2  ;;  %v2057_v43 = vsel %vm2714_vm14, 1.0, %v2156_v31  ;;  %vm2734_vm1 = vcmp.lt.s32.totalorder %v1629_v9, 8 }
 0x121   : > { %v1675_v21 = vadd.f32 %v1674_v44, %v1666_v25  ;;  %v1691_v33 = vmul.f32 %v1666_v25, %v1265_v47  ;;  %v1030_v29 = vadd.f32 %v1009_v34, %v916_v27  ;;  %vm1540_vm11 = vc.u32 %v1532_v13, %v1536_v2  ;;  %v1250_v25 = vpop.f32.mrf.mxu0 }
 0x122   : > { %v1541_v44 = vsel %vm1540_vm11, 1, %v2155_v57  ;;  %v1542_v7 = vadd.s32 %v1536_v2, %v1532_v13  ;;  %v1558_v14 = vand.u32 65535, %v2712_v19  ;;  %v1559_v15 = vshrl.u32 %v2712_v19, 16 }
 0x123   : > { %v1700_v11 = vadd.f32 %v1699_v23, %v1691_v33  ;;  %v1144_v60 = vadd.f32 %v1123_v40, %v1030_v29  ;;  %v917_v40 = vadd.f32 %v898_v20, %v2463_v62  ;;  %v1543_v26 = vadd.s32 %v1541_v44, %v1535_v53  ;;  %v903_v13 = vpop.f32.mrf.mxu1 }
 0x124   : > { %v1520_v62 = vadd.s32 %v1519_v6, %v1510_v56  ;;  %v1537_v20 = vshrl.u32 %v1533_v24, 16  ;;  %vm1544_vm0 = vc.u32 %v1542_v7, %v1538_v49  ;;  %v1561_v18 = vmul.u32 52429, %v1558_v14 }
 0x125   : > { %v1266_v45 = vadd.f32 %v1245_v0, %v1144_v60  ;;  %v1545_v61 = vsel %vm1544_vm0, 1, %v2155_v57  ;;  %v1128_v27 = vpop.f32.mrf.mxu3  ;;  %v1562_v5 = vmul.u32 52428, %v1558_v14  ;;  %v1563_v38 = vmul.u32 52429, %v1559_v15 }
 0x126   : > { %v1547_v37 = vadd.s32 %v1545_v61, %v1543_v26  ;;  %v1521_v30 = vshrl.u32 %v1520_v62, 3  ;;  %vm1590_vm2 = vcmp.ne.s32.totalorder %v1494_v3, 0  ;;  %vm1600_vm3 = vcmp.lt.s32.totalorder %v1494_v3, 0 }
 0x127   : > { %1276 = vst [vmem:[%s2599_s18 + $0x18] sm:$0xff] %v1266_v45  ;;  %v1667_v4 = vmul.f32 %v2056_v48, %v1266_v45  ;;  %v1565_v33 = vshll.u32 %v1562_v5, 16  ;;  %v1567_v48 = vshll.u32 %v1563_v38, 16  ;;  %v2058_v56 = vsel %vm2734_vm1, 1.0, %v2156_v31  ;;  %vm2744_vm5 = vmand %vm1600_vm3, %vm1590_vm2 }
 0x128   : > { %v1012_v54 = vpop.f32.mrf.mxu2  ;;  %v1548_v24 = vadd.s32 %v1547_v37, %v1537_v20  ;;  %v1522_v42 = vmul.u32 10, %v1521_v30  ;;  %v1566_v7 = vshrl.u32 %v1562_v5, 16  ;;  %v919_v59 = vadd.f32 %v903_v13, %v2496_v39 }
 0x129   : > { %v1676_v23 = vadd.f32 %v1675_v21, %v1667_v4  ;;  %v1692_v50 = vmul.f32 %v1667_v4, %v1266_v45  ;;  %v1031_v17 = vadd.f32 %v1012_v54, %v917_v40  ;;  %v1564_v21 = vmul.u32 52428, %v1559_v15  ;;  %v1253_v16 = vpop.f32.mrf.mxu0 }
 0x12a   : > { %v1549_v2 = vadd.s32 %v1548_v24, %v1539_v12  ;;  %vm1569_vm4 = vc.u32 %v1561_v18, %v1565_v33  ;;  %v1571_v46 = vadd.s32 %v1565_v33, %v1561_v18  ;;  %v1523_v44 = vsub.s32 %v2627_v28, %v1522_v42 }
 0x12b   : > { %v1701_v10 = vadd.f32 %v1700_v11, %v1692_v50  ;;  %v1145_v47 = vadd.f32 %v1126_v36, %v1031_v17  ;;  %v918_v36 = vadd.f32 %v900_v32, %v2481_v8  ;;  %v1620_v8 = vadd.s32 10, %v1494_v3  ;;  %v905_v20 = vpop.f32.mrf.mxu1 }
 0x12c   : > { %v1570_v60 = vsel %vm1569_vm4, 1, %v2155_v57  ;;  %v1550_v40 = vshrl.u32 %v1549_v2, 3  ;;  %vm1573_vm6 = vc.u32 %v1571_v46, %v1567_v48  ;;  %v1568_v54 = vshrl.u32 %v1563_v38, 16 }
 0x12d   : > { %v1267_v34 = vadd.f32 %v1248_v51, %v1145_v47  ;;  %v1572_v49 = vadd.s32 %v1570_v60, %v1564_v21  ;;  %v1131_v45 = vpop.f32.mrf.mxu3  ;;  %v1574_v4 = vsel %vm1573_vm6, 1, %v2155_v57  ;;  %v1630_v58 = vsel %vm2744_vm5, %v1620_v8, %v1494_v3 }
 0x12e   : > { %vm1591_vm7 = vcmp.ne.s32.totalorder %v1523_v44, 0  ;;  %vm1601_vm8 = vcmp.lt.s32.totalorder %v1523_v44, 0  ;;  %v1551_v28 = vmul.u32 10, %v1550_v40  ;;  %vm1640_vm9 = vcmp.lt.s32.totalorder %v1630_v58, 8 }
 0x12f   : > { %1277 = vst [vmem:[%s2599_s18 + $0x20] sm:$0xff] %v1267_v34  ;;  %v1668_v41 = vmul.f32 %v2057_v43, %v1267_v34  ;;  %v1576_v0 = vadd.s32 %v1574_v4, %v1572_v49  ;;  %vm2754_vm10 = vmand %vm1601_vm8, %vm1591_vm7  ;;  %v2059_v39 = vsel %vm1640_vm9, 1.0, %v2156_v31  ;;  %v920_v30 = vadd.f32 %v905_v20, %v2525_v52 }
 0x130   : > { %v1014_v29 = vpop.f32.mrf.mxu2  ;;  %v1552_v47 = vsub.s32 %v2665_v1, %v1551_v28  ;;  %vm1714_vm4 = vcmask 1040384  }
 0x131   : > { %v1677_v51 = vadd.f32 %v1676_v23, %v1668_v41  ;;  %v1693_v53 = vmul.f32 %v1668_v41, %v1267_v34  ;;  %v1032_v11 = vadd.f32 %v1014_v29, %v918_v36  ;;  %v1577_v50 = vadd.s32 %v1576_v0, %v1566_v7  ;;  %v1255_v24 = vpop.f32.mrf.mxu0 }
 0x132   : > { %vm1592_vm11 = vcmp.ne.s32.totalorder %v1552_v47, 0  ;;  %vm1602_vm12 = vcmp.lt.s32.totalorder %v1552_v47, 0  ;;  %v1622_v13 = vadd.s32 10, %v1552_v47 }
 0x133   : > { %v1702_v55 = vadd.f32 %v1701_v10, %v1693_v53  ;;  %v1146_v32 = vadd.f32 %v1128_v27, %v1032_v11  ;;  %v1621_v27 = vadd.s32 10, %v1523_v44  ;;  %v1578_v37 = vadd.s32 %v1577_v50, %v1568_v54  ;;  %v908_v1 = vpop.f32.mrf.mxu1  ;;  %vm1612_vm14 = vmand %vm1602_vm12, %vm1592_vm11 }
 0x134   : > { %v1632_v29 = vsel %vm1612_vm14, %v1622_v13, %v1552_v47  ;;  %v921_v42 = vadd.f32 %v908_v1, %v2533_v63 }
 0x135   : > { %v1268_v26 = vadd.f32 %v1250_v25, %v1146_v32  ;;  %v1579_v9 = vshrl.u32 %v1578_v37, 3  ;;  %v1133_v43 = vpop.f32.mrf.mxu3  ;;  %v1631_v25 = vsel %vm2754_vm10, %v1621_v27, %v1523_v44  ;;  %vm1642_vm1 = vcmp.lt.s32.totalorder %v1632_v29, 8 }
 0x136   : > { %vm1641_vm13 = vcmp.lt.s32.totalorder %v1631_v25, 8 }
 0x137   : > { %1278 = vst [vmem:[%s2599_s18 + $0x28] sm:$0xff] %v1268_v26  ;;  %v1669_v62 = vmul.f32 %v2058_v56, %v1268_v26  ;;  %v1580_v18 = vmul.u32 10, %v1579_v9  ;;  %v2060_v21 = vsel %vm1641_vm13, 1.0, %v2156_v31  ;;  %v2061_v56 = vsel %vm1642_vm1, 1.0, %v2156_v31 }
 0x138   : > { %v1017_v23 = vpop.f32.mrf.mxu2 }
 0x139   : > { %v1678_v17 = vadd.f32 %v1677_v51, %v1669_v62  ;;  %v1694_v61 = vmul.f32 %v1669_v62, %v1268_v26  ;;  %v1033_v57 = vadd.f32 %v1017_v23, %v919_v59  ;;  %v1581_v52 = vsub.s32 %v2712_v19, %v1580_v18  ;;  %v1258_v60 = vpop.f32.mrf.mxu0 }
 0x13b   : > { %v1703_v14 = vadd.f32 %v1702_v55, %v1694_v61  ;;  %v1147_v15 = vadd.f32 %v1131_v45, %v1033_v57  ;;  %vm1593_vm15 = vcmp.ne.s32.totalorder %v1581_v52, 0  ;;  %vm1603_vm0 = vcmp.lt.s32.totalorder %v1581_v52, 0  ;;  %v910_v19 = vpop.f32.mrf.mxu1 }
 0x13c   : > { %v1623_v46 = vadd.s32 10, %v1581_v52  ;;  %vm1613_vm2 = vmand %vm1603_vm0, %vm1593_vm15  ;;  %v922_v49 = vadd.f32 %v910_v19, %v2569_v35 }
 0x13d   : > { %v1269_v3 = vadd.f32 %v1253_v16, %v1147_v15  ;;  %v1136_v48 = vpop.f32.mrf.mxu3 }
 0x13e   : > { %v1633_v6 = vsel %vm1613_vm2, %v1623_v46, %v1581_v52 }
 0x13f   : > { %1279 = vst [vmem:[%s2599_s18 + $0x30] sm:$0xff] %v1269_v3  ;;  %v1670_v12 = vmul.f32 %v2059_v39, %v1269_v3  ;;  %vm1643_vm3 = vcmp.lt.s32.totalorder %v1633_v6, 8 }
 0x140   : > { %v1019_v34 = vpop.f32.mrf.mxu2  ;;  %v2062_v0 = vsel %vm1643_vm3, 1.0, %v2156_v31 }
 0x141   : > { %v1679_v5 = vadd.f32 %v1678_v17, %v1670_v12  ;;  %v1695_v38 = vmul.f32 %v1670_v12, %v1269_v3  ;;  %v1034_v36 = vadd.f32 %v1019_v34, %v920_v30  ;;  %v1260_v54 = vpop.f32.mrf.mxu0 }
 0x143   : > { %v1704_v22 = vadd.f32 %v1703_v14, %v1695_v38  ;;  %v1148_v41 = vadd.f32 %v1133_v43, %v1034_v36 }
 0x145   : > { %v1270_v33 = vadd.f32 %v1255_v24, %v1148_v41  ;;  %v1138_v4 = vpop.f32.mrf.mxu3 }
 0x147   : > { %1280 = vst [vmem:[%s2599_s18 + $0x38] sm:$0xff] %v1270_v33  ;;  %v1671_v2 = vmul.f32 %v2060_v21, %v1270_v33 }
 0x148   : > { %v1022_v51 = vpop.f32.mrf.mxu2 }
 0x149   : > { %v1680_v53 = vadd.f32 %v1679_v5, %v1671_v2  ;;  %v1696_v11 = vmul.f32 %v1671_v2, %v1270_v33  ;;  %v1035_v8 = vadd.f32 %v1022_v51, %v921_v42 }
 0x14b   : > { %v1705_v55 = vadd.f32 %v1704_v22, %v1696_v11  ;;  %v1149_v32 = vadd.f32 %v1136_v48, %v1035_v8 }
 0x14d   : > { %v1271_v63 = vadd.f32 %v1258_v60, %v1149_v32 }
 0x14f   : > { %1281 = vst [vmem:[%s2599_s18 + $0x40] sm:$0xff] %v1271_v63  ;;  %v1672_v45 = vmul.f32 %v2061_v56, %v1271_v63 }
 0x150   : > { %v1024_v44 = vpop.f32.mrf.mxu2 }
 0x151   : > { %v1681_v40 = vadd.f32 %v1680_v53, %v1672_v45  ;;  %v1697_v7 = vmul.f32 %v1672_v45, %v1271_v63  ;;  %v1036_v26 = vadd.f32 %v1024_v44, %v922_v49 }
 0x153   : > { %v1706_v16 = vadd.f32 %v1705_v55, %v1697_v7  ;;  %v1150_v58 = vadd.f32 %v1138_v4, %v1036_v26 }
 0x155   : > { %v1272_v59 = vadd.f32 %v1260_v54, %v1150_v58 }
 0x157   : > { %1282 = vst [vmem:[%s2599_s18 + $0x48] sm:$0xff] %v1272_v59  ;;  %v1673_v62 = vmul.f32 %v2062_v0, %v1272_v59 }
 0x159   : > { %v1682_v20 = vadd.f32 %v1681_v40, %v1673_v62  ;;  %v1698_v23 = vmul.f32 %v1673_v62, %v1272_v59 }
 0x15b   : > { %v1683_v35 = vrot.slane %v1682_v20, 4  ;;  %v1707_v28 = vadd.f32 %v1706_v16, %v1698_v23 }
 0x15d   : > { %v1684_v50 = vadd.f32 %v1683_v35, %v1682_v20  ;;  %v1708_v17 = vrot.slane %v1707_v28, 4 }
 0x15f   : > { %v1685_v61 = vrot.slane %v1684_v50, 2  ;;  %v1709_v57 = vadd.f32 %v1708_v17, %v1707_v28 }
 0x161   : > { %v1686_v27 = vadd.f32 %v1685_v61, %v1684_v50  ;;  %v1710_v37 = vrot.slane %v1709_v57, 2 }
 0x163   : > { %v1687_v14 = vrot.slane %v1686_v27, 1  ;;  %v1711_v15 = vadd.f32 %v1710_v37, %v1709_v57 }
 0x165   : > { %v1712_v10 = vrot.slane %v1711_v15, 1  ;;  %v1688_v31 = vadd.f32 %v1687_v14, %v1686_v27 }
 0x167   : > { %v1713_v39 = vadd.f32 %v1712_v10, %v1711_v15 }
 0x169   : > { %v1715_v47 = vsel %vm1714_vm4, %v1688_v31, %v1713_v39 }
 0x16a   : > { %1716 = vst [vmem:[%s226_s22] sm:$0x3] %v1715_v47 }
 0x16b PF: > { %s14_s14 = sadd.s32 1, %s2153_s14   ;;  %s2816_s12 = smov %s2149_s13 }
 0x16c   : > { %p11_p5 = scmp.ge.s32.totalorder %s14_s14, 4   ;;  %s2817_s13 = smov %s2819_s15 }
 0x16e   :  { %13 = sbr.rel (!%p11_p5) target bundleno = 2 (0x2), region = 81 }

// kernel: _basic_block_forward.8
= control target key start
LH: loop header
LB: loop body
LE: loop exit
PB: predicated region body
PF: predicated region fallthrough
CT: control target
= control target key end

     0   :  { %s1024_s12 = smov 0   ;;  %s1026_s13 = smov 0   ;;  %s1396_s0 = inlined_call_operand.vmem [shape: bf16[2,80,4], index: 0, kind: input, shape index: {}]   ;;  %s1397_s1 = inlined_call_operand.vmem [shape: bf16[1,4,128], index: 1, kind: input, shape index: {}]   ;;  %s1398_s2 = inlined_call_operand.vmem [shape: f32[2,80,128], index: 2, kind: output, shape index: {0}]   ;;  %s1399_s3 = inlined_call_operand.vmem [shape: f32[2,2,128], index: 3, kind: output, shape index: {1}]  }
   0x1   :  { %s1028_s14 = smov 0  }
   0x2 LB: > { %s26_s15 = sadd.s32 1, %s996_s13  ;;  %p901_p0 = scmp.ge.s32.totalorder %s1000_s14, 1  ;;  %s1000_s14 = sphi %s1028_s14, %s14_s14   ;;  %s996_s13 = sphi %s1026_s13, %s1427_s13   ;;  %s992_s12 = sphi %s1024_s12, %s1426_s12  }
   0x3   : > { %p28_p1 = scmp.ge.s32.totalorder %s26_s15, 2  ;;  %p165_p2 = scmp.lt.s32.totalorder %s1000_s14, 3 }
   0x5   : > { %s1429_s15 = smov (%p28_p1, %s26_s15), 0  ;;  %p166_p3 = pnand %p901_p0, %p165_p2 }
   0x6   : > { %p203_p4 = scmp.lt.s32.totalorder (!%p166_p3), %s992_s12, 1 }
   0x7   : > { %169 = sbr.rel (%p166_p3) target bundleno = 197 (0xc5), region = 28 }
   0xc   : > { %v238_v0 = vld [vmem:[%s1397_s1] sm:$0x3]  ;;  %vm280_vm0 = vcmask 1041408   ;;  %s1431_s12 = smov (!%p203_p4, %s992_s12), 1  ;;  %vm264_vm1 = vcmask 31744   ;;  %v328_v7 = vlaneseq  ;;  %v1002_v29 = vmov 0  }
   0xd   : > { %v282_v1 = vsel %vm280_vm0, %v238_v0, 0  ;;  %s950_s18 = smul.u32 40, %s1431_s12  ;;  %s904_s26 = sshll.u32 %s1431_s12, 1 }
   0xe   : > { %291 = vmatpush.bf16.msra.mxu0 %v282_v1  ;;  %948 = vmatpush.bf16.msra.mxu2 %v282_v1  ;;  %v1051_v8 = vshrl.u32 %v328_v7, 7  ;;  %s951_s22 = smul.u32 80, %s1431_s12  ;;  %s226_s29 = scalar_lea.vmem %s1399_s3, %s904_s26 }
   0xf   : > { %947 = vmatpush.bf16.msra.mxu1 %v282_v1  ;;  %949 = vmatpush.bf16.msra.mxu3 %v282_v1  ;;  %s207_s21 = scalar_lea.vmem %s1396_s0, %s950_s18 }
  0x10   : > { %v942_v2 = vld [vmem:[%s207_s21] sm:$0xff]  ;;  %v944_v3 = vld [vmem:[%s207_s21 + $0x10] sm:$0xff]  ;;  %v943_v4 = vld [vmem:[%s207_s21 + $0x8] sm:$0xff]  ;;  %v342_v9 = vand.u32 65535, %v1051_v8  ;;  %v1055_v10 = vadd.s32 16, %v1051_v8  ;;  %v1058_v11 = vadd.s32 32, %v1051_v8  ;;  %s1157_s25 = scalar_lea.vmem %s1398_s2, %s951_s22 }
  0x11   : > { %v946_v5 = vld [vmem:[%s207_s21 + $0x20] sm:$0xff]  ;;  %925 = vmatmul.msk.bf16.vlgmr.msra.gmra.mxu0 %vm264_vm1, %v942_v2  ;;  %927 = vmatmul.msk.bf16.vlgmr.msra.gmra.mxu2 %vm264_vm1, %v944_v3  ;;  %v945_v6 = vld [vmem:[%s207_s21 + $0x18] sm:$0xff]  ;;  %v1061_v12 = vadd.s32 8, %v1051_v8  ;;  %v343_v13 = vshrl.u32 %v1051_v8, 16  ;;  %v1089_v52 = vadd.s32 24, %v1051_v8 }
  0x12   : > { %926 = vmatmul.msk.bf16.vlgmr.msra.gmra.mxu1 %vm264_vm1, %v943_v4  ;;  %929 = vmatmul.msk.bf16.vlgmr.msra.gmra.mxu3 %vm264_vm1, %v946_v5  ;;  %v346_v14 = vmul.u32 52428, %v342_v9  ;;  %v400_v15 = vand.u32 65535, %v1055_v10  ;;  %v345_v16 = vmul.u32 52429, %v342_v9  ;;  %v401_v19 = vshrl.u32 %v1055_v10, 16 }
  0x13   : > { %v1065_v17 = vmul.u32 52429, %v343_v13  ;;  %v458_v21 = vand.u32 65535, %v1058_v11  ;;  %v371_v22 = vand.u32 65535, %v1061_v12  ;;  %v348_v25 = vmul.u32 52428, %v343_v13 }
  0x14   : > { %v349_v18 = vshll.u32 %v346_v14, 16  ;;  %v1068_v20 = vmul.u32 52428, %v400_v15  ;;  %v403_v26 = vmul.u32 52429, %v400_v15  ;;  %v1073_v27 = vmul.u32 52429, %v401_v19 }
  0x15   : > { %v351_v23 = vshll.u32 %v1065_v17, 16  ;;  %v459_v31 = vshrl.u32 %v1058_v11, 16  ;;  %v1078_v32 = vmul.u32 52428, %v458_v21  ;;  %v372_v33 = vshrl.u32 %v1061_v12, 16 }
  0x16   : > { %vm353_vm2 = vc.u32 %v345_v16, %v349_v18  ;;  %v355_v24 = vadd.s32 %v349_v18, %v345_v16  ;;  %v407_v28 = vshll.u32 %v1068_v20, 16  ;;  %v409_v35 = vshll.u32 %v1073_v27, 16 }
  0x17   : > { %v354_v30 = vsel %vm353_vm2, 1, %v1002_v29  ;;  %v375_v37 = vmul.u32 52428, %v371_v22  ;;  %v406_v39 = vmul.u32 52428, %v401_v19  ;;  %v1083_v40 = vmul.u32 52429, %v459_v31 }
  0x18   : > { %vm357_vm3 = vc.u32 %v355_v24, %v351_v23  ;;  %vm411_vm4 = vc.u32 %v403_v26, %v407_v28  ;;  %v356_v34 = vadd.s32 %v354_v30, %v348_v25  ;;  %v413_v36 = vadd.s32 %v407_v28, %v403_v26 }
  0x19   : > { %v358_v38 = vsel %vm357_vm3, 1, %v1002_v29  ;;  %v412_v41 = vsel %vm411_vm4, 1, %v1002_v29  ;;  %v461_v42 = vmul.u32 52429, %v458_v21  ;;  %v465_v43 = vshll.u32 %v1078_v32, 16 }
  0x1a   : > { %v374_v44 = vmul.u32 52429, %v371_v22  ;;  %v350_v45 = vshrl.u32 %v346_v14, 16  ;;  %v360_v46 = vadd.s32 %v358_v38, %v356_v34  ;;  %vm415_vm5 = vc.u32 %v413_v36, %v409_v35 }
  0x1b   : > { %v376_v47 = vmul.u32 52429, %v372_v33  ;;  %v378_v48 = vshll.u32 %v375_v37, 16  ;;  %v414_v49 = vadd.s32 %v412_v41, %v406_v39  ;;  %v467_v50 = vshll.u32 %v1083_v40, 16 }
  0x1c   : > { %v377_v51 = vmul.u32 52428, %v372_v33  ;;  %vm469_vm6 = vc.u32 %v461_v42, %v465_v43  ;;  %v471_v53 = vadd.s32 %v465_v43, %v461_v42  ;;  %v416_v55 = vsel %vm415_vm5, 1, %v1002_v29 }
  0x1d   : > { %v380_v54 = vshll.u32 %v376_v47, 16  ;;  %vm382_vm7 = vc.u32 %v374_v44, %v378_v48  ;;  %v464_v56 = vmul.u32 52428, %v459_v31  ;;  %v384_v58 = vadd.s32 %v378_v48, %v374_v44 }
  0x1e   : > { %v383_v57 = vsel %vm382_vm7, 1, %v1002_v29  ;;  %v352_v59 = vshrl.u32 %v1065_v17, 16  ;;  %v361_v60 = vadd.s32 %v360_v46, %v350_v45  ;;  %v408_v61 = vshrl.u32 %v1068_v20, 16 }
  0x1f   : > { %v429_v62 = vand.u32 65535, %v1089_v52  ;;  %v470_v63 = vsel %vm469_vm6, 1, %v1002_v29  ;;  %v385_v0 = vadd.s32 %v383_v57, %v377_v51  ;;  %vm386_vm8 = vc.u32 %v384_v58, %v380_v54 }
  0x20   : > { %v430_v1 = vshrl.u32 %v1089_v52, 16  ;;  %v418_v2 = vadd.s32 %v416_v55, %v414_v49  ;;  %vm473_vm9 = vc.u32 %v471_v53, %v467_v50  ;;  %v387_v3 = vsel %vm386_vm8, 1, %v1002_v29 }
  0x21   : > { %928 = vmatmul.msk.bf16.gmra.mxu2 %vm264_vm1, %v945_v6  ;;  %v433_v4 = vmul.u32 52428, %v429_v62  ;;  %v472_v5 = vadd.s32 %v470_v63, %v464_v56  ;;  %v432_v6 = vmul.u32 52429, %v429_v62  ;;  %v474_v9 = vsel %vm473_vm9, 1, %v1002_v29 }
  0x22   : > { %v434_v7 = vmul.u32 52429, %v430_v1  ;;  %v379_v13 = vshrl.u32 %v375_v37, 16  ;;  %v389_v14 = vadd.s32 %v387_v3, %v385_v0  ;;  %v362_v16 = vadd.s32 %v361_v60, %v352_v59 }
  0x23   : > { %v436_v15 = vshll.u32 %v433_v4, 16  ;;  %v410_v17 = vshrl.u32 %v1073_v27, 16  ;;  %v419_v18 = vadd.s32 %v418_v2, %v408_v61  ;;  %v435_v19 = vmul.u32 52428, %v430_v1 }
  0x24   : > { %v438_v20 = vshll.u32 %v434_v7, 16  ;;  %v466_v21 = vshrl.u32 %v1078_v32, 16  ;;  %v476_v22 = vadd.s32 %v474_v9, %v472_v5  ;;  %v381_v24 = vshrl.u32 %v376_v47, 16 }
  0x25   : > { %vm440_vm10 = vc.u32 %v432_v6, %v436_v15  ;;  %v442_v23 = vadd.s32 %v436_v15, %v432_v6  ;;  %v390_v25 = vadd.s32 %v389_v14, %v379_v13  ;;  %v363_v26 = vshrl.u32 %v362_v16, 3 }
  0x26   : > { %v420_v28 = vadd.s32 %v419_v18, %v410_v17  ;;  %v441_v30 = vsel %vm440_vm10, 1, %v1002_v29  ;;  %v437_v31 = vshrl.u32 %v433_v4, 16  ;;  %v1105_v27 = vadd.s32 40, %v1051_v8 }
  0x27   : > { %vm444_vm11 = vc.u32 %v442_v23, %v438_v20  ;;  %v443_v33 = vadd.s32 %v441_v30, %v435_v19  ;;  %v468_v35 = vshrl.u32 %v1083_v40, 16  ;;  %v477_v32 = vadd.s32 %v476_v22, %v466_v21 }
  0x28   : > { %v445_v34 = vsel %vm444_vm11, 1, %v1002_v29  ;;  %v1109_v36 = vadd.s32 64, %v1051_v8  ;;  %v391_v37 = vadd.s32 %v390_v25, %v381_v24  ;;  %v487_v39 = vand.u32 65535, %v1105_v27 }
  0x29   : > { %v447_v38 = vadd.s32 %v445_v34, %v443_v33  ;;  %v488_v41 = vshrl.u32 %v1105_v27, 16  ;;  %v364_v42 = vmul.u32 10, %v363_v26  ;;  %v421_v43 = vshrl.u32 %v420_v28, 3 }
  0x2a   : > { %v439_v44 = vshrl.u32 %v434_v7, 16  ;;  %v574_v45 = vand.u32 65535, %v1109_v36  ;;  %v490_v47 = vmul.u32 52429, %v487_v39  ;;  %v491_v48 = vmul.u32 52428, %v487_v39 }
  0x2b   : > { %v448_v46 = vadd.s32 %v447_v38, %v437_v31  ;;  %v1114_v49 = vmul.u32 52429, %v488_v41  ;;  %v575_v40 = vshrl.u32 %v1109_v36, 16  ;;  %v478_v51 = vadd.s32 %v477_v32, %v468_v35 }
  0x2c   : > { %v1117_v50 = vmul.u32 52428, %v574_v45  ;;  %v392_v53 = vshrl.u32 %v391_v37, 3  ;;  %v494_v54 = vshll.u32 %v491_v48, 16  ;;  %v1121_v56 = vsub.s32 %v1051_v8, %v364_v42 }
  0x2d   : > { %v496_v55 = vshll.u32 %v1114_v49, 16  ;;  %v422_v57 = vmul.u32 10, %v421_v43  ;;  %v1124_v58 = vadd.s32 48, %v1051_v8  ;;  %v449_v59 = vadd.s32 %v448_v46, %v439_v44 }
  0x2e   : > { %v493_v60 = vmul.u32 52428, %v488_v41  ;;  %vm498_vm12 = vc.u32 %v490_v47, %v494_v54  ;;  %v500_v61 = vadd.s32 %v494_v54, %v490_v47  ;;  %v577_v63 = vmul.u32 52429, %v574_v45 }
  0x2f   : > { %v499_v62 = vsel %vm498_vm12, 1, %v1002_v29  ;;  %v1127_v0 = vmul.u32 52429, %v575_v40  ;;  %v581_v1 = vshll.u32 %v1117_v50, 16  ;;  %v479_v2 = vshrl.u32 %v478_v51, 3 }
  0x30   : > { %v393_v3 = vmul.u32 10, %v392_v53  ;;  %vm502_vm13 = vc.u32 %v500_v61, %v496_v55  ;;  %vm629_vm14 = vcmp.ne.s32.totalorder %v1121_v56, 0  ;;  %v516_v4 = vand.u32 65535, %v1124_v58 }
  0x31   : > { %v1133_v5 = vsub.s32 %v1055_v10, %v422_v57  ;;  %v450_v6 = vshrl.u32 %v449_v59, 3  ;;  %v501_v7 = vadd.s32 %v499_v62, %v493_v60  ;;  %v503_v9 = vsel %vm502_vm13, 1, %v1002_v29 }
  0x32   : > { %v583_v13 = vshll.u32 %v1127_v0, 16  ;;  %vm585_vm15 = vc.u32 %v577_v63, %v581_v1  ;;  %v587_v14 = vadd.s32 %v581_v1, %v577_v63  ;;  %v517_v15 = vshrl.u32 %v1124_v58, 16 }
  0x33   : > { %vm639_vm0 = vcmp.lt.s32.totalorder %v1121_v56, 0  ;;  %v1140_v16 = vadd.s32 10, %v1121_v56  ;;  %v480_v17 = vmul.u32 10, %v479_v2  ;;  %v1143_v10 = vsub.s32 %v1061_v12, %v393_v3 }
  0x34   : > { %v580_v18 = vmul.u32 52428, %v575_v40  ;;  %v519_v19 = vmul.u32 52429, %v516_v4  ;;  %v520_v20 = vmul.u32 52428, %v516_v4  ;;  %v521_v21 = vmul.u32 52429, %v517_v15  ;;  %vm1170_vm6 = vmand %vm639_vm0, %vm629_vm14 }
  0x35   : > { %vm631_vm1 = vcmp.ne.s32.totalorder %v1133_v5, 0  ;;  %v495_v22 = vshrl.u32 %v491_v48, 16  ;;  %v505_v23 = vadd.s32 %v503_v9, %v501_v7  ;;  %v586_v24 = vsel %vm585_vm15, 1, %v1002_v29 }
  0x36   : > { %v451_v25 = vmul.u32 10, %v450_v6  ;;  %vm589_vm2 = vc.u32 %v587_v14, %v583_v13  ;;  %v522_v26 = vmul.u32 52428, %v517_v15  ;;  %v523_v28 = vshll.u32 %v520_v20, 16 }
  0x37   : > { %vm641_vm3 = vcmp.lt.s32.totalorder %v1133_v5, 0  ;;  %v661_v12 = vadd.s32 10, %v1133_v5  ;;  %vm630_vm4 = vcmp.ne.s32.totalorder %v1143_v10, 0  ;;  %v525_v30 = vshll.u32 %v521_v21, 16 }
  0x38   : > { %v588_v31 = vadd.s32 %v586_v24, %v580_v18  ;;  %vm527_vm5 = vc.u32 %v519_v19, %v523_v28  ;;  %v529_v33 = vadd.s32 %v523_v28, %v519_v19  ;;  %v1152_v34 = vadd.s32 72, %v1051_v8  ;;  %vm1189_vm9 = vmand %vm641_vm3, %vm631_vm1 }
  0x39   : > { %v497_v32 = vshrl.u32 %v1114_v49, 16  ;;  %v506_v37 = vadd.s32 %v505_v23, %v495_v22  ;;  %v590_v38 = vsel %vm589_vm2, 1, %v1002_v29  ;;  %v528_v39 = vsel %vm527_vm5, 1, %v1002_v29 }
  0x3a   : > { %v1177_v43 = vsub.s32 %v1089_v52, %v451_v25  ;;  %v524_v44 = vshrl.u32 %v520_v20, 16  ;;  %v530_v45 = vadd.s32 %v528_v39, %v522_v26  ;;  %vm531_vm7 = vc.u32 %v529_v33, %v525_v30 }
  0x3b   : > { %vm640_vm8 = vcmp.lt.s32.totalorder %v1143_v10, 0  ;;  %v582_v46 = vshrl.u32 %v1117_v50, 16  ;;  %v532_v47 = vsel %vm531_vm7, 1, %v1002_v29  ;;  %v603_v48 = vand.u32 65535, %v1152_v34 }
  0x3c   : > { %v592_v49 = vadd.s32 %v590_v38, %v588_v31  ;;  %v526_v40 = vshrl.u32 %v521_v21, 16  ;;  %v534_v51 = vadd.s32 %v532_v47, %v530_v45  ;;  %v604_v53 = vshrl.u32 %v1152_v34, 16  ;;  %vm1215_vm12 = vmand %vm640_vm8, %vm630_vm4 }
  0x3d   : > { %v669_v50 = vsel %vm1170_vm6, %v1140_v16, %v1121_v56  ;;  %v1199_v54 = vsub.s32 %v1058_v11, %v480_v17  ;;  %v660_v55 = vadd.s32 10, %v1143_v10  ;;  %v507_v57 = vadd.s32 %v506_v37, %v497_v32 }
  0x3e   : > { %vm632_vm10 = vcmp.ne.s32.totalorder %v1177_v43, 0  ;;  %vm642_vm11 = vcmp.lt.s32.totalorder %v1177_v43, 0  ;;  %v535_v59 = vadd.s32 %v534_v51, %v524_v44  ;;  %v1204_v60 = vmul.u32 52428, %v603_v48 }
  0x3f   : > { %v671_v61 = vsel %vm1189_vm9, %v661_v12, %v1133_v5  ;;  %v584_v56 = vshrl.u32 %v1127_v0, 16  ;;  %v1220_v63 = vmul.u32 52429, %v604_v53  ;;  %v662_v1 = vadd.s32 10, %v1177_v43  ;;  %vm1237_vm14 = vmand %vm642_vm11, %vm632_vm10 }
  0x40   : > { %v593_v3 = vadd.s32 %v592_v49, %v582_v46  ;;  %v536_v4 = vadd.s32 %v535_v59, %v526_v40  ;;  %v606_v5 = vmul.u32 52429, %v603_v48  ;;  %vm1227_vm13 = vcmp.lt.s32.totalorder %v669_v50, 8 }
  0x41   : > { %v508_v9 = vshrl.u32 %v507_v57, 3  ;;  %v610_v13 = vshll.u32 %v1204_v60, 16  ;;  %vm1244_vm15 = vcmp.lt.s32.totalorder %v671_v61, 8  ;;  %vm633_vm0 = vcmp.ne.s32.totalorder %v1199_v54, 0 }
  0x42   : > { %vm643_vm1 = vcmp.lt.s32.totalorder %v1199_v54, 0  ;;  %v670_v15 = vsel %vm1215_vm12, %v660_v55, %v1143_v10  ;;  %v537_v17 = vshrl.u32 %v536_v4, 3  ;;  %v609_v18 = vmul.u32 52428, %v604_v53 }
  0x43   : > { %v612_v19 = vshll.u32 %v1220_v63, 16  ;;  %v1261_v20 = vadd.s32 56, %v1051_v8  ;;  %v672_v21 = vsel %vm1237_vm14, %v662_v1, %v1177_v43  ;;  %v594_v22 = vadd.s32 %v593_v3, %v584_v56  ;;  %vm1278_vm4 = vmand %vm643_vm1, %vm633_vm0 }
  0x44   : > { %vm614_vm2 = vc.u32 %v606_v5, %v610_v13  ;;  %v616_v23 = vadd.s32 %v610_v13, %v606_v5  ;;  %v1003_v10 = vmov 0.0   ;;  %v509_v25 = vmul.u32 10, %v508_v9 }
  0x45   : > { %v930_v24 = vsel %vm1227_vm13, 1.0, %v1003_v10  ;;  %v615_v26 = vsel %vm614_vm2, 1, %v1002_v29  ;;  %v932_v8 = vsel %vm1244_vm15, 1.0, %v1003_v10  ;;  %v663_v28 = vadd.s32 10, %v1199_v54 }
  0x46   : > { %vm680_vm3 = vcmp.lt.s32.totalorder %v670_v15, 8  ;;  %v538_v12 = vmul.u32 10, %v537_v17  ;;  %vm1282_vm5 = vcmp.lt.s32.totalorder %v672_v21, 8  ;;  %v617_v32 = vadd.s32 %v615_v26, %v609_v18 }
  0x47   : > { %vm618_vm6 = vc.u32 %v616_v23, %v612_v19  ;;  %v545_v37 = vand.u32 65535, %v1261_v20  ;;  %v595_v39 = vshrl.u32 %v594_v22, 3  ;;  %v546_v43 = vshrl.u32 %v1261_v20, 16 }
  0x48   : > { %v931_v44 = vsel %vm680_vm3, 1.0, %v1003_v10  ;;  %v1297_v45 = vsub.s32 %v1105_v27, %v509_v25  ;;  %v611_v46 = vshrl.u32 %v1204_v60, 16  ;;  %v619_v47 = vsel %vm618_vm6, 1, %v1002_v29 }
  0x49   : > { %v673_v52 = vsel %vm1278_vm4, %v663_v28, %v1199_v54  ;;  %v933_v49 = vsel %vm1282_vm5, 1.0, %v1003_v10  ;;  %v539_v40 = vsub.s32 %v1124_v58, %v538_v12  ;;  %v613_v27 = vshrl.u32 %v1220_v63, 16 }
  0x4a   : > { %v621_v51 = vadd.s32 %v619_v47, %v617_v32  ;;  %v548_v53 = vmul.u32 52429, %v545_v37  ;;  %v549_v50 = vmul.u32 52428, %v545_v37  ;;  %v596_v59 = vmul.u32 10, %v595_v39 }
  0x4b   : > { %v550_v60 = vmul.u32 52429, %v546_v43  ;;  %vm634_vm7 = vcmp.ne.s32.totalorder %v1297_v45, 0  ;;  %v551_v61 = vmul.u32 52428, %v546_v43  ;;  %vm644_vm8 = vcmp.lt.s32.totalorder %v1297_v45, 0 }
  0x4c   : > { %v622_v54 = vadd.s32 %v621_v51, %v611_v46  ;;  %v552_v11 = vshll.u32 %v549_v50, 16  ;;  %v664_v58 = vadd.s32 10, %v1297_v45  ;;  %vm635_vm9 = vcmp.ne.s32.totalorder %v539_v40, 0  ;;  %vm1326_vm12 = vmand %vm644_vm8, %vm634_vm7 }
  0x4d   : > { %v554_v56 = vshll.u32 %v550_v60, 16  ;;  %vm645_vm10 = vcmp.lt.s32.totalorder %v539_v40, 0  ;;  %v597_v4 = vsub.s32 %v1109_v36, %v596_v59  ;;  %v665_v5 = vadd.s32 10, %v539_v40 }
  0x4e   : > { %vm556_vm11 = vc.u32 %v548_v53, %v552_v11  ;;  %v558_v1 = vadd.s32 %v552_v11, %v548_v53  ;;  %v553_v13 = vshrl.u32 %v549_v50, 16  ;;  %vm1330_vm14 = vcmp.lt.s32.totalorder %v673_v52, 8  ;;  %vm1336_vm15 = vmand %vm645_vm10, %vm635_vm9 }
  0x4f   : > { %v557_v6 = vsel %vm556_vm11, 1, %v1002_v29  ;;  %v555_v21 = vshrl.u32 %v550_v60, 16  ;;  %v674_v25 = vsel %vm1326_vm12, %v664_v58, %v1297_v45  ;;  %vm637_vm0 = vcmp.ne.s32.totalorder %v597_v4, 0 }
  0x50   : > { %v559_v14 = vadd.s32 %v557_v6, %v551_v61  ;;  %vm560_vm13 = vc.u32 %v558_v1, %v554_v56  ;;  %vm647_vm1 = vcmp.lt.s32.totalorder %v597_v4, 0  ;;  %v675_v26 = vsel %vm1336_vm15, %v665_v5, %v539_v40 }
  0x51   : > { %v561_v17 = vsel %vm560_vm13, 1, %v1002_v29  ;;  %v667_v12 = vadd.s32 10, %v597_v4  ;;  %vm684_vm4 = vcmp.lt.s32.totalorder %v674_v25, 8  ;;  %vm1354_vm5 = vmand %vm647_vm1, %vm637_vm0  ;;  %vm685_vm6 = vcmp.lt.s32.totalorder %v675_v26, 8 }
  0x52   : > { %v563_v22 = vadd.s32 %v561_v17, %v559_v14  ;;  %v936_v47 = vsel %vm685_vm6, 1.0, %v1003_v10 }
  0x53   : > { %v677_v46 = vsel %vm1354_vm5, %v667_v12, %v597_v4 }
  0x54   : > { %vm687_vm8 = vcmp.lt.s32.totalorder %v677_v46, 8 }
  0x55   : > { %v938_v59 = vsel %vm687_vm8, 1.0, %v1003_v10 }
  0x8e   : > { %v1159_v35 = vpop.f32.mrf.mxu0 }
  0x8f   : > { %318 = vst [vmem:[%s1157_s25] sm:$0xff] %v1159_v35  ;;  %v1174_v42 = vpop.f32.mrf.mxu1  ;;  %v709_v38 = vmul.f32 %v930_v24, %v1159_v35 }
  0x90   : > { %320 = vst [vmem:[%s1157_s25 + $0x10] sm:$0xff] %v1174_v42  ;;  %v711_v48 = vmul.f32 %v932_v8, %v1174_v42  ;;  %v564_v8 = vadd.s32 %v563_v22, %v553_v13 }
  0x91   : > { %v734_v55 = vmul.f32 %v709_v38, %v1159_v35  ;;  %v623_v35 = vadd.s32 %v622_v54, %v613_v27 }
  0x92   : > { %v736_v18 = vmul.f32 %v711_v48, %v1174_v42  ;;  %v934_v42 = vsel %vm1330_vm14, 1.0, %v1003_v10  ;;  %v565_v31 = vadd.s32 %v564_v8, %v555_v21  ;;  %vm759_vm14 = vcmask 1040384  }
  0x93   : > { %v624_v9 = vshrl.u32 %v623_v35, 3 }
  0x94   : > { %v1209_v62 = vpop.f32.mrf.mxu2  ;;  %v566_v43 = vshrl.u32 %v565_v31, 3 }
  0x95   : > { %322 = vst [vmem:[%s1157_s25 + $0x20] sm:$0xff] %v1209_v62  ;;  %v1225_v2 = vpop.f32.mrf.mxu3  ;;  %v625_v19 = vmul.u32 10, %v624_v9 }
  0x96   : > { %v1231_v7 = vpop.f32.mrf.mxu0  ;;  %326 = vst [vmem:[%s1157_s25 + $0x40] sm:$0xff] %v1225_v2  ;;  %v717_v56 = vmul.f32 %v938_v59, %v1225_v2 }
  0x97   : > { %319 = vst [vmem:[%s1157_s25 + $0x8] sm:$0xff] %v1231_v7  ;;  %v1255_v16 = vpop.f32.mrf.mxu1  ;;  %v710_v57 = vmul.f32 %v931_v44, %v1231_v7  ;;  %v626_v29 = vsub.s32 %v1152_v34, %v625_v19  ;;  %v713_v34 = vmul.f32 %v934_v42, %v1209_v62 }
  0x98   : > { %321 = vst [vmem:[%s1157_s25 + $0x18] sm:$0xff] %v1255_v16  ;;  %v712_v24 = vmul.f32 %v933_v49, %v1255_v16  ;;  %v742_v0 = vmul.f32 %v717_v56, %v1225_v2 }
  0x99   : > { %v735_v3 = vmul.f32 %v710_v57, %v1231_v7  ;;  %v719_v36 = vadd.f32 %v710_v57, %v709_v38  ;;  %vm638_vm2 = vcmp.ne.s32.totalorder %v626_v29, 0  ;;  %vm648_vm3 = vcmp.lt.s32.totalorder %v626_v29, 0 }
  0x9a   : > { %v737_v32 = vmul.f32 %v712_v24, %v1255_v16  ;;  %v668_v39 = vadd.s32 10, %v626_v29  ;;  %vm1360_vm7 = vmand %vm648_vm3, %vm638_vm2  ;;  %v935_v16 = vsel %vm684_vm4, 1.0, %v1003_v10  ;;  %v738_v49 = vmul.f32 %v713_v34, %v1209_v62 }
  0x9b   : > { %v744_v23 = vadd.f32 %v735_v3, %v734_v55  ;;  %v720_v28 = vadd.f32 %v719_v36, %v711_v48  ;;  %v567_v48 = vmul.u32 10, %v566_v43 }
  0x9c   : > { %v1286_v33 = vpop.f32.mrf.mxu2  ;;  %v678_v40 = vsel %vm1360_vm7, %v668_v39, %v626_v29 }
  0x9d   : > { %323 = vst [vmem:[%s1157_s25 + $0x28] sm:$0xff] %v1286_v33  ;;  %v1292_v41 = vpop.f32.mrf.mxu3  ;;  %v745_v37 = vadd.f32 %v744_v23, %v736_v18  ;;  %v721_v44 = vadd.f32 %v720_v28, %v712_v24  ;;  %v568_v27 = vsub.s32 %v1261_v20, %v567_v48  ;;  %v714_v53 = vmul.f32 %v935_v16, %v1286_v33 }
  0x9e   : > { %327 = vst [vmem:[%s1157_s25 + $0x48] sm:$0xff] %v1292_v41  ;;  %vm688_vm11 = vcmp.lt.s32.totalorder %v678_v40, 8 }
  0x9f   : > { %v746_v52 = vadd.f32 %v745_v37, %v737_v32  ;;  %v722_v51 = vadd.f32 %v721_v44, %v713_v34  ;;  %vm636_vm9 = vcmp.ne.s32.totalorder %v568_v27, 0  ;;  %vm646_vm10 = vcmp.lt.s32.totalorder %v568_v27, 0 }
  0xa0   : > { %v666_v55 = vadd.s32 10, %v568_v27  ;;  %vm656_vm12 = vmand %vm646_vm10, %vm636_vm9  ;;  %v739_v54 = vmul.f32 %v714_v53, %v1286_v33  ;;  %v939_v61 = vsel %vm688_vm11, 1.0, %v1003_v10 }
  0xa1   : > { %v747_v57 = vadd.f32 %v746_v52, %v738_v49  ;;  %v723_v60 = vadd.f32 %v722_v51, %v714_v53  ;;  %v718_v4 = vmul.f32 %v939_v61, %v1292_v41 }
  0xa2   : > { %v676_v62 = vsel %vm656_vm12, %v666_v55, %v568_v27 }
  0xa3   : > { %vm686_vm13 = vcmp.lt.s32.totalorder %v676_v62, 8  ;;  %v748_v58 = vadd.f32 %v747_v57, %v739_v54  ;;  %v743_v9 = vmul.f32 %v718_v4, %v1292_v41 }
  0xa4   : > { %v1317_v63 = vpop.f32.mrf.mxu2  ;;  %v937_v11 = vsel %vm686_vm13, 1.0, %v1003_v10 }
  0xa5   : > { %324 = vst [vmem:[%s1157_s25 + $0x30] sm:$0xff] %v1317_v63  ;;  %v715_v50 = vmul.f32 %v936_v47, %v1317_v63 }
  0xa7   : > { %v740_v20 = vmul.f32 %v715_v50, %v1317_v63  ;;  %v724_v35 = vadd.f32 %v723_v60, %v715_v50 }
  0xa9   : > { %v749_v3 = vadd.f32 %v748_v58, %v740_v20 }
  0xac   : > { %v310_v30 = vpop.f32.mrf.mxu2 }
  0xad   : > { %325 = vst [vmem:[%s1157_s25 + $0x38] sm:$0xff] %v310_v30  ;;  %v716_v1 = vmul.f32 %v937_v11, %v310_v30 }
  0xaf   : > { %v725_v5 = vadd.f32 %v724_v35, %v716_v1  ;;  %v741_v6 = vmul.f32 %v716_v1, %v310_v30 }
  0xb1   : > { %v726_v33 = vadd.f32 %v725_v5, %v717_v56  ;;  %v750_v63 = vadd.f32 %v749_v3, %v741_v6 }
  0xb3   : > { %v727_v13 = vadd.f32 %v726_v33, %v718_v4  ;;  %v751_v14 = vadd.f32 %v750_v63, %v742_v0 }
  0xb5   : > { %v728_v10 = vrot.slane %v727_v13, 4  ;;  %v752_v15 = vadd.f32 %v751_v14, %v743_v9 }
  0xb7   : > { %v729_v36 = vadd.f32 %v728_v10, %v727_v13  ;;  %v753_v7 = vrot.slane %v752_v15, 4 }
  0xb9   : > { %v730_v17 = vrot.slane %v729_v36, 2  ;;  %v754_v18 = vadd.f32 %v753_v7, %v752_v15 }
  0xbb   : > { %v731_v19 = vadd.f32 %v730_v17, %v729_v36  ;;  %v755_v21 = vrot.slane %v754_v18, 2 }
  0xbd   : > { %v732_v22 = vrot.slane %v731_v19, 1  ;;  %v756_v23 = vadd.f32 %v755_v21, %v754_v18 }
  0xbf   : > { %v757_v24 = vrot.slane %v756_v23, 1  ;;  %v733_v2 = vadd.f32 %v732_v22, %v731_v19 }
  0xc1   : > { %v758_v41 = vadd.f32 %v757_v24, %v756_v23 }
  0xc3   : > { %v760_v25 = vsel %vm759_vm14, %v733_v2, %v758_v41 }
  0xc4   : > { %761 = vst [vmem:[%s226_s29] sm:$0x3] %v760_v25 }
  0xc5 PF: > { %s14_s14 = sadd.s32 1, %s1000_s14   ;;  %s1426_s12 = smov %s996_s13 }
  0xc6   : > { %p11_p5 = scmp.ge.s32.totalorder %s14_s14, 4   ;;  %s1427_s13 = smov %s1429_s15 }
  0xc8   :  { %13 = sbr.rel (!%p11_p5) target bundleno = 2 (0x2), region = 73 }

// kernel: _basic_block_forward.9
= control target key start
LH: loop header
LB: loop body
LE: loop exit
PB: predicated region body
PF: predicated region fallthrough
CT: control target
= control target key end

     0   :  { %s542_s0 = inlined_call_operand.vmem [shape: f32[160,128], index: 0, kind: input, shape index: {}]   ;;  %s543_s1 = inlined_call_operand.vmem [shape: f32[160,128], index: 1, kind: input, shape index: {}]   ;;  %s544_s2 = inlined_call_operand.vmem [shape: f32[1,128], index: 2, kind: input, shape index: {}]   ;;  %s545_s3 = inlined_call_operand.vmem [shape: f32[1,128], index: 3, kind: input, shape index: {}]   ;;  %s546_s4 = inlined_call_operand.vmem [shape: f32[1,128], index: 4, kind: input, shape index: {}]   ;;  %s547_s5 = inlined_call_operand.vmem [shape: f32[1,128], index: 5, kind: input, shape index: {}]   ;;  %s548_s6 = inlined_call_operand.vmem [shape: f32[160,128], index: 6, kind: output, shape index: {}]  }
   0x1   :  { %v23_v0 = vld [vmem:[%s542_s0] sm:$0xff]  ;;  %v24_v7 = vld [vmem:[%s542_s0 + $0x8] sm:$0xff]  ;;  %v25_v13 = vld [vmem:[%s542_s0 + $0x10] sm:$0xff] }
   0x2   :  { %v268_v1 = vld [vmem:[%s544_s2] ss:$0 sm:$0xff]  ;;  %v92_v8 = vld [vmem:[%s543_s1 + $0x8] sm:$0xff]  ;;  %v93_v14 = vld [vmem:[%s543_s1 + $0x10] sm:$0xff] }
   0x3   :  { %v273_v2 = vld [vmem:[%s545_s3] ss:$0 sm:$0xff]  ;;  %v47_v4 = vmul.f32 %v268_v1, %v23_v0  ;;  %v48_v11 = vmul.f32 %v268_v1, %v24_v7  ;;  %v26_v15 = vld [vmem:[%s542_s0 + $0x18] sm:$0xff]  ;;  %v49_v16 = vmul.f32 %v268_v1, %v25_v13  ;;  %v28_v26 = vld [vmem:[%s542_s0 + $0x28] sm:$0xff] }
   0x4   :  { %v91_v3 = vld [vmem:[%s543_s1] sm:$0xff]  ;;  %v50_v18 = vmul.f32 %v268_v1, %v26_v15  ;;  %v94_v19 = vld [vmem:[%s543_s1 + $0x18] sm:$0xff]  ;;  %v96_v27 = vld [vmem:[%s543_s1 + $0x28] sm:$0xff]  ;;  %v52_v32 = vmul.f32 %v268_v1, %v28_v26 }
   0x5   :  { %v282_v5 = vld [vmem:[%s546_s4] ss:$0 sm:$0xff]  ;;  %v71_v9 = vadd.f32 %v273_v2, %v47_v4  ;;  %v72_v23 = vadd.f32 %v273_v2, %v48_v11  ;;  %v29_v28 = vld [vmem:[%s542_s0 + $0x30] sm:$0xff]  ;;  %v73_v29 = vadd.f32 %v273_v2, %v49_v16  ;;  %v30_v42 = vld [vmem:[%s542_s0 + $0x38] sm:$0xff] }
   0x6   :  { %v287_v6 = vld [vmem:[%s547_s5] ss:$0 sm:$0xff]  ;;  %v115_v10 = vmul.f32 %v282_v5, %v91_v3  ;;  %v116_v12 = vmul.f32 %v282_v5, %v92_v8  ;;  %v117_v17 = vmul.f32 %v282_v5, %v93_v14  ;;  %v118_v24 = vmul.f32 %v282_v5, %v94_v19  ;;  %v97_v33 = vld [vmem:[%s543_s1 + $0x30] sm:$0xff]  ;;  %v98_v43 = vld [vmem:[%s543_s1 + $0x38] sm:$0xff] }
   0x7   :  { %v27_v20 = vld [vmem:[%s542_s0 + $0x20] sm:$0xff]  ;;  %v74_v30 = vadd.f32 %v273_v2, %v50_v18  ;;  %v120_v37 = vmul.f32 %v282_v5, %v96_v27  ;;  %v76_v40 = vadd.f32 %v273_v2, %v52_v32  ;;  %v53_v41 = vmul.f32 %v268_v1, %v29_v28  ;;  %v32_v58 = vld [vmem:[%s542_s0 + $0x48] sm:$0xff]  ;;  %v33_v0 = vld [vmem:[%s542_s0 + $0x50] sm:$0xff] }
   0x8   :  { %v95_v21 = vld [vmem:[%s543_s1 + $0x20] sm:$0xff]  ;;  %v135_v22 = vadd.f32 %v115_v10, %v71_v9  ;;  %v51_v25 = vmul.f32 %v268_v1, %v27_v20  ;;  %v136_v35 = vadd.f32 %v116_v12, %v72_v23  ;;  %v137_v38 = vadd.f32 %v117_v17, %v73_v29  ;;  %v100_v59 = vld [vmem:[%s543_s1 + $0x48] sm:$0xff]  ;;  %v101_v3 = vld [vmem:[%s543_s1 + $0x50] sm:$0xff] }
   0x9   :  { %v119_v31 = vmul.f32 %v282_v5, %v95_v21  ;;  %v138_v39 = vadd.f32 %v118_v24, %v74_v30  ;;  %v121_v47 = vmul.f32 %v282_v5, %v97_v33  ;;  %v140_v50 = vadd.f32 %v120_v37, %v76_v40  ;;  %v31_v52 = vld [vmem:[%s542_s0 + $0x40] sm:$0xff]  ;;  %v34_v10 = vld [vmem:[%s542_s0 + $0x58] sm:$0xff] }
   0xa   :  { %v159_v34 = vadd.f32 %v287_v6, %v135_v22  ;;  %v75_v36 = vadd.f32 %v273_v2, %v51_v25  ;;  %v160_v45 = vadd.f32 %v287_v6, %v136_v35  ;;  %v161_v48 = vadd.f32 %v287_v6, %v137_v38  ;;  %v99_v53 = vld [vmem:[%s543_s1 + $0x40] sm:$0xff]  ;;  %v102_v11 = vld [vmem:[%s543_s1 + $0x58] sm:$0xff]  ;;  %v36_v22 = vld [vmem:[%s542_s0 + $0x68] sm:$0xff] }
   0xb   :  { %v162_v49 = vadd.f32 %v287_v6, %v138_v39  ;;  %v77_v51 = vadd.f32 %v273_v2, %v53_v41  ;;  %v54_v56 = vmul.f32 %v268_v1, %v30_v42  ;;  %v122_v57 = vmul.f32 %v282_v5, %v98_v43  ;;  %v35_v16 = vld [vmem:[%s542_s0 + $0x60] sm:$0xff]  ;;  %v105_v41 = vld [vmem:[%s543_s1 + $0x70] sm:$0xff] }
   0xc   :  { %v179_v44 = vmax.f32 %v159_v34, 0.0  ;;  %v139_v46 = vadd.f32 %v119_v31, %v75_v36  ;;  %v180_v54 = vmax.f32 %v160_v45, 0.0  ;;  %v181_v60 = vmax.f32 %v161_v48, 0.0  ;;  %v103_v21 = vld [vmem:[%s543_s1 + $0x60] sm:$0xff]  ;;  %v104_v31 = vld [vmem:[%s543_s1 + $0x68] sm:$0xff]  ;;  %v37_v36 = vld [vmem:[%s542_s0 + $0x70] sm:$0xff] }
   0xd   :  { %v182_v61 = vmax.f32 %v162_v49, 0.0  ;;  %v164_v62 = vadd.f32 %v287_v6, %v140_v50  ;;  %v141_v63 = vadd.f32 %v121_v47, %v77_v51  ;;  %v78_v7 = vadd.f32 %v273_v2, %v54_v56  ;;  %v106_v51 = vld [vmem:[%s543_s1 + $0x78] sm:$0xff] }
   0xe   :  { %199 = vst [vmem:[%s548_s6] sm:$0xff] %v179_v44  ;;  %v163_v55 = vadd.f32 %v287_v6, %v139_v46  ;;  %v55_v8 = vmul.f32 %v268_v1, %v31_v52  ;;  %v123_v9 = vmul.f32 %v282_v5, %v99_v53  ;;  %v56_v14 = vmul.f32 %v268_v1, %v32_v58  ;;  %v38_v46 = vld [vmem:[%s542_s0 + $0x78] sm:$0xff]  ;;  %v39_v52 = vld [vmem:[%s542_s0 + $0x80] sm:$0xff] }
   0xf   :  { %200 = vst [vmem:[%s548_s6 + $0x8] sm:$0xff] %v180_v54  ;;  %v184_v12 = vmax.f32 %v164_v62, 0.0  ;;  %v165_v13 = vadd.f32 %v287_v6, %v141_v63  ;;  %v124_v15 = vmul.f32 %v282_v5, %v100_v59  ;;  %v142_v17 = vadd.f32 %v122_v57, %v78_v7  ;;  %v107_v57 = vld [vmem:[%s543_s1 + $0x80] sm:$0xff]  ;;  %v40_v62 = vld [vmem:[%s542_s0 + $0x88] sm:$0xff] }
  0x10   :  { %v183_v4 = vmax.f32 %v163_v55, 0.0  ;;  %201 = vst [vmem:[%s548_s6 + $0x10] sm:$0xff] %v181_v60  ;;  %v79_v18 = vadd.f32 %v273_v2, %v55_v8  ;;  %v57_v19 = vmul.f32 %v268_v1, %v33_v0  ;;  %v125_v20 = vmul.f32 %v282_v5, %v101_v3  ;;  %v108_v63 = vld [vmem:[%s543_s1 + $0x88] sm:$0xff]  ;;  %v41_v8 = vld [vmem:[%s542_s0 + $0x90] sm:$0xff] }
  0x11   :  { %202 = vst [vmem:[%s548_s6 + $0x18] sm:$0xff] %v182_v61  ;;  %v185_v23 = vmax.f32 %v165_v13, 0.0  ;;  %v80_v24 = vadd.f32 %v273_v2, %v56_v14  ;;  %v58_v25 = vmul.f32 %v268_v1, %v34_v10  ;;  %v126_v26 = vmul.f32 %v282_v5, %v102_v11  ;;  %v42_v14 = vld [vmem:[%s542_s0 + $0x98] sm:$0xff] }
  0x12   :  { %203 = vst [vmem:[%s548_s6 + $0x20] sm:$0xff] %v183_v4  ;;  %v166_v27 = vadd.f32 %v287_v6, %v142_v17  ;;  %v143_v28 = vadd.f32 %v123_v9, %v79_v18  ;;  %v81_v29 = vadd.f32 %v273_v2, %v57_v19  ;;  %v59_v30 = vmul.f32 %v268_v1, %v35_v16  ;;  %v109_v9 = vld [vmem:[%s543_s1 + $0x90] sm:$0xff] }
  0x13   :  { %204 = vst [vmem:[%s548_s6 + $0x28] sm:$0xff] %v184_v12  ;;  %v144_v32 = vadd.f32 %v124_v15, %v80_v24  ;;  %v82_v33 = vadd.f32 %v273_v2, %v58_v25  ;;  %v127_v34 = vmul.f32 %v282_v5, %v103_v21  ;;  %v60_v35 = vmul.f32 %v268_v1, %v36_v22  ;;  %v110_v15 = vld [vmem:[%s543_s1 + $0x98] sm:$0xff] }
  0x14   :  { %205 = vst [vmem:[%s548_s6 + $0x30] sm:$0xff] %v185_v23  ;;  %v186_v37 = vmax.f32 %v166_v27, 0.0  ;;  %v167_v38 = vadd.f32 %v287_v6, %v143_v28  ;;  %v145_v39 = vadd.f32 %v125_v20, %v81_v29  ;;  %v83_v40 = vadd.f32 %v273_v2, %v59_v30 }
  0x15   :  { %v168_v42 = vadd.f32 %v287_v6, %v144_v32  ;;  %v146_v43 = vadd.f32 %v126_v26, %v82_v33  ;;  %v84_v44 = vadd.f32 %v273_v2, %v60_v35  ;;  %v128_v45 = vmul.f32 %v282_v5, %v104_v31 }
  0x16   :  { %206 = vst [vmem:[%s548_s6 + $0x38] sm:$0xff] %v186_v37  ;;  %v187_v47 = vmax.f32 %v167_v38, 0.0  ;;  %v169_v48 = vadd.f32 %v287_v6, %v145_v39  ;;  %v147_v49 = vadd.f32 %v127_v34, %v83_v40  ;;  %v61_v50 = vmul.f32 %v268_v1, %v37_v36 }
  0x17   :  { %v188_v53 = vmax.f32 %v168_v42, 0.0  ;;  %v170_v54 = vadd.f32 %v287_v6, %v146_v43  ;;  %v148_v55 = vadd.f32 %v128_v45, %v84_v44  ;;  %v129_v56 = vmul.f32 %v282_v5, %v105_v41 }
  0x18   :  { %207 = vst [vmem:[%s548_s6 + $0x40] sm:$0xff] %v187_v47  ;;  %v189_v58 = vmax.f32 %v169_v48, 0.0  ;;  %v171_v59 = vadd.f32 %v287_v6, %v147_v49  ;;  %v85_v60 = vadd.f32 %v273_v2, %v61_v50  ;;  %v62_v61 = vmul.f32 %v268_v1, %v38_v46 }
  0x19   :  { %208 = vst [vmem:[%s548_s6 + $0x48] sm:$0xff] %v188_v53  ;;  %v190_v0 = vmax.f32 %v170_v54, 0.0  ;;  %v172_v3 = vadd.f32 %v287_v6, %v148_v55  ;;  %v130_v4 = vmul.f32 %v282_v5, %v106_v51  ;;  %v63_v7 = vmul.f32 %v268_v1, %v39_v52 }
  0x1a   :  { %209 = vst [vmem:[%s548_s6 + $0x50] sm:$0xff] %v189_v58  ;;  %v191_v10 = vmax.f32 %v171_v59, 0.0  ;;  %v149_v11 = vadd.f32 %v129_v56, %v85_v60  ;;  %v86_v12 = vadd.f32 %v273_v2, %v62_v61  ;;  %v131_v13 = vmul.f32 %v282_v5, %v107_v57 }
  0x1b   :  { %210 = vst [vmem:[%s548_s6 + $0x58] sm:$0xff] %v190_v0  ;;  %v192_v16 = vmax.f32 %v172_v3, 0.0  ;;  %v87_v17 = vadd.f32 %v273_v2, %v63_v7  ;;  %v64_v18 = vmul.f32 %v268_v1, %v40_v62  ;;  %v132_v19 = vmul.f32 %v282_v5, %v108_v63 }
  0x1c   :  { %211 = vst [vmem:[%s548_s6 + $0x60] sm:$0xff] %v191_v10  ;;  %v173_v20 = vadd.f32 %v287_v6, %v149_v11  ;;  %v150_v21 = vadd.f32 %v130_v4, %v86_v12  ;;  %v65_v22 = vmul.f32 %v268_v1, %v41_v8  ;;  %v133_v23 = vmul.f32 %v282_v5, %v109_v9 }
  0x1d   :  { %212 = vst [vmem:[%s548_s6 + $0x68] sm:$0xff] %v192_v16  ;;  %v151_v24 = vadd.f32 %v131_v13, %v87_v17  ;;  %v88_v25 = vadd.f32 %v273_v2, %v64_v18  ;;  %v66_v26 = vmul.f32 %v268_v1, %v42_v14  ;;  %v134_v27 = vmul.f32 %v282_v5, %v110_v15 }
  0x1e   :  { %v193_v28 = vmax.f32 %v173_v20, 0.0  ;;  %v174_v29 = vadd.f32 %v287_v6, %v150_v21  ;;  %v89_v30 = vadd.f32 %v273_v2, %v65_v22 }
  0x1f   :  { %v175_v31 = vadd.f32 %v287_v6, %v151_v24  ;;  %v152_v32 = vadd.f32 %v132_v19, %v88_v25  ;;  %v90_v33 = vadd.f32 %v273_v2, %v66_v26 }
  0x20   :  { %213 = vst [vmem:[%s548_s6 + $0x70] sm:$0xff] %v193_v28  ;;  %v194_v34 = vmax.f32 %v174_v29, 0.0  ;;  %v153_v35 = vadd.f32 %v133_v23, %v89_v30 }
  0x21   :  { %v195_v36 = vmax.f32 %v175_v31, 0.0  ;;  %v176_v1 = vadd.f32 %v287_v6, %v152_v32  ;;  %v154_v5 = vadd.f32 %v134_v27, %v90_v33 }
  0x22   :  { %214 = vst [vmem:[%s548_s6 + $0x78] sm:$0xff] %v194_v34  ;;  %v177_v37 = vadd.f32 %v287_v6, %v153_v35 }
  0x23   :  { %215 = vst [vmem:[%s548_s6 + $0x80] sm:$0xff] %v195_v36  ;;  %v196_v2 = vmax.f32 %v176_v1, 0.0  ;;  %v178_v38 = vadd.f32 %v287_v6, %v154_v5 }
  0x24   :  { %v197_v39 = vmax.f32 %v177_v37, 0.0 }
  0x25   :  { %216 = vst [vmem:[%s548_s6 + $0x88] sm:$0xff] %v196_v2  ;;  %v198_v40 = vmax.f32 %v178_v38, 0.0 }
  0x26   :  { %217 = vst [vmem:[%s548_s6 + $0x90] sm:$0xff] %v197_v39 }
  0x27   :  { %218 = vst [vmem:[%s548_s6 + $0x98] sm:$0xff] %v198_v40 }

// kernel: _basic_block_forward.7
= control target key start
LH: loop header
LB: loop body
LE: loop exit
PB: predicated region body
PF: predicated region fallthrough
CT: control target
= control target key end

     0   :  { %s2824_s12 = smov 0   ;;  %s2826_s13 = smov 0   ;;  %s3599_s0 = inlined_call_operand.vmem [shape: bf16[2,102,128], index: 0, kind: input, shape index: {}]   ;;  %s3600_s1 = inlined_call_operand.vmem [shape: bf16[9,128,128], index: 1, kind: input, shape index: {}]   ;;  %s3601_s2 = inlined_call_operand.vmem [shape: f32[2,80,128], index: 2, kind: output, shape index: {0}]   ;;  %s3602_s3 = inlined_call_operand.vmem [shape: f32[2,2,128], index: 3, kind: output, shape index: {1}]  }
   0x1   :  { %s2828_s14 = smov 0  }
   0x2 LB: > { %s26_s15 = sadd.s32 1, %s2796_s13  ;;  %p2163_p0 = scmp.ge.s32.totalorder %s2800_s14, 1  ;;  %s2800_s14 = sphi %s2828_s14, %s14_s14   ;;  %s2796_s13 = sphi %s2826_s13, %s3632_s13   ;;  %s2792_s12 = sphi %s2824_s12, %s3631_s12  }
   0x3   : > { %p28_p1 = scmp.ge.s32.totalorder %s26_s15, 2  ;;  %p165_p2 = scmp.lt.s32.totalorder %s2800_s14, 3 }
   0x5   : > { %s3634_s15 = smov (%p28_p1, %s26_s15), 0  ;;  %p166_p3 = pnand %p2163_p0, %p165_p2 }
   0x6   : > { %p203_p4 = scmp.lt.s32.totalorder (!%p166_p3), %s2792_s12, 1 }
   0x7   : > { %169 = sbr.rel (%p166_p3) target bundleno = 389 (0x185), region = 28 }
   0xc   : > { %v2662_v0 = vld [vmem:[%s3600_s1 + $0x78] sm:$0xff]  ;;  %v2661_v1 = vld [vmem:[%s3600_s1 + $0x70] sm:$0xff]  ;;  %s3636_s12 = smov (!%p203_p4, %s2792_s12), 1  ;;  %v2660_v4 = vld [vmem:[%s3600_s1 + $0x68] sm:$0xff]  ;;  %vm299_vm0 = vsmask.f32 7424 }
   0xd   : > { %397 = vmatpush.bf16.msra.mxu0 %v2662_v0  ;;  %2734 = vmatpush.bf16.msra.mxu1 %v2662_v0  ;;  %v2682_v2 = vld [vmem:[%s3600_s1 + $0xf8] sm:$0xff]  ;;  %v2681_v3 = vld [vmem:[%s3600_s1 + $0xf0] sm:$0xff]  ;;  %s2750_s26 = smul.u32 52, %s3636_s12  ;;  %v2680_v5 = vld [vmem:[%s3600_s1 + $0xe8] sm:$0xff]  ;;  %vm539_vm1 = vcmask 1046528   ;;  %vm1005_vm4 = vcmask 1045504  }
   0xe   : > { %2735 = vmatpush.bf16.msra.mxu2 %v2662_v0  ;;  %768 = vmatpush.bf16.msra.mxu3 %v2682_v2  ;;  %v2659_v6 = vld [vmem:[%s3600_s1 + $0x60] sm:$0xff]  ;;  %v2658_v9 = vld [vmem:[%s3600_s1 + $0x58] sm:$0xff]  ;;  %v2657_v17 = vld [vmem:[%s3600_s1 + $0x50] sm:$0xff]  ;;  %vm833_vm2 = vsmask.f32 6400  ;;  %vm1471_vm5 = vcmask 1044480  }
   0xf   : > { %s2869_s6 = scalar_lea.vmem %s3599_s0, %s2750_s26  ;;  %v2679_v7 = vld [vmem:[%s3600_s1 + $0xe0] sm:$0xff]  ;;  %v2678_v14 = vld [vmem:[%s3600_s1 + $0xd8] sm:$0xff]  ;;  %v2677_v24 = vld [vmem:[%s3600_s1 + $0xd0] sm:$0xff]  ;;  %vm1299_vm3 = vsmask.f32 5376  ;;  %s2166_s8 = sshll.u32 %s3636_s12, 1 }
  0x10   : > { %v253_v8 = vld [vmem:[%s2869_s6 + $0x28] sm:$0x1]  ;;  %v2879_v10 = vld [vmem:[%s2869_s6] sm:$0xff]   ;;  %v2882_v11 = vld [vmem:[%s2869_s6 + $0x10] sm:$0xff]  ;;  %s226_s11 = scalar_lea.vmem %s3602_s3, %s2166_s8 }
  0x11   : > { %398 = vmatpush.bf16.msra.mxu0 %v2661_v1  ;;  %2736 = vmatpush.bf16.msra.mxu1 %v2661_v1  ;;  %v2885_v12 = vld [vmem:[%s2869_s6 + $0x20] sm:$0xff]  ;;  %v292_v13 = vunpack.c.l.b16 %v253_v8  ;;  %v2891_v15 = vld [vmem:[%s2869_s6 + $0x8] sm:$0xff]  ;;  %v303_v16 = vshll.u32 %v2879_v10, 16  ;;  %v2898_v18 = vld [vmem:[%s2869_s6 + $0x18] sm:$0xff]  ;;  %v316_v19 = vshll.u32 %v2882_v11, 16  ;;  %v301_v25 = vshrl.u32 %v2879_v10, 16 }
  0x12   : > { %2737 = vmatpush.bf16.msra.mxu2 %v2661_v1  ;;  %769 = vmatpush.bf16.msra.mxu3 %v2681_v3  ;;  %v332_v21 = vshll.u32 %v2885_v12, 16  ;;  %v648_v22 = vld [vmem:[%s2869_s6 + $0x4] sm:$0xe]  ;;  %v2906_v23 = vld [vmem:[%s2869_s6 + $0x8] sm:$0xff]   ;;  %v308_v27 = vshll.u32 %v2891_v15, 16  ;;  %v320_v28 = vshrl.u32 %v2882_v11, 16 }
  0x13   : > { %v2901_v20 = vpack.c.b16 %v292_v13, %v292_v13  ;;  %v305_v26 = vrot.slane %v303_v16, 1  ;;  %v2656_v29 = vld [vmem:[%s3600_s1 + $0x48] sm:$0xff]  ;;  %v2917_v30 = vrot.slane %v316_v19, 1  ;;  %v324_v31 = vshll.u32 %v2898_v18, 16  ;;  %v2655_v39 = vld [vmem:[%s3600_s1 + $0x40] sm:$0xff]  ;;  %v2654_v45 = vld [vmem:[%s3600_s1 + $0x38] sm:$0xff] }
  0x14   : > { %v687_v32 = vunpack.c.l.b16 %v648_v22  ;;  %v688_v33 = vunpack.c.l.b16 %v2906_v23  ;;  %v2921_v34 = vrot.slane %v332_v21, 1  ;;  %v336_v35 = vshrl.u32 %v2885_v12, 16  ;;  %v2676_v37 = vld [vmem:[%s3600_s1 + $0xc8] sm:$0xff]  ;;  %v2670_v48 = vld [vmem:[%s3600_s1 + $0xb8] sm:$0xff]  ;;  %v2675_v52 = vld [vmem:[%s3600_s1 + $0xc0] sm:$0xff] }
  0x15   : > { %399 = vmatpush.bf16.msra.mxu0 %v2660_v4  ;;  %2738 = vmatpush.bf16.msra.mxu1 %v2660_v4  ;;  %v340_v36 = vshll.u32 %v2901_v20, 16  ;;  %v310_v38 = vrot.slane %v308_v27, 1  ;;  %v306_v40 = vor.u32 %v305_v26, %v301_v25  ;;  %v322_v41 = vor.u32 %v320_v28, %v2917_v30  ;;  %v2933_v43 = vld [vmem:[%s2869_s6 + $0xc] sm:$0xff]  ;;  %v2690_v49 = vld [vmem:[%s3600_s1 + $0x138] sm:$0xff]  ;;  %v2651_v3 = vld [vmem:[%s3600_s1 + $0x20] sm:$0xff] }
  0x16   : > { %2739 = vmatpush.bf16.msra.mxu2 %v2660_v4  ;;  %770 = vmatpush.bf16.msra.mxu3 %v2680_v5  ;;  %v326_v42 = vrot.slane %v324_v31, 1  ;;  %v2937_v44 = vpack.c.b16 %v688_v33, %v687_v32  ;;  %v338_v46 = vor.u32 %v336_v35, %v2921_v34  ;;  %v705_v54 = vrot.slane %v2933_v43, 1  ;;  %v2653_v56 = vld [vmem:[%s3600_s1 + $0x30] sm:$0xff]  ;;  %v2718_v57 = vld [vmem:[%s3600_s1 + $0x1f8] sm:$0xff]  ;;  %v2652_v61 = vld [vmem:[%s3600_s1 + $0x28] sm:$0xff] }
  0x17   : > { %v342_v47 = vrot.slane %v340_v36, 1  ;;  %v311_v50 = vsel %vm299_vm0, %v306_v40, %v310_v38  ;;  %v2669_v58 = vld [vmem:[%s3600_s1 + $0xb0] sm:$0xff]  ;;  %v2668_v63 = vld [vmem:[%s3600_s1 + $0xa8] sm:$0xff]  ;;  %v312_v1 = vshrl.u32 %v2891_v15, 16  ;;  %v328_v2 = vshrl.u32 %v2898_v18, 16  ;;  %v2667_v4 = vld [vmem:[%s3600_s1 + $0xa0] sm:$0xff] }
  0x18   : > { %v327_v51 = vsel %vm299_vm0, %v322_v41, %v326_v42  ;;  %v704_v53 = vrot.slane %v2937_v44, 1  ;;  %v2689_v59 = vld [vmem:[%s3600_s1 + $0x130] sm:$0xff]  ;;  %v2688_v0 = vld [vmem:[%s3600_s1 + $0x128] sm:$0xff]  ;;  %v2687_v5 = vld [vmem:[%s3600_s1 + $0x120] sm:$0xff]  ;;  %v835_v27 = vshrl.u32 %v2937_v44, 16  ;;  %v846_v31 = vshll.u32 %v2933_v43, 16 }
  0x19   : > { %400 = vmatpush.bf16.msra.mxu0 %v2659_v6  ;;  %2740 = vmatpush.bf16.msra.mxu1 %v2659_v6  ;;  %v343_v55 = vsel %vm299_vm0, %v338_v46, %v342_v47  ;;  %v2717_v62 = vld [vmem:[%s3600_s1 + $0x1f0] sm:$0xff]  ;;  %v2666_v13 = vld [vmem:[%s3600_s1 + $0x98] sm:$0xff]  ;;  %v2731_v25 = vld [vmem:[%s2869_s6] sm:$0xf0]  ;;  %v541_v46 = vrot.slane %v2891_v15, 1 }
  0x1a   : > { %2741 = vmatpush.bf16.msra.mxu2 %v2659_v6  ;;  %771 = vmatpush.bf16.msra.mxu3 %v2679_v7  ;;  %v706_v60 = vsel %vm539_vm1, %v704_v53, %v705_v54  ;;  %v314_v6 = vor.u32 %v312_v1, %v310_v38  ;;  %v330_v7 = vor.u32 %v328_v2, %v326_v42  ;;  %v2994_v8 = vld [vmem:[%s2869_s6 + $0x14] sm:$0xff]  ;;  %v2732_v26 = vld [vmem:[%s2869_s6] sm:$0xe]  ;;  %v2716_v28 = vld [vmem:[%s3600_s1 + $0x1e8] sm:$0xff]  ;;  %v837_v38 = vrot.slane %v835_v27, 1 }
  0x1b   : > { %v707_v19 = vrot.slane %v2994_v8, 1  ;;  %v2649_v21 = vld [vmem:[%s3600_s1 + $0x10] sm:$0xff]  ;;  %v2664_v35 = vld [vmem:[%s3600_s1 + $0x88] sm:$0xff]  ;;  %v848_v41 = vrot.slane %v846_v31, 2  ;;  %v2647_v42 = vld [vmem:[%s3600_s1] sm:$0xff] }
  0x1c   : > { %v319_v16 = vsel %vm299_vm0, %v314_v6, %v2917_v30  ;;  %v2665_v22 = vld [vmem:[%s3600_s1 + $0x90] sm:$0xff]  ;;  %v843_v30 = vshrl.u32 %v2933_v43, 16  ;;  %v2684_v36 = vld [vmem:[%s3600_s1 + $0x108] sm:$0xff]  ;;  %v2683_v47 = vld [vmem:[%s3600_s1 + $0x100] sm:$0xff] }
  0x1d   : > { %401 = vmatpush.bf16.msra.mxu0 %v2658_v9  ;;  %2742 = vmatpush.bf16.msra.mxu1 %v2658_v9  ;;  %v708_v32 = vsel %vm539_vm1, %v705_v54, %v707_v19  ;;  %v3060_v53 = vld [vmem:[%s2869_s6 + $0x1c] sm:$0xff]  ;;  %v2693_v27 = vld [vmem:[%s3600_s1 + $0x150] sm:$0xff] }
  0x1e   : > { %2743 = vmatpush.bf16.msra.mxu2 %v2658_v9  ;;  %772 = vmatpush.bf16.msra.mxu3 %v2678_v14  ;;  %v2650_v9 = vld [vmem:[%s3600_s1 + $0x18] sm:$0xff]  ;;  %v845_v40 = vrot.slane %v843_v30, 1  ;;  %v2695_v6 = vld [vmem:[%s3600_s1 + $0x160] sm:$0xff]  ;;  %v2721_v31 = vld [vmem:[%s3600_s1 + $0x210] sm:$0xff] }
  0x1f   : > { %v2686_v14 = vld [vmem:[%s3600_s1 + $0x118] sm:$0xff] }
  0x20   : > { %v2714_v2 = vld [vmem:[%s3600_s1 + $0x1d8] sm:$0xff] }
  0x21   : > { %402 = vmatpush.bf16.msra.mxu0 %v2657_v17  ;;  %2744 = vmatpush.bf16.msra.mxu1 %v2657_v17 }
  0x22   : > { %2745 = vmatpush.bf16.msra.mxu2 %v2657_v17  ;;  %773 = vmatpush.bf16.msra.mxu3 %v2677_v24  ;;  %v335_v17 = vsel %vm299_vm0, %v330_v7, %v2921_v34  ;;  %v2685_v24 = vld [vmem:[%s3600_s1 + $0x110] sm:$0xff]  ;;  %v2648_v34 = vld [vmem:[%s3600_s1 + $0x8] sm:$0xff]  ;;  %v2723_v7 = vld [vmem:[%s3600_s1 + $0x220] sm:$0xff] }
  0x25   : > { %403 = vmatpush.bf16.msra.mxu0 %v2656_v29  ;;  %2746 = vmatpush.bf16.msra.mxu1 %v2656_v29 }
  0x26   : > { %2747 = vmatpush.bf16.msra.mxu2 %v2656_v29  ;;  %774 = vmatpush.bf16.msra.mxu3 %v2676_v37  ;;  %v838_v29 = vshll.u32 %v2937_v44, 16  ;;  %v2733_v37 = vor.u32 %v2732_v26, %v2731_v25  ;;  %v2663_v44 = vld [vmem:[%s3600_s1 + $0x80] sm:$0xff]  ;;  %v2722_v25 = vld [vmem:[%s3600_s1 + $0x218] sm:$0xff]  ;;  %v2713_v26 = vld [vmem:[%s3600_s1 + $0x1d0] sm:$0xff] }
  0x29   : > { %404 = vmatpush.bf16.msra.mxu0 %v2655_v39  ;;  %2748 = vmatpush.bf16.msra.mxu1 %v2655_v39 }
  0x2a   : > { %2749 = vmatpush.bf16.msra.mxu2 %v2655_v39  ;;  %775 = vmatpush.bf16.msra.mxu3 %v2675_v52  ;;  %v840_v39 = vrot.slane %v838_v29, 2  ;;  %v2726_v52 = vld [vmem:[%s3600_s1 + $0x238] sm:$0xff]  ;;  %v864_v29 = vshll.u32 %v3060_v53, 16 }
  0x2c   : > { %405 = vmatmul.bf16.vlgmr.msra.gmra.mxu0 %v311_v50  ;;  %415 = vmatmul.bf16.vlgmr.msra.gmra.mxu1 %v327_v51  ;;  %v841_v50 = vor.u32 %v840_v39, %v837_v38  ;;  %v849_v51 = vor.u32 %v848_v41, %v845_v40  ;;  %v545_v38 = vrot.slane %v2898_v18, 1 }
  0x2d   : > { %484 = vmatpush.bf16.msrb.mxu1 %v2654_v45  ;;  %940 = vmatpush.bf16.msrb.mxu0 %v2690_v49  ;;  %v540_v45 = vrot.slane %v2733_v37, 1  ;;  %v2698_v49 = vld [vmem:[%s3600_s1 + $0x178] sm:$0xff] }
  0x2e   : > { %604 = vmatpush.bf16.msrb.mxu2 %v2670_v48  ;;  %1406 = vmatpush.bf16.msrb.mxu3 %v2718_v57  ;;  %v2710_v48 = vld [vmem:[%s3600_s1 + $0x1b8] sm:$0xff]  ;;  %v2697_v57 = vld [vmem:[%s3600_s1 + $0x170] sm:$0xff] }
  0x2f   : > { %425 = vmatmul.bf16.vlgmr.msra.gmra.mxu2 %v343_v55  ;;  %776 = vmatmul.bf16.vlgmr.msra.gmra.mxu3 %v706_v60  ;;  %v542_v54 = vsel %vm539_vm1, %v540_v45, %v541_v46  ;;  %v850_v55 = vsel %vm833_vm2, %v841_v50, %v849_v51  ;;  %v2715_v60 = vld [vmem:[%s3600_s1 + $0x1e0] sm:$0xff] }
  0x31   : > { %485 = vmatpush.bf16.msrb.mxu1 %v2653_v56  ;;  %941 = vmatpush.bf16.msrb.mxu0 %v2689_v59  ;;  %v2709_v56 = vld [vmem:[%s3600_s1 + $0x1b0] sm:$0xff] }
  0x32   : > { %605 = vmatpush.bf16.msrb.mxu2 %v2669_v58  ;;  %1407 = vmatpush.bf16.msrb.mxu3 %v2717_v62  ;;  %v709_v58 = vrot.slane %v3060_v53, 1  ;;  %v2725_v59 = vld [vmem:[%s3600_s1 + $0x230] sm:$0xff]  ;;  %v855_v62 = vshll.u32 %v2994_v8, 16 }
  0x34   : > { %v710_v1 = vsel %vm539_vm1, %v707_v19, %v709_v58 }
  0x35   : > { %486 = vmatpush.bf16.msrb.mxu1 %v2652_v61  ;;  %942 = vmatpush.bf16.msrb.mxu0 %v2688_v0  ;;  %v852_v61 = vshrl.u32 %v2994_v8, 16  ;;  %v2696_v0 = vld [vmem:[%s3600_s1 + $0x168] sm:$0xff] }
  0x36   : > { %606 = vmatpush.bf16.msrb.mxu2 %v2668_v63  ;;  %1408 = vmatpush.bf16.msrb.mxu3 %v2716_v28  ;;  %v2708_v63 = vld [vmem:[%s3600_s1 + $0x1a8] sm:$0xff]  ;;  %v861_v28 = vshrl.u32 %v3060_v53, 16 }
  0x39   : > { %487 = vmatpush.bf16.msrb.mxu1 %v2651_v3  ;;  %943 = vmatpush.bf16.msrb.mxu0 %v2687_v5  ;;  %v854_v3 = vrot.slane %v852_v61, 1  ;;  %v2707_v5 = vld [vmem:[%s3600_s1 + $0x1a0] sm:$0xff] }
  0x3a   : > { %607 = vmatpush.bf16.msrb.mxu2 %v2667_v4  ;;  %1409 = vmatpush.bf16.msrb.mxu3 %v2715_v60  ;;  %v857_v4 = vrot.slane %v855_v62, 2  ;;  %v812_v60 = vld [vmem:[%s2869_s6 + $0x2c] sm:$0x3] }
  0x3c   : > { %410 = vmatmul.bf16.gmra.mxu0 %v319_v16  ;;  %420 = vmatmul.bf16.gmra.mxu1 %v335_v17  ;;  %v3109_v16 = vld [vmem:[%s2869_s6 + $0x24] sm:$0xff]  ;;  %v2694_v17 = vld [vmem:[%s3600_s1 + $0x158] sm:$0xff] }
  0x3d   : > { %488 = vmatpush.bf16.msrb.mxu1 %v2650_v9  ;;  %944 = vmatpush.bf16.msrb.mxu0 %v2686_v14  ;;  %v543_v9 = vrot.slane %v2882_v11, 1  ;;  %v2706_v14 = vld [vmem:[%s3600_s1 + $0x198] sm:$0xff]  ;;  %v873_v50 = vshll.u32 %v3109_v16, 16 }
  0x3e   : > { %608 = vmatpush.bf16.msrb.mxu2 %v2666_v13  ;;  %1410 = vmatpush.bf16.msrb.mxu3 %v2714_v2  ;;  %v858_v13 = vor.u32 %v857_v4, %v854_v3  ;;  %v831_v2 = vunpack.c.l.b16 %v812_v60 }
  0x3f   : > { %781 = vmatmul.bf16.gmra.mxu3 %v708_v32  ;;  %v544_v19 = vsel %vm539_vm1, %v541_v46, %v543_v9  ;;  %v658_v32 = vld [vmem:[%s2869_s6 + $0x2c] sm:$0x1]  ;;  %v546_v41 = vsel %vm539_vm1, %v543_v9, %v545_v38  ;;  %v2719_v9 = vld [vmem:[%s3600_s1 + $0x200] sm:$0xff] }
  0x40   : > { %v697_v37 = vunpack.c.l.b16 %v658_v32 }
  0x41   : > { %489 = vmatpush.bf16.msrb.mxu1 %v2649_v21  ;;  %945 = vmatpush.bf16.msrb.mxu0 %v2685_v24  ;;  %v859_v21 = vsel %vm833_vm2, %v849_v51, %v858_v13  ;;  %v2705_v24 = vld [vmem:[%s3600_s1 + $0x190] sm:$0xff]  ;;  %v2703_v51 = vld [vmem:[%s3600_s1 + $0x180] sm:$0xff] }
  0x42   : > { %609 = vmatpush.bf16.msrb.mxu2 %v2665_v22  ;;  %v711_v22 = vrot.slane %v3109_v16, 1  ;;  %1411 = vmatpush.bf16.msrb.mxu3 %v2713_v26  ;;  %v703_v40 = vpack.c.b16 %v697_v37, %v697_v37  ;;  %v1450_v37 = vld [vmem:[%s2869_s6 + $0x8] sm:$0x8] }
  0x44   : > { %v712_v30 = vsel %vm539_vm1, %v709_v58, %v711_v22  ;;  %v713_v45 = vrot.slane %v703_v40, 1 }
  0x45   : > { %490 = vmatpush.bf16.msrb.mxu1 %v2648_v34  ;;  %946 = vmatpush.bf16.msrb.mxu0 %v2684_v36  ;;  %v2712_v34 = vld [vmem:[%s3600_s1 + $0x1c8] sm:$0xff]  ;;  %v866_v36 = vrot.slane %v864_v29, 2 }
  0x46   : > { %610 = vmatpush.bf16.msrb.mxu2 %v2664_v35  ;;  %v863_v35 = vrot.slane %v861_v28, 1  ;;  %1412 = vmatpush.bf16.msrb.mxu3 %v2712_v34 }
  0x48   : > { %v867_v39 = vor.u32 %v866_v36, %v863_v35  ;;  %v984_v35 = vld [vmem:[%s2869_s6 + $0x4] sm:$0xc] }
  0x49   : > { %491 = vmatpush.bf16.msrb.mxu1 %v2647_v42  ;;  %947 = vmatpush.bf16.msrb.mxu0 %v2683_v47  ;;  %v1114_v42 = vld [vmem:[%s2869_s6 + $0x8] sm:$0xc]  ;;  %v1154_v47 = vunpack.c.h.b16 %v2906_v23 }
  0x4a   : > { %611 = vmatpush.bf16.msrb.mxu2 %v2663_v44  ;;  %v868_v44 = vsel %vm833_vm2, %v858_v13, %v867_v39  ;;  %v1153_v46 = vunpack.c.l.b16 %v1114_v42 }
  0x4c   : > { %492 = vmatmul.bf16.vlgmr.msrb.gmra.mxu1 %v2879_v10  ;;  %948 = vmatmul.bf16.vlgmr.msrb.gmra.mxu0 %v850_v55  ;;  %v2724_v10 = vld [vmem:[%s3600_s1 + $0x228] sm:$0xff]  ;;  %v2691_v55 = vld [vmem:[%s3600_s1 + $0x140] sm:$0xff] }
  0x4d   : > { %1070 = vmatpush.bf16.msra.mxu1 %v2698_v49  ;;  %1536 = vmatpush.bf16.msra.mxu0 %v2726_v52  ;;  %v870_v49 = vshrl.u32 %v3109_v16, 16  ;;  %v2720_v52 = vld [vmem:[%s3600_s1 + $0x208] sm:$0xff] }
  0x4e   : > { %1234 = vmatpush.bf16.msra.mxu2 %v2710_v48  ;;  %v2692_v48 = vld [vmem:[%s3600_s1 + $0x148] sm:$0xff] }
  0x4f   : > { %612 = vmatmul.bf16.vlgmr.msrb.gmra.mxu2 %v542_v54  ;;  %786 = vmatmul.bf16.gmra.mxu3 %v710_v1  ;;  %v2711_v54 = vld [vmem:[%s3600_s1 + $0x1c0] sm:$0xff]  ;;  %v872_v58 = vrot.slane %v870_v49, 1  ;;  %v547_v1 = vrot.slane %v2885_v12, 1  ;;  %v1007_v49 = vrot.slane %v2933_v43, 2  ;;  %v3221_v43 = vld [vmem:[%s2869_s6 + $0x28] sm:$0xff] }
  0x50   : > { %1413 = vmatpush.bf16.msrb.mxu3 %v2711_v54 }
  0x51   : > { %1071 = vmatpush.bf16.msra.mxu1 %v2697_v57  ;;  %1537 = vmatpush.bf16.msra.mxu0 %v2725_v59  ;;  %v3172_v57 = vpack.c.b16 %v1154_v47, %v1153_v46  ;;  %v875_v59 = vrot.slane %v873_v50, 2 }
  0x52   : > { %1235 = vmatpush.bf16.msra.mxu2 %v2709_v56  ;;  %v3168_v56 = vld [vmem:[%s2869_s6 + $0x10] sm:$0xff] }
  0x53   : > { %v1301_v61 = vshrl.u32 %v3172_v57, 16  ;;  %v1304_v62 = vshll.u32 %v3172_v57, 16  ;;  %v1171_v46 = vrot.slane %v3168_v56, 2 }
  0x55   : > { %1072 = vmatpush.bf16.msra.mxu1 %v2696_v0  ;;  %1538 = vmatpush.bf16.msra.mxu0 %v2724_v10  ;;  %v1312_v0 = vshll.u32 %v3168_v56, 16  ;;  %v876_v10 = vor.u32 %v875_v59, %v872_v58  ;;  %v1303_v3 = vrot.slane %v1301_v61, 2  ;;  %v1306_v4 = vrot.slane %v1304_v62, 3 }
  0x56   : > { %1236 = vmatpush.bf16.msra.mxu2 %v2708_v63  ;;  %v1309_v63 = vshrl.u32 %v3168_v56, 16  ;;  %v1009_v59 = vrot.slane %v2994_v8, 2 }
  0x57   : > { %v877_v13 = vsel %vm833_vm2, %v867_v39, %v876_v10  ;;  %v1469_v39 = vunpack.c.l.b16 %v1450_v37 }
  0x59   : > { %1073 = vmatpush.bf16.msra.mxu1 %v2695_v6  ;;  %1539 = vmatpush.bf16.msra.mxu0 %v2723_v7  ;;  %v1314_v6 = vrot.slane %v1312_v0, 3  ;;  %v548_v7 = vsel %vm539_vm1, %v545_v38, %v547_v1  ;;  %v1003_v38 = vunpack.c.l.b16 %v984_v35  ;;  %v1470_v42 = vpack.c.b16 %v1154_v47, %v1469_v39  ;;  %v1278_v0 = vld [vmem:[%s2869_s6 + $0x30] sm:$0x7] }
  0x5a   : > { %1237 = vmatpush.bf16.msra.mxu2 %v2707_v5  ;;  %v1311_v5 = vrot.slane %v1309_v63, 2  ;;  %v1013_v39 = vrot.slane %v3109_v16, 2 }
  0x5b   : > { %v1472_v50 = vrot.slane %v1470_v42, 3 }
  0x5c   : > { %497 = vmatmul.bf16.gmra.mxu1 %v2891_v15  ;;  %953 = vmatmul.bf16.gmra.mxu0 %v859_v21  ;;  %v2704_v15 = vld [vmem:[%s3600_s1 + $0x188] sm:$0xff] }
  0x5d   : > { %1074 = vmatpush.bf16.msra.mxu1 %v2694_v17  ;;  %1540 = vmatpush.bf16.msra.mxu0 %v2722_v25  ;;  %v1307_v17 = vor.u32 %v1306_v4, %v1303_v3  ;;  %v3192_v25 = vld [vmem:[%s2869_s6 + $0x18] sm:$0xff] }
  0x5e   : > { %1238 = vmatpush.bf16.msra.mxu2 %v2706_v14  ;;  %v3185_v14 = vpack.c.b16 %v831_v2, %v831_v2  ;;  %v1318_v28 = vshrl.u32 %v3192_v25, 16  ;;  %v1321_v29 = vshll.u32 %v3192_v25, 16  ;;  %v1173_v58 = vrot.slane %v3192_v25, 2 }
  0x5f   : > { %617 = vmatmul.bf16.gmra.mxu2 %v544_v19  ;;  %791 = vmatmul.bf16.gmra.mxu3 %v712_v30  ;;  %v1315_v19 = vor.u32 %v1314_v6, %v1311_v5  ;;  %v1475_v60 = vrot.slane %v3192_v25, 3  ;;  %v1010_v2 = vsel %vm1005_vm4, %v1007_v49, %v1009_v59  ;;  %v1297_v5 = vunpack.c.l.b16 %v1278_v0 }
  0x60   : > { %v879_v21 = vshrl.u32 %v3185_v14, 16  ;;  %v1174_v63 = vsel %vm1005_vm4, %v1171_v46, %v1173_v58 }
  0x61   : > { %1075 = vmatpush.bf16.msra.mxu1 %v2693_v27  ;;  %1541 = vmatpush.bf16.msra.mxu0 %v2721_v31  ;;  %v1323_v31 = vrot.slane %v1321_v29, 3  ;;  %v3235_v6 = vpack.c.b16 %v1297_v5, %v1297_v5 }
  0x62   : > { %1239 = vmatpush.bf16.msra.mxu2 %v2705_v24  ;;  %v1316_v24 = vsel %vm1299_vm3, %v1307_v17, %v1315_v19  ;;  %v881_v26 = vrot.slane %v879_v21, 1 }
  0x63   : > { %v1348_v17 = vshll.u32 %v3235_v6, 16 }
  0x65   : > { %1076 = vmatpush.bf16.msra.mxu1 %v2692_v48  ;;  %1542 = vmatpush.bf16.msra.mxu0 %v2720_v52 }
  0x66   : > { %1240 = vmatpush.bf16.msra.mxu2 %v2704_v15  ;;  %v1320_v15 = vrot.slane %v1318_v28, 2 }
  0x68   : > { %v1324_v36 = vor.u32 %v1323_v31, %v1320_v15 }
  0x69   : > { %1077 = vmatpush.bf16.msra.mxu1 %v2691_v55  ;;  %1543 = vmatpush.bf16.msra.mxu0 %v2719_v9 }
  0x6a   : > { %1241 = vmatpush.bf16.msra.mxu2 %v2703_v51  ;;  %v1325_v40 = vsel %vm1299_vm3, %v1315_v19, %v1324_v36 }
  0x6c   : > { %502 = vmatmul.bf16.gmra.mxu1 %v2882_v11  ;;  %958 = vmatmul.bf16.gmra.mxu0 %v868_v44  ;;  %v714_v11 = vsel %vm539_vm1, %v711_v22, %v713_v45  ;;  %v882_v22 = vshll.u32 %v3185_v14, 16 }
  0x6e   : > { %v884_v27 = vrot.slane %v882_v22, 2  ;;  %v1011_v22 = vrot.slane %v3060_v53, 2 }
  0x6f   : > { %622 = vmatmul.bf16.gmra.mxu2 %v546_v41  ;;  %796 = vmatmul.bf16.gmra.mxu3 %v714_v11  ;;  %v3204_v41 = vld [vmem:[%s2869_s6 + $0x20] sm:$0xff] }
  0x70   : > { %v885_v30 = vor.u32 %v884_v27, %v881_v26  ;;  %v1327_v44 = vshrl.u32 %v3204_v41, 16  ;;  %v1330_v45 = vshll.u32 %v3204_v41, 16  ;;  %v1175_v19 = vrot.slane %v3204_v41, 2 }
  0x71   : > { %v1350_v26 = vrot.slane %v1348_v17, 3 }
  0x72   : > { %v886_v34 = vsel %vm833_vm2, %v876_v10, %v885_v30  ;;  %v1329_v51 = vrot.slane %v1327_v44, 2  ;;  %v1332_v52 = vrot.slane %v1330_v45, 3  ;;  %v1176_v27 = vsel %vm1005_vm4, %v1173_v58, %v1175_v19 }
  0x73   : > { %v1014_v45 = vsel %vm1005_vm4, %v1011_v22, %v1013_v39 }
  0x74   : > { %v1333_v11 = vor.u32 %v1332_v52, %v1329_v51 }
  0x76   : > { %v1334_v55 = vsel %vm1299_vm3, %v1324_v36, %v1333_v11  ;;  %v1177_v36 = vrot.slane %v3221_v43, 2 }
  0x7c   : > { %507 = vmatmul.bf16.gmra.mxu1 %v2898_v18  ;;  %963 = vmatmul.bf16.gmra.mxu0 %v877_v13  ;;  %v549_v18 = vrot.slane %v2901_v20, 1  ;;  %v1004_v20 = vpack.c.b16 %v688_v33, %v1003_v38  ;;  %v1473_v33 = vrot.slane %v3168_v56, 3  ;;  %v1336_v56 = vshrl.u32 %v3221_v43, 16 }
  0x7d   : > { %v1345_v13 = vshrl.u32 %v3235_v6, 16 }
  0x7e   : > { %v550_v32 = vsel %vm539_vm1, %v547_v1, %v549_v18  ;;  %v1006_v48 = vrot.slane %v1004_v20, 2  ;;  %v1474_v54 = vsel %vm1471_vm5, %v1472_v50, %v1473_v33  ;;  %v1338_v61 = vrot.slane %v1336_v56, 2  ;;  %v1124_v20 = vld [vmem:[%s2869_s6 + $0x30] sm:$0x3]  ;;  %s2751_s6 = smul.u32 80, %s3636_s12 }
  0x7f   : > { %627 = vmatmul.bf16.gmra.mxu2 %v548_v7  ;;  %1414 = vmatmul.bf16.vlgmr.msrb.gmra.mxu3 %v1316_v24  ;;  %v1476_v3 = vsel %vm1471_vm5, %v1473_v33, %v1475_v60  ;;  %v1477_v24 = vrot.slane %v3204_v41, 3  ;;  %v1347_v25 = vrot.slane %v1345_v13, 2  ;;  %v1012_v18 = vsel %vm1005_vm4, %v1009_v59, %v1011_v22 }
  0x80   : > { %v1008_v47 = vsel %vm1005_vm4, %v1006_v48, %v1007_v49  ;;  %v1178_v41 = vsel %vm1005_vm4, %v1175_v19, %v1177_v36  ;;  %v1163_v48 = vunpack.c.l.b16 %v1124_v20  ;;  %v1015_v56 = vrot.slane %v3185_v14, 2  ;;  %s3420_s7 = scalar_lea.vmem %s3601_s2, %s2751_s6 }
  0x81   : > { %v1478_v30 = vsel %vm1471_vm5, %v1475_v60, %v1477_v24  ;;  %v1351_v15 = vor.u32 %v1350_v26, %v1347_v25 }
  0x82   : > { %v1169_v16 = vpack.c.b16 %v1163_v48, %v1163_v48 }
  0x8c   : > { %512 = vmatmul.bf16.gmra.mxu1 %v2885_v12  ;;  %968 = vmatmul.bf16.gmra.mxu0 %v886_v34  ;;  %v1170_v12 = vrot.slane %v3172_v57, 2  ;;  %v1339_v57 = vshll.u32 %v3221_v43, 16 }
  0x8e   : > { %v1172_v23 = vsel %vm1005_vm4, %v1170_v12, %v1171_v46  ;;  %v1341_v62 = vrot.slane %v1339_v57, 3  ;;  %v1481_v57 = vrot.slane %v3235_v6, 3 }
  0x8f   : > { %632 = vmatmul.bf16.gmra.mxu2 %v550_v32  ;;  %1419 = vmatmul.bf16.gmra.mxu3 %v1325_v40  ;;  %v1479_v40 = vrot.slane %v3221_v43, 3 }
  0x90   : > { %v1342_v4 = vor.u32 %v1341_v62, %v1338_v61 }
  0x91   : > { %v1480_v12 = vsel %vm1471_vm5, %v1477_v24, %v1479_v40  ;;  %v1482_v0 = vsel %vm1471_vm5, %v1479_v40, %v1481_v57 }
  0x92   : > { %v1343_v8 = vsel %vm1299_vm3, %v1333_v11, %v1342_v4  ;;  %v1352_v53 = vsel %vm1299_vm3, %v1342_v4, %v1351_v15  ;;  %v1179_v11 = vrot.slane %v1169_v16, 2 }
  0x94   : > { %v1180_v59 = vsel %vm1005_vm4, %v1177_v36, %v1179_v11 }
  0x9c   : > { %1078 = vmatmul.bf16.vlgmr.msra.gmra.mxu1 %v1008_v47  ;;  %1544 = vmatmul.bf16.vlgmr.msra.gmra.mxu0 %v1474_v54 }
  0x9f   : > { %1242 = vmatmul.bf16.vlgmr.msra.gmra.mxu2 %v1172_v23  ;;  %1424 = vmatmul.bf16.gmra.mxu3 %v1334_v55 }
  0xa9   : > { %v406_v1 = vpop.f32.mrf.mxu0  ;;  %v3230_v10 = vpop.f32.mrf.mxu1 }
  0xac   : > { %1083 = vmatmul.bf16.gmra.mxu1 %v1010_v2  ;;  %1549 = vmatmul.bf16.gmra.mxu0 %v1476_v3 }
  0xaf   : > { %1247 = vmatmul.bf16.gmra.mxu2 %v1174_v63  ;;  %1429 = vmatmul.bf16.gmra.mxu3 %v1343_v8  ;;  %v1016_v63 = vsel %vm1005_vm4, %v1013_v39, %v1015_v56 }
  0xb1   : > { %v408_v7 = vpop.f32.mrf.mxu0  ;;  %v3237_v9 = vpop.f32.mrf.mxu1 }
  0xb2   : > { %v777_v21 = vpop.f32.mrf.mxu3  ;;  %v3249_v31 = vpop.f32.mrf.mxu2 }
  0xb9   : > { %v411_v28 = vpop.f32.mrf.mxu0  ;;  %v3245_v29 = vpop.f32.mrf.mxu1 }
  0xba   : > { %v779_v32 = vpop.f32.mrf.mxu3  ;;  %v3255_v38 = vpop.f32.mrf.mxu2 }
  0xbc   : > { %1088 = vmatmul.bf16.gmra.mxu1 %v1012_v18  ;;  %1554 = vmatmul.bf16.gmra.mxu0 %v1478_v30 }
  0xbf   : > { %1252 = vmatmul.bf16.gmra.mxu2 %v1176_v27  ;;  %1434 = vmatmul.bf16.gmra.mxu3 %v1352_v53 }
  0xc1   : > { %v413_v34 = vpop.f32.mrf.mxu0  ;;  %v3252_v35 = vpop.f32.mrf.mxu1 }
  0xc2   : > { %v782_v37 = vpop.f32.mrf.mxu3 }
  0xc9   : > { %v493_v42 = vpop.f32.mrf.mxu1  ;;  %v949_v44 = vpop.f32.mrf.mxu0 }
  0xca   : > { %v494_v46 = vadd.f32 %v493_v42, %v406_v1  ;;  %v784_v49 = vpop.f32.mrf.mxu3 }
  0xcc   : > { %1093 = vmatmul.bf16.gmra.mxu1 %v1014_v45  ;;  %1559 = vmatmul.bf16.gmra.mxu0 %v1480_v12 }
  0xcf   : > { %1257 = vmatmul.bf16.gmra.mxu2 %v1178_v41 }
  0xd1   : > { %v495_v52 = vpop.f32.mrf.mxu1  ;;  %v951_v23 = vpop.f32.mrf.mxu0 }
  0xd2   : > { %v613_v50 = vpop.f32.mrf.mxu2  ;;  %v496_v47 = vadd.f32 %v495_v52, %v408_v7  ;;  %v787_v55 = vpop.f32.mrf.mxu3 }
  0xd3   : > { %v638_v33 = vadd.f32 %v613_v50, %v494_v46  ;;  %v2802_v46 = vmov 0  }
  0xd5   : > { %v802_v51 = vadd.f32 %v777_v21, %v638_v33  ;;  %v1590_v21 = vlaneseq }
  0xd7   : > { %v3263_v54 = vadd.f32 %v949_v44, %v802_v51  ;;  %v3276_v24 = vshrl.u32 %v1590_v21, 7 }
  0xd9   : > { %v498_v61 = vpop.f32.mrf.mxu1  ;;  %v954_v62 = vpop.f32.mrf.mxu0  ;;  %v1605_v15 = vshrl.u32 %v3276_v24, 16 }
  0xda   : > { %v615_v43 = vpop.f32.mrf.mxu2  ;;  %v499_v1 = vadd.f32 %v498_v61, %v411_v28  ;;  %v789_v3 = vpop.f32.mrf.mxu3  ;;  %v1604_v28 = vand.u32 65535, %v3276_v24 }
  0xdb   : > { %v639_v58 = vadd.f32 %v615_v43, %v496_v47  ;;  %v3283_v36 = vmul.u32 52429, %v1605_v15  ;;  %v1610_v42 = vmul.u32 52428, %v1605_v15 }
  0xdc   : > { %1098 = vmatmul.bf16.gmra.mxu1 %v1016_v63  ;;  %1564 = vmatmul.bf16.gmra.mxu0 %v1482_v0 }
  0xdd   : > { %v803_v60 = vadd.f32 %v779_v32, %v639_v58  ;;  %v1608_v32 = vmul.u32 52428, %v1604_v28  ;;  %v1613_v41 = vshll.u32 %v3283_v36, 16  ;;  %v1614_v21 = vshrl.u32 %v3283_v36, 16 }
  0xdf   : > { %1262 = vmatmul.bf16.gmra.mxu2 %v1180_v59  ;;  %v3270_v2 = vadd.f32 %v951_v23, %v803_v60  ;;  %v1612_v57 = vshrl.u32 %v1608_v32, 16 }
  0xe1   : > { %v500_v8 = vpop.f32.mrf.mxu1  ;;  %v956_v6 = vpop.f32.mrf.mxu0 }
  0xe2   : > { %v618_v14 = vpop.f32.mrf.mxu2  ;;  %v501_v7 = vadd.f32 %v500_v8, %v413_v34  ;;  %v3274_v17 = vpop.f32.mrf.mxu3  ;;  %v1607_v34 = vmul.u32 52429, %v1604_v28 }
  0xe3   : > { %v640_v4 = vadd.f32 %v618_v14, %v499_v1 }
  0xe5   : > { %v804_v5 = vadd.f32 %v782_v37, %v640_v4  ;;  %v1611_v37 = vshll.u32 %v1608_v32, 16 }
  0xe7   : > { %v3272_v13 = vadd.f32 %v954_v62, %v804_v5  ;;  %vm1615_vm6 = vc.u32 %v1607_v34, %v1611_v37  ;;  %v1617_v44 = vadd.s32 %v1611_v37, %v1607_v34 }
  0xe8   : > { %v1616_v48 = vsel %vm1615_vm6, 1, %v2802_v46 }
  0xe9   : > { %v503_v26 = vpop.f32.mrf.mxu1  ;;  %v959_v27 = vpop.f32.mrf.mxu0  ;;  %vm1619_vm7 = vc.u32 %v1617_v44, %v1613_v41  ;;  %v1618_v51 = vadd.s32 %v1616_v48, %v1610_v42 }
  0xea   : > { %v620_v19 = vpop.f32.mrf.mxu2  ;;  %v504_v18 = vadd.f32 %v503_v26, %v3230_v10  ;;  %v3285_v40 = vpop.f32.mrf.mxu3  ;;  %v3289_v10 = vadd.s32 8, %v3276_v24  ;;  %v1620_v47 = vsel %vm1619_vm7, 1, %v2802_v46 }
  0xeb   : > { %v641_v22 = vadd.f32 %v620_v19, %v501_v7  ;;  %v1622_v62 = vadd.s32 %v1620_v47, %v1618_v51 }
  0xec   : > { %v1633_v50 = vand.u32 65535, %v3289_v10  ;;  %v1634_v16 = vshrl.u32 %v3289_v10, 16 }
  0xed   : > { %v805_v25 = vadd.f32 %v784_v49, %v641_v22  ;;  %v1623_v22 = vadd.s32 %v1622_v62, %v1612_v57 }
  0xee   : > { %v1637_v52 = vmul.u32 52428, %v1633_v50  ;;  %v1636_v11 = vmul.u32 52429, %v1633_v50  ;;  %v1639_v58 = vmul.u32 52428, %v1634_v16 }
  0xef   : > { %v3280_v30 = vadd.f32 %v956_v6, %v805_v25 }
  0xf0   : > { %v1640_v56 = vshll.u32 %v1637_v52, 16  ;;  %v1641_v6 = vshrl.u32 %v1637_v52, 16 }
  0xf1   : > { %v505_v45 = vpop.f32.mrf.mxu1  ;;  %v961_v12 = vpop.f32.mrf.mxu0 }
  0xf2   : > { %v623_v53 = vpop.f32.mrf.mxu2  ;;  %v506_v49 = vadd.f32 %v505_v45, %v3237_v9  ;;  %v3299_v9 = vadd.s32 16, %v3276_v24  ;;  %v3301_v61 = vpop.f32.mrf.mxu3  ;;  %vm1644_vm8 = vc.u32 %v1636_v11, %v1640_v56  ;;  %v1646_v63 = vadd.s32 %v1640_v56, %v1636_v11 }
  0xf3   : > { %v642_v39 = vadd.f32 %v623_v53, %v504_v18  ;;  %v1645_v14 = vsel %vm1644_vm8, 1, %v2802_v46 }
  0xf4   : > { %v1662_v4 = vand.u32 65535, %v3299_v9  ;;  %v1647_v8 = vadd.s32 %v1645_v14, %v1639_v58 }
  0xf5   : > { %v806_v20 = vadd.f32 %v787_v55, %v642_v39  ;;  %v1638_v55 = vmul.u32 52429, %v1634_v16 }
  0xf6   : > { %v1666_v19 = vmul.u32 52428, %v1662_v4  ;;  %v1665_v18 = vmul.u32 52429, %v1662_v4 }
  0xf7   : > { %v3294_v33 = vadd.f32 %v959_v27, %v806_v20  ;;  %v1642_v59 = vshll.u32 %v1638_v55, 16  ;;  %v1643_v28 = vshrl.u32 %v1638_v55, 16  ;;  %v1624_v20 = vadd.s32 %v1623_v22, %v1614_v21 }
  0xf8   : > { %v1669_v32 = vshll.u32 %v1666_v19, 16  ;;  %v1670_v11 = vshrl.u32 %v1666_v19, 16 }
  0xf9   : > { %v508_v0 = vpop.f32.mrf.mxu1  ;;  %v964_v1 = vpop.f32.mrf.mxu0  ;;  %vm1648_vm9 = vc.u32 %v1646_v63, %v1642_v59  ;;  %v1625_v51 = vshrl.u32 %v1624_v20, 3  ;;  %v3325_v59 = vadd.s32 32, %v3276_v24 }
  0xfa   : > { %v625_v23 = vpop.f32.mrf.mxu2  ;;  %v509_v5 = vadd.f32 %v508_v0, %v3245_v29  ;;  %v1649_v7 = vsel %vm1648_vm9, 1, %v2802_v46  ;;  %vm1673_vm10 = vc.u32 %v1665_v18, %v1669_v32  ;;  %v1675_v39 = vadd.s32 %v1669_v32, %v1665_v18 }
  0xfb   : > { %v643_v43 = vadd.f32 %v625_v23, %v506_v49  ;;  %v1651_v25 = vadd.s32 %v1649_v7, %v1647_v8  ;;  %v1674_v45 = vsel %vm1673_vm10, 1, %v2802_v46  ;;  %v3317_v49 = vpop.f32.mrf.mxu3  ;;  %v1626_v62 = vmul.u32 10, %v1625_v51 }
  0xfc   : > { %v1720_v21 = vand.u32 65535, %v3325_v59 }
  0xfd   : > { %v807_v60 = vadd.f32 %v789_v3, %v643_v43  ;;  %v1663_v3 = vshrl.u32 %v3299_v9, 16  ;;  %v1652_v53 = vadd.s32 %v1651_v25, %v1641_v6 }
  0xff   : > { %v3309_v26 = vadd.f32 %v961_v12, %v807_v60  ;;  %v1667_v15 = vmul.u32 52429, %v1663_v3  ;;  %v1668_v34 = vmul.u32 52428, %v1663_v3  ;;  %v1653_v44 = vadd.s32 %v1652_v53, %v1643_v28 }
 0x100   : > { %v3314_v12 = vadd.s32 24, %v3276_v24 }
 0x101   : > { %v1671_v37 = vshll.u32 %v1667_v15, 16  ;;  %v510_v42 = vpop.f32.mrf.mxu1  ;;  %v966_v36 = vpop.f32.mrf.mxu0  ;;  %v1676_v50 = vadd.s32 %v1674_v45, %v1668_v34  ;;  %v1654_v47 = vshrl.u32 %v1653_v44, 3  ;;  %v1672_v8 = vshrl.u32 %v1667_v15, 16 }
 0x102   : > { %v628_v27 = vpop.f32.mrf.mxu2  ;;  %v511_v48 = vadd.f32 %v510_v42, %v3252_v35  ;;  %v1692_v52 = vshrl.u32 %v3314_v12, 16  ;;  %v1721_v15 = vshrl.u32 %v3325_v59, 16 }
 0x103   : > { %v644_v29 = vadd.f32 %v628_v27, %v509_v5  ;;  %vm1677_vm11 = vc.u32 %v1675_v39, %v1671_v37  ;;  %v1655_v5 = vmul.u32 10, %v1654_v47  ;;  %v3331_v22 = vpop.f32.mrf.mxu3  ;;  %v1723_v37 = vmul.u32 52429, %v1720_v21 }
 0x104   : > { %v1678_v16 = vsel %vm1677_vm11, 1, %v2802_v46  ;;  %v1696_v35 = vmul.u32 52429, %v1692_v52  ;;  %v1697_v63 = vmul.u32 52428, %v1692_v52  ;;  %v1724_v39 = vmul.u32 52428, %v1720_v21 }
 0x105   : > { %v808_v41 = vadd.f32 %v3274_v17, %v644_v29  ;;  %v1691_v17 = vand.u32 65535, %v3314_v12  ;;  %v1680_v56 = vadd.s32 %v1678_v16, %v1676_v50  ;;  %v3337_v28 = vsub.s32 %v3289_v10, %v1655_v5 }
 0x106   : > { %v1700_v6 = vshll.u32 %v1696_v35, 16  ;;  %v1701_v53 = vshrl.u32 %v1696_v35, 16  ;;  %v1727_v50 = vshll.u32 %v1724_v39, 16  ;;  %v3347_v16 = vadd.s32 40, %v3276_v24 }
 0x107   : > { %v3322_v55 = vadd.f32 %v964_v1, %v808_v41  ;;  %v1694_v57 = vmul.u32 52429, %v1691_v17  ;;  %v1695_v58 = vmul.u32 52428, %v1691_v17  ;;  %v1681_v7 = vadd.s32 %v1680_v56, %v1670_v11 }
 0x108   : > { %v1725_v41 = vmul.u32 52429, %v1721_v15  ;;  %vm1892_vm0 = vcmp.ne.s32.totalorder %v3337_v28, 0  ;;  %vm1731_vm1 = vc.u32 %v1723_v37, %v1727_v50  ;;  %vm1902_vm2 = vcmp.lt.s32.totalorder %v3337_v28, 0 }
 0x109   : > { %v1698_v0 = vshll.u32 %v1695_v58, 16  ;;  %v513_v14 = vpop.f32.mrf.mxu1  ;;  %v969_v4 = vpop.f32.mrf.mxu0  ;;  %v1699_v18 = vshrl.u32 %v1695_v58, 16  ;;  %v1682_v29 = vadd.s32 %v1681_v7, %v1672_v8  ;;  %v1732_v47 = vsel %vm1731_vm1, 1, %v2802_v46  ;;  %vm3377_vm5 = vmand %vm1902_vm2, %vm1892_vm0 }
 0x10a   : > { %v630_v23 = vpop.f32.mrf.mxu2  ;;  %v514_v1 = vadd.f32 %v513_v14, %v3249_v31  ;;  %v1733_v11 = vadd.s32 %v1727_v50, %v1723_v37  ;;  %v1750_v35 = vshrl.u32 %v3347_v16, 16 }
 0x10b   : > { %v645_v43 = vadd.f32 %v630_v23, %v511_v48  ;;  %vm1702_vm12 = vc.u32 %v1694_v57, %v1698_v0  ;;  %v1704_v3 = vadd.s32 %v1698_v0, %v1694_v57  ;;  %v1726_v48 = vmul.u32 52428, %v1721_v15 }
 0x10c   : > { %v1703_v19 = vsel %vm1702_vm12, 1, %v2802_v46 }
 0x10d   : > { %v809_v60 = vadd.f32 %v3285_v40, %v645_v43  ;;  %v3334_v40 = vsub.s32 %v3276_v24, %v1626_v62  ;;  %v1705_v25 = vadd.s32 %v1703_v19, %v1697_v63  ;;  %vm1706_vm13 = vc.u32 %v1704_v3, %v1700_v6  ;;  %v3359_v62 = vpop.f32.mrf.mxu3 }
 0x10e   : > { %v1707_v31 = vsel %vm1706_vm13, 1, %v2802_v46  ;;  %v1749_v43 = vand.u32 65535, %v3347_v16  ;;  %v1734_v58 = vadd.s32 %v1732_v47, %v1726_v48  ;;  %v1728_v63 = vshrl.u32 %v1724_v39, 16 }
 0x10f   : > { %v1709_v34 = vadd.s32 %v1707_v31, %v1705_v25  ;;  %v3341_v20 = vadd.f32 %v966_v36, %v809_v60  ;;  %vm1891_vm14 = vcmp.ne.s32.totalorder %v3334_v40, 0  ;;  %vm1901_vm15 = vcmp.lt.s32.totalorder %v3334_v40, 0 }
 0x110   : > { %v1921_v17 = vadd.s32 10, %v3334_v40  ;;  %v1729_v36 = vshll.u32 %v1725_v41, 16  ;;  %v1753_v0 = vmul.u32 52428, %v1749_v43  ;;  %vm3365_vm4 = vmand %vm1901_vm15, %vm1891_vm14  ;;  %v1752_v8 = vmul.u32 52429, %v1749_v43 }
 0x111   : > { %v515_v10 = vpop.f32.mrf.mxu1  ;;  %v971_v44 = vpop.f32.mrf.mxu0  ;;  %v1710_v45 = vadd.s32 %v1709_v34, %v1699_v18  ;;  %v3370_v6 = vmul.u32 52429, %v1750_v35  ;;  %v1730_v3 = vshrl.u32 %v1725_v41, 16  ;;  %v1755_v31 = vmul.u32 52428, %v1750_v35 }
 0x112   : > { %v633_v27 = vpop.f32.mrf.mxu2  ;;  %v516_v51 = vadd.f32 %v515_v10, %v3255_v38  ;;  %v1922_v38 = vadd.s32 10, %v3337_v28  ;;  %vm1735_vm3 = vc.u32 %v1733_v11, %v1729_v36  ;;  %v1756_v21 = vshll.u32 %v1753_v0, 16 }
 0x113   : > { %v646_v32 = vadd.f32 %v633_v27, %v514_v1  ;;  %v1711_v23 = vadd.s32 %v1710_v45, %v1701_v53  ;;  %v1736_v5 = vsel %vm1735_vm3, 1, %v2802_v46  ;;  %v1758_v15 = vshll.u32 %v3370_v6, 16 }
 0x114   : > { %v1738_v19 = vadd.s32 %v1736_v5, %v1734_v58  ;;  %vm1760_vm6 = vc.u32 %v1752_v8, %v1756_v21  ;;  %v1931_v53 = vsel %vm3365_vm4, %v1921_v17, %v3334_v40  ;;  %v1932_v34 = vsel %vm3377_vm5, %v1922_v38, %v3337_v28 }
 0x115   : > { %v810_v42 = vadd.f32 %v3301_v61, %v646_v32  ;;  %v1683_v61 = vshrl.u32 %v1682_v29, 3  ;;  %v1712_v57 = vshrl.u32 %v1711_v23, 3  ;;  %v1762_v29 = vadd.s32 %v1756_v21, %v1752_v8  ;;  %v3412_v47 = vpop.f32.mrf.mxu3 }
 0x116   : > { %v1739_v32 = vadd.s32 %v1738_v19, %v1728_v63  ;;  %v1761_v39 = vsel %vm1760_vm6, 1, %v2802_v46  ;;  %v1757_v45 = vshrl.u32 %v1753_v0, 16  ;;  %vm3400_vm8 = vcmp.lt.s32.totalorder %v1931_v53, 8 }
 0x117   : > { %v3351_v52 = vadd.f32 %v969_v4, %v810_v42  ;;  %v1684_v4 = vmul.u32 10, %v1683_v61  ;;  %v1713_v18 = vmul.u32 10, %v1712_v57  ;;  %v1763_v42 = vadd.s32 %v1761_v39, %v1755_v31 }
 0x118   : > { %v1740_v41 = vadd.s32 %v1739_v32, %v1730_v3  ;;  %vm1764_vm7 = vc.u32 %v1762_v29, %v1758_v15  ;;  %vm3405_vm9 = vcmp.lt.s32.totalorder %v1932_v34, 8  ;;  %v3444_v21 = vadd.s32 56, %v3276_v24 }
 0x119   : > { %v1079_v25 = vpop.f32.mrf.mxu1  ;;  %v1545_v27 = vpop.f32.mrf.mxu0  ;;  %v3390_v37 = vsub.s32 %v3299_v9, %v1684_v4  ;;  %v1765_v40 = vsel %vm1764_vm7, 1, %v2802_v46  ;;  %v1714_v9 = vsub.s32 %v3314_v12, %v1713_v18  ;;  %v1759_v12 = vshrl.u32 %v3370_v6, 16 }
 0x11a   : > { %v635_v56 = vpop.f32.mrf.mxu2  ;;  %v1741_v36 = vshrl.u32 %v1740_v41, 3  ;;  %v2803_v4 = vmov 0.0  }
 0x11b   : > { %v647_v60 = vadd.f32 %v635_v56, %v516_v51  ;;  %v1767_v51 = vadd.s32 %v1765_v40, %v1763_v42  ;;  %vm1893_vm10 = vcmp.ne.s32.totalorder %v3390_v37, 0  ;;  %vm1903_vm11 = vcmp.lt.s32.totalorder %v3390_v37, 0 }
 0x11c   : > { %vm1894_vm12 = vcmp.ne.s32.totalorder %v1714_v9, 0  ;;  %vm1904_vm13 = vcmp.lt.s32.totalorder %v1714_v9, 0  ;;  %v1742_v63 = vmul.u32 10, %v1741_v36  ;;  %v2631_v5 = vsel %vm3400_vm8, 1.0, %v2803_v4  ;;  %vm3435_vm14 = vmand %vm1903_vm11, %vm1893_vm10 }
 0x11d   : > { %v811_v1 = vadd.f32 %v3317_v49, %v647_v60  ;;  %v1104_v49 = vadd.f32 %v1079_v25, %v3263_v54  ;;  %v3394_v54 = vadd.s32 48, %v3276_v24  ;;  %v1768_v56 = vadd.s32 %v1767_v51, %v1757_v45  ;;  %vm3439_vm15 = vmand %vm1904_vm13, %vm1894_vm12 }
 0x11e   : > { %v1923_v60 = vadd.s32 10, %v3390_v37  ;;  %v1924_v8 = vadd.s32 10, %v1714_v9  ;;  %v3453_v31 = vsub.s32 %v3325_v59, %v1742_v63  ;;  %v1808_v59 = vshrl.u32 %v3444_v21, 16 }
 0x11f   : > { %v3398_v48 = vadd.f32 %v971_v44, %v811_v1  ;;  %v1778_v61 = vand.u32 65535, %v3394_v54  ;;  %v1779_v23 = vshrl.u32 %v3394_v54, 16  ;;  %v1769_v3 = vadd.s32 %v1768_v56, %v1759_v12 }
 0x120   : > { %v1933_v18 = vsel %vm3435_vm14, %v1923_v60, %v3390_v37  ;;  %v1934_v29 = vsel %vm3439_vm15, %v1924_v8, %v1714_v9  ;;  %v1807_v37 = vand.u32 65535, %v3444_v21  ;;  %vm1895_vm4 = vcmp.ne.s32.totalorder %v3453_v31, 0 }
 0x121   : > { %v1081_v11 = vpop.f32.mrf.mxu1  ;;  %v1547_v43 = vpop.f32.mrf.mxu0  ;;  %v1781_v38 = vmul.u32 52429, %v1778_v61  ;;  %v1782_v57 = vmul.u32 52428, %v1778_v61  ;;  %v1784_v6 = vmul.u32 52428, %v1779_v23  ;;  %v1770_v41 = vshrl.u32 %v1769_v3, 3 }
 0x122   : > { %v1243_v10 = vpop.f32.mrf.mxu2  ;;  %v1105_v35 = vadd.f32 %v1081_v11, %v3270_v2  ;;  %vm3463_vm2 = vcmp.lt.s32.totalorder %v1933_v18, 8  ;;  %vm3467_vm3 = vcmp.lt.s32.totalorder %v1934_v29, 8  ;;  %vm1905_vm5 = vcmp.lt.s32.totalorder %v3453_v31, 0 }
 0x123   : > { %v1268_v50 = vadd.f32 %v1243_v10, %v1104_v49  ;;  %v1785_v0 = vshll.u32 %v1782_v57, 16  ;;  %v1786_v28 = vshrl.u32 %v1782_v57, 16  ;;  %v1811_v17 = vmul.u32 52428, %v1807_v37  ;;  %vm3496_vm7 = vmand %vm1905_vm5, %vm1895_vm4 }
 0x124   : > { %v3474_v36 = vmul.u32 52429, %v1808_v59  ;;  %v3477_v12 = vadd.s32 64, %v3276_v24 }
 0x125   : > { %v1440_v44 = vadd.f32 %v3331_v22, %v1268_v50  ;;  %v3422_v22 = vmul.u32 52429, %v1779_v23  ;;  %vm1789_vm0 = vc.u32 %v1781_v38, %v1785_v0  ;;  %v1791_v19 = vadd.s32 %v1785_v0, %v1781_v38 }
 0x126   : > { %v1790_v15 = vsel %vm1789_vm0, 1, %v2802_v46  ;;  %v1771_v23 = vmul.u32 10, %v1770_v41  ;;  %v1814_v60 = vshll.u32 %v1811_v17, 16  ;;  %v1816_v63 = vshll.u32 %v3474_v36, 16 }
 0x127   : > { %v1570_v58 = vadd.f32 %v1545_v27, %v1440_v44  ;;  %v1787_v14 = vshll.u32 %v3422_v22, 16  ;;  %v2632_v27 = vsel %vm3405_vm9, 1.0, %v2803_v4  ;;  %v1792_v53 = vadd.s32 %v1790_v15, %v1784_v6 }
 0x128   : > { %v1810_v44 = vmul.u32 52429, %v1807_v37  ;;  %v1788_v38 = vshrl.u32 %v3422_v22, 16  ;;  %v1925_v6 = vadd.s32 10, %v3453_v31  ;;  %v1815_v41 = vshrl.u32 %v1811_v17, 16 }
 0x129   : > { %1580 = vst [vmem:[%s3420_s7] sm:$0xff] %v1570_v58  ;;  %vm1793_vm1 = vc.u32 %v1791_v19, %v1787_v14  ;;  %v1971_v49 = vmul.f32 %v2631_v5, %v1570_v58  ;;  %v1084_v34 = vpop.f32.mrf.mxu1  ;;  %v1550_v39 = vpop.f32.mrf.mxu0  ;;  %v1836_v5 = vand.u32 65535, %v3477_v12 }
 0x12a   : > { %v1245_v1 = vpop.f32.mrf.mxu2  ;;  %v1794_v42 = vsel %vm1793_vm1, 1, %v2802_v46  ;;  %v1106_v45 = vadd.f32 %v1084_v34, %v3272_v13  ;;  %vm1818_vm6 = vc.u32 %v1810_v44, %v1814_v60  ;;  %v1820_v22 = vadd.s32 %v1814_v60, %v1810_v44 }
 0x12b   : > { %v1269_v25 = vadd.f32 %v1245_v1, %v1105_v35  ;;  %v1796_v9 = vadd.s32 %v1794_v42, %v1792_v53  ;;  %v1996_v13 = vmul.f32 %v1971_v49, %v1570_v58  ;;  %v1813_v35 = vmul.u32 52428, %v1808_v59 }
 0x12c   : > { %v2633_v58 = vsel %vm3463_vm2, 1.0, %v2803_v4  ;;  %v1837_v1 = vshrl.u32 %v3477_v12, 16  ;;  %vm1822_vm8 = vc.u32 %v1820_v22, %v1816_v63 }
 0x12d   : > { %v1441_v32 = vadd.f32 %v3359_v62, %v1269_v25  ;;  %v1422_v62 = vpop.f32.mrf.mxu3  ;;  %v1797_v57 = vadd.s32 %v1796_v9, %v1786_v28  ;;  %v1819_v25 = vsel %vm1818_vm6, 1, %v2802_v46 }
 0x12e   : > { %v1821_v15 = vadd.s32 %v1819_v25, %v1813_v35  ;;  %v3506_v29 = vmul.u32 52429, %v1837_v1  ;;  %v1842_v50 = vmul.u32 52428, %v1837_v1 }
 0x12f   : > { %v1571_v10 = vadd.f32 %v1547_v43, %v1441_v32  ;;  %v1798_v18 = vadd.s32 %v1797_v57, %v1788_v38  ;;  %v1840_v32 = vmul.u32 52428, %v1836_v5 }
 0x131   : > { %1581 = vst [vmem:[%s3420_s7 + $0x8] sm:$0xff] %v1571_v10  ;;  %v1972_v51 = vmul.f32 %v2632_v27, %v1571_v10  ;;  %v1086_v2 = vpop.f32.mrf.mxu1  ;;  %v1552_v8 = vpop.f32.mrf.mxu0  ;;  %v3502_v27 = vsub.s32 %v3347_v16, %v1771_v23  ;;  %v1839_v16 = vmul.u32 52429, %v1836_v5  ;;  %v1799_v40 = vshrl.u32 %v1798_v18, 3 }
 0x132   : > { %v1248_v61 = vpop.f32.mrf.mxu2  ;;  %v1107_v3 = vadd.f32 %v1086_v2, %v3280_v30 }
 0x133   : > { %v1981_v11 = vadd.f32 %v1972_v51, %v1971_v49  ;;  %v1997_v43 = vmul.f32 %v1972_v51, %v1571_v10  ;;  %v1270_v56 = vadd.f32 %v1248_v61, %v1106_v45  ;;  %v1823_v49 = vsel %vm1822_vm8, 1, %v2802_v46 }
 0x134   : > { %v1825_v42 = vadd.s32 %v1823_v49, %v1821_v15  ;;  %v1843_v45 = vshll.u32 %v1840_v32, 16  ;;  %vm1896_vm9 = vcmp.ne.s32.totalorder %v3502_v27, 0  ;;  %vm1906_vm10 = vcmp.lt.s32.totalorder %v3502_v27, 0 }
 0x135   : > { %v2006_v0 = vadd.f32 %v1997_v43, %v1996_v13  ;;  %v1442_v14 = vadd.f32 %v3412_v47, %v1270_v56  ;;  %v2634_v47 = vsel %vm3467_vm3, 1.0, %v2803_v4  ;;  %v1425_v34 = vpop.f32.mrf.mxu3  ;;  %v1845_v51 = vshll.u32 %v3506_v29, 16  ;;  %vm3526_vm14 = vmand %vm1906_vm10, %vm1896_vm9 }
 0x136   : > { %v1817_v61 = vshrl.u32 %v3474_v36, 16  ;;  %v1826_v23 = vadd.s32 %v1825_v42, %v1815_v41  ;;  %vm1847_vm11 = vc.u32 %v1839_v16, %v1843_v45  ;;  %v1849_v44 = vadd.s32 %v1843_v45, %v1839_v16 }
 0x137   : > { %v1572_v7 = vadd.f32 %v1550_v39, %v1442_v14  ;;  %v1935_v39 = vsel %vm3496_vm7, %v1925_v6, %v3453_v31  ;;  %v3515_v31 = vadd.s32 72, %v3276_v24  ;;  %v1926_v56 = vadd.s32 10, %v3502_v27 }
 0x138   : > { %vm1945_vm12 = vcmp.lt.s32.totalorder %v1935_v39, 8  ;;  %v1848_v38 = vsel %vm1847_vm11, 1, %v2802_v46  ;;  %vm1851_vm13 = vc.u32 %v1849_v44, %v1845_v51  ;;  %v1844_v14 = vshrl.u32 %v1840_v32, 16 }
 0x139   : > { %1582 = vst [vmem:[%s3420_s7 + $0x10] sm:$0xff] %v1572_v7  ;;  %v1973_v30 = vmul.f32 %v2633_v58, %v1572_v7  ;;  %v1089_v17 = vpop.f32.mrf.mxu1  ;;  %v1555_v13 = vpop.f32.mrf.mxu0  ;;  %v1850_v57 = vadd.s32 %v1848_v38, %v1842_v50  ;;  %v1865_v35 = vand.u32 65535, %v3515_v31  ;;  %v2635_v63 = vsel %vm1945_vm12, 1.0, %v2803_v4 }
 0x13a   : > { %v1250_v53 = vpop.f32.mrf.mxu2  ;;  %v1108_v43 = vadd.f32 %v1089_v17, %v3294_v33  ;;  %v1852_v33 = vsel %vm1851_vm13, 1, %v2802_v46  ;;  %v1866_v58 = vshrl.u32 %v3515_v31, 16  ;;  %v1936_v1 = vsel %vm3526_vm14, %v1926_v56, %v3502_v27 }
 0x13b   : > { %v1982_v37 = vadd.f32 %v1981_v11, %v1973_v30  ;;  %v1998_v59 = vmul.f32 %v1973_v30, %v1572_v7  ;;  %v1271_v10 = vadd.f32 %v1250_v53, %v1107_v3  ;;  %v1854_v6 = vadd.s32 %v1852_v33, %v1850_v57 }
 0x13c   : > { %v1868_v7 = vmul.u32 52429, %v1865_v35  ;;  %v1869_v3 = vmul.u32 52428, %v1865_v35  ;;  %v1846_v15 = vshrl.u32 %v3506_v29, 16  ;;  %v1871_v39 = vmul.u32 52428, %v1866_v58 }
 0x13d   : > { %v2007_v28 = vadd.f32 %v2006_v0, %v1998_v59  ;;  %v1443_v9 = vadd.f32 %v1422_v62, %v1271_v10  ;;  %v1800_v62 = vmul.u32 10, %v1799_v40  ;;  %v1827_v0 = vadd.s32 %v1826_v23, %v1817_v61  ;;  %v1427_v22 = vpop.f32.mrf.mxu3 }
 0x13e   : > { %v1855_v53 = vadd.s32 %v1854_v6, %v1844_v14  ;;  %v1872_v41 = vshll.u32 %v1869_v3, 16  ;;  %vm3540_vm15 = vcmp.lt.s32.totalorder %v1936_v1, 8  ;;  %v1873_v51 = vshrl.u32 %v1869_v3, 16 }
 0x13f   : > { %v1573_v11 = vadd.f32 %v1552_v8, %v1443_v9  ;;  %v1801_v18 = vsub.s32 %v3394_v54, %v1800_v62  ;;  %v1828_v32 = vshrl.u32 %v1827_v0, 3  ;;  %v2636_v61 = vsel %vm3540_vm15, 1.0, %v2803_v4 }
 0x140   : > { %vm1876_vm0 = vc.u32 %v1868_v7, %v1872_v41  ;;  %v1856_v10 = vadd.s32 %v1855_v53, %v1846_v15  ;;  %v1878_v45 = vadd.s32 %v1872_v41, %v1868_v7 }
 0x141   : > { %1583 = vst [vmem:[%s3420_s7 + $0x18] sm:$0xff] %v1573_v11  ;;  %v1974_v24 = vmul.f32 %v2634_v47, %v1573_v11  ;;  %v1870_v47 = vmul.u32 52429, %v1866_v58  ;;  %v1091_v30 = vpop.f32.mrf.mxu1  ;;  %v1557_v49 = vpop.f32.mrf.mxu0  ;;  %vm1897_vm1 = vcmp.ne.s32.totalorder %v1801_v18, 0  ;;  %vm1907_vm2 = vcmp.lt.s32.totalorder %v1801_v18, 0 }
 0x142   : > { %v1253_v60 = vpop.f32.mrf.mxu2  ;;  %v1109_v16 = vadd.f32 %v1091_v30, %v3309_v26  ;;  %v1877_v54 = vsel %vm1876_vm0, 1, %v2802_v46  ;;  %v1829_v59 = vmul.u32 10, %v1828_v32  ;;  %v1927_v9 = vadd.s32 10, %v1801_v18  ;;  %vm3551_vm4 = vmand %vm1907_vm2, %vm1897_vm1 }
 0x143   : > { %v1983_v5 = vadd.f32 %v1982_v37, %v1974_v24  ;;  %v1999_v2 = vmul.f32 %v1974_v24, %v1573_v11  ;;  %v1272_v8 = vadd.f32 %v1253_v60, %v1108_v43  ;;  %v1874_v37 = vshll.u32 %v1870_v47, 16 }
 0x144   : > { %v1879_v40 = vadd.s32 %v1877_v54, %v1871_v39  ;;  %v1830_v56 = vsub.s32 %v3444_v21, %v1829_v59  ;;  %v1857_v62 = vshrl.u32 %v1856_v10, 3  ;;  %v1875_v38 = vshrl.u32 %v1870_v47, 16 }
 0x145   : > { %v2008_v19 = vadd.f32 %v2007_v28, %v1999_v2  ;;  %v1444_v25 = vadd.f32 %v1425_v34, %v1272_v8  ;;  %vm1880_vm3 = vc.u32 %v1878_v45, %v1874_v37  ;;  %v1430_v11 = vpop.f32.mrf.mxu3  ;;  %v1937_v35 = vsel %vm3551_vm4, %v1927_v9, %v1801_v18 }
 0x146   : > { %v1881_v44 = vsel %vm1880_vm3, 1, %v2802_v46  ;;  %vm1898_vm5 = vcmp.ne.s32.totalorder %v1830_v56, 0  ;;  %vm1908_vm6 = vcmp.lt.s32.totalorder %v1830_v56, 0  ;;  %v1858_v46 = vmul.u32 10, %v1857_v62 }
 0x147   : > { %v1574_v42 = vadd.f32 %v1555_v13, %v1444_v25  ;;  %v1883_v24 = vadd.s32 %v1881_v44, %v1879_v40  ;;  %vm1947_vm7 = vcmp.lt.s32.totalorder %v1937_v35, 8  ;;  %v1928_v2 = vadd.s32 10, %v1830_v56  ;;  %vm3561_vm8 = vmand %vm1908_vm6, %vm1898_vm5 }
 0x148   : > { %v1859_v7 = vsub.s32 %v3477_v12, %v1858_v46  ;;  %vm2021_vm2 = vcmask 1040384  }
 0x149   : > { %1584 = vst [vmem:[%s3420_s7 + $0x20] sm:$0xff] %v1574_v42  ;;  %v1975_v34 = vmul.f32 %v2635_v63, %v1574_v42  ;;  %v1094_v43 = vpop.f32.mrf.mxu1  ;;  %v1560_v33 = vpop.f32.mrf.mxu0  ;;  %v1884_v60 = vadd.s32 %v1883_v24, %v1873_v51  ;;  %v1938_v18 = vsel %vm3561_vm8, %v1928_v2, %v1830_v56 }
 0x14a   : > { %v1255_v29 = vpop.f32.mrf.mxu2  ;;  %v1110_v57 = vadd.f32 %v1094_v43, %v3322_v55  ;;  %vm1899_vm9 = vcmp.ne.s32.totalorder %v1859_v7, 0  ;;  %vm1909_vm10 = vcmp.lt.s32.totalorder %v1859_v7, 0  ;;  %vm1948_vm11 = vcmp.lt.s32.totalorder %v1938_v18, 8 }
 0x14b   : > { %v1984_v50 = vadd.f32 %v1983_v5, %v1975_v34  ;;  %v2000_v28 = vmul.f32 %v1975_v34, %v1574_v42  ;;  %v1273_v26 = vadd.f32 %v1255_v29, %v1109_v16  ;;  %v1885_v14 = vadd.s32 %v1884_v60, %v1875_v38  ;;  %vm3571_vm12 = vmand %vm1909_vm10, %vm1899_vm9 }
 0x14c   : > { %v1929_v12 = vadd.s32 10, %v1859_v7  ;;  %v2638_v27 = vsel %vm1948_vm11, 1.0, %v2803_v4 }
 0x14d   : > { %v2009_v17 = vadd.f32 %v2008_v19, %v2000_v28  ;;  %v1445_v13 = vadd.f32 %v1427_v22, %v1273_v26  ;;  %v2637_v22 = vsel %vm1947_vm7, 1.0, %v2803_v4  ;;  %v1886_v3 = vshrl.u32 %v1885_v14, 3  ;;  %v1432_v25 = vpop.f32.mrf.mxu3 }
 0x14e   : > { %v1939_v59 = vsel %vm3571_vm12, %v1929_v12, %v1859_v7 }
 0x14f   : > { %v1575_v36 = vadd.f32 %v1557_v49, %v1445_v13  ;;  %v1887_v32 = vmul.u32 10, %v1886_v3  ;;  %vm1949_vm15 = vcmp.lt.s32.totalorder %v1939_v59, 8 }
 0x151   : > { %1585 = vst [vmem:[%s3420_s7 + $0x28] sm:$0xff] %v1575_v36  ;;  %v1976_v63 = vmul.f32 %v2636_v61, %v1575_v36  ;;  %v1096_v1 = vpop.f32.mrf.mxu1  ;;  %v1562_v30 = vpop.f32.mrf.mxu0  ;;  %v1888_v34 = vsub.s32 %v3515_v31, %v1887_v32 }
 0x152   : > { %v1258_v0 = vpop.f32.mrf.mxu2  ;;  %v1111_v19 = vadd.f32 %v1096_v1, %v3341_v20 }
 0x153   : > { %v1985_v58 = vadd.f32 %v1984_v50, %v1976_v63  ;;  %v2001_v21 = vmul.f32 %v1976_v63, %v1575_v36  ;;  %v1274_v5 = vadd.f32 %v1258_v0, %v1110_v57  ;;  %vm1900_vm13 = vcmp.ne.s32.totalorder %v1888_v34, 0 }
 0x154   : > { %vm1910_vm14 = vcmp.lt.s32.totalorder %v1888_v34, 0  ;;  %v1930_v51 = vadd.s32 10, %v1888_v34 }
 0x155   : > { %v2010_v8 = vadd.f32 %v2009_v17, %v2001_v21  ;;  %v1446_v55 = vadd.f32 %v1430_v11, %v1274_v5  ;;  %v1435_v45 = vpop.f32.mrf.mxu3  ;;  %vm1920_vm0 = vmand %vm1910_vm14, %vm1900_vm13 }
 0x156   : > { %v1940_v44 = vsel %vm1920_vm0, %v1930_v51, %v1888_v34 }
 0x157   : > { %v1576_v47 = vadd.f32 %v1560_v33, %v1446_v55  ;;  %vm1950_vm1 = vcmp.lt.s32.totalorder %v1940_v44, 8 }
 0x158   : > { %v2640_v35 = vsel %vm1950_vm1, 1.0, %v2803_v4 }
 0x159   : > { %1586 = vst [vmem:[%s3420_s7 + $0x30] sm:$0xff] %v1576_v47  ;;  %v1977_v15 = vmul.f32 %v2637_v22, %v1576_v47  ;;  %v1099_v37 = vpop.f32.mrf.mxu1  ;;  %v1565_v9 = vpop.f32.mrf.mxu0 }
 0x15a   : > { %v1260_v49 = vpop.f32.mrf.mxu2  ;;  %v1112_v29 = vadd.f32 %v1099_v37, %v3351_v52  ;;  %v2639_v52 = vsel %vm1949_vm15, 1.0, %v2803_v4 }
 0x15b   : > { %v1986_v53 = vadd.f32 %v1985_v58, %v1977_v15  ;;  %v2002_v39 = vmul.f32 %v1977_v15, %v1576_v47  ;;  %v1275_v41 = vadd.f32 %v1260_v49, %v1111_v19 }
 0x15d   : > { %v2011_v42 = vadd.f32 %v2010_v8, %v2002_v39  ;;  %v1447_v16 = vadd.f32 %v1432_v25, %v1275_v41  ;;  %v1437_v24 = vpop.f32.mrf.mxu3 }
 0x15f   : > { %v1577_v54 = vadd.f32 %v1562_v30, %v1447_v16 }
 0x161   : > { %1587 = vst [vmem:[%s3420_s7 + $0x38] sm:$0xff] %v1577_v54  ;;  %v1978_v10 = vmul.f32 %v2638_v27, %v1577_v54  ;;  %v1101_v13 = vpop.f32.mrf.mxu1  ;;  %v1567_v33 = vpop.f32.mrf.mxu0 }
 0x162   : > { %v1263_v40 = vpop.f32.mrf.mxu2  ;;  %v1113_v23 = vadd.f32 %v1101_v13, %v3398_v48 }
 0x163   : > { %v1987_v50 = vadd.f32 %v1986_v53, %v1978_v10  ;;  %v2003_v28 = vmul.f32 %v1978_v10, %v1577_v54  ;;  %v1276_v26 = vadd.f32 %v1263_v40, %v1112_v29 }
 0x165   : > { %v2012_v31 = vadd.f32 %v2011_v42, %v2003_v28  ;;  %v1448_v17 = vadd.f32 %v1435_v45, %v1276_v26 }
 0x167   : > { %v1578_v61 = vadd.f32 %v1565_v9, %v1448_v17 }
 0x169   : > { %1588 = vst [vmem:[%s3420_s7 + $0x40] sm:$0xff] %v1578_v61  ;;  %v1979_v11 = vmul.f32 %v2639_v52, %v1578_v61 }
 0x16a   : > { %v1265_v43 = vpop.f32.mrf.mxu2 }
 0x16b   : > { %v1988_v56 = vadd.f32 %v1987_v50, %v1979_v11  ;;  %v2004_v62 = vmul.f32 %v1979_v11, %v1578_v61  ;;  %v1277_v38 = vadd.f32 %v1265_v43, %v1113_v23 }
 0x16d   : > { %v2013_v36 = vadd.f32 %v2012_v31, %v2004_v62  ;;  %v1449_v57 = vadd.f32 %v1437_v24, %v1277_v38 }
 0x16f   : > { %v1579_v60 = vadd.f32 %v1567_v33, %v1449_v57 }
 0x171   : > { %1589 = vst [vmem:[%s3420_s7 + $0x48] sm:$0xff] %v1579_v60  ;;  %v1980_v63 = vmul.f32 %v2640_v35, %v1579_v60 }
 0x173   : > { %v1989_v0 = vadd.f32 %v1988_v56, %v1980_v63  ;;  %v2005_v48 = vmul.f32 %v1980_v63, %v1579_v60 }
 0x175   : > { %v1990_v46 = vrot.slane %v1989_v0, 4  ;;  %v2014_v14 = vadd.f32 %v2013_v36, %v2005_v48 }
 0x177   : > { %v1991_v58 = vadd.f32 %v1990_v46, %v1989_v0  ;;  %v2015_v21 = vrot.slane %v2014_v14, 4 }
 0x179   : > { %v1992_v5 = vrot.slane %v1991_v58, 2  ;;  %v2016_v2 = vadd.f32 %v2015_v21, %v2014_v14 }
 0x17b   : > { %v1993_v8 = vadd.f32 %v1992_v5, %v1991_v58  ;;  %v2017_v55 = vrot.slane %v2016_v2, 2 }
 0x17d   : > { %v1994_v6 = vrot.slane %v1993_v8, 1  ;;  %v2018_v22 = vadd.f32 %v2017_v55, %v2016_v2 }
 0x17f   : > { %v2019_v1 = vrot.slane %v2018_v22, 1  ;;  %v1995_v4 = vadd.f32 %v1994_v6, %v1993_v8 }
 0x181   : > { %v2020_v7 = vadd.f32 %v2019_v1, %v2018_v22 }
 0x183   : > { %v2022_v3 = vsel %vm2021_vm2, %v1995_v4, %v2020_v7 }
 0x184   : > { %2023 = vst [vmem:[%s226_s11] sm:$0x3] %v2022_v3 }
 0x185 PF: > { %s14_s14 = sadd.s32 1, %s2800_s14   ;;  %s3631_s12 = smov %s2796_s13 }
 0x186   : > { %p11_p5 = scmp.ge.s32.totalorder %s14_s14, 4   ;;  %s3632_s13 = smov %s3634_s15 }
 0x188   :  { %13 = sbr.rel (!%p11_p5) target bundleno = 2 (0x2), region = 81 }

</bundles_post_ra>
